<compile_context>
chip_gen: v7x
topology: tpu7x:2x2x1
jax: 0.10.0
libtpu: 0.0.40
codegen_flags: <defaults>
</compile_context>

<pallas_src>
import functools

import jax
import jax.numpy as jnp
from jax import lax
from jax.experimental import pallas as pl
from jax.experimental.pallas import tpu as pltpu

FPAD = 128  # all feature widths are zero-padded to one lane-dense 128-wide slab

# Explicit scoped-VMEM limit: raises v5e's 16 MiB default, matches v6e/v7x
# defaults, and leaves headroom under v7x's 64 MiB physical VMEM.
VMEM_LIMIT_BYTES = 32 * 1024 * 1024


def _num_tensorcores_per_chip():
    """2 on v7x-class chips (megacore), 1 on v5e/v6e. Best-effort detection."""
    try:
        kind = jax.devices()[0].device_kind.lower().replace(" ", "")
    except Exception:
        return 1
    return 2 if ("v7" in kind or "tpu7" in kind) else 1


_NUM_TC = _num_tensorcores_per_chip()


def _round_up(x, m):
    return ((x + m - 1) // m) * m


def _pick_tile_s(sp, kp, allow_split=True):
    """Row tile (multiple of 16) for the fused kernels.

    Sized so the dominant per-step slab (the f32 [tile, Kp, 128] intermediate /
    f32-equivalent feature block) is ~4 MiB: measured tile-size data puts
    multi-MiB tiles near the HBM roofline while ~1 MiB tiles lose 15-40%.
    With bf16 inputs double-buffered this stays well under the 32 MiB limit.
    """
    cap = max(16, ((4 << 20) // (kp * FPAD * 4)) // 16 * 16)
    tile = min(sp, cap)
    while sp % tile:
        tile -= 16
    # Split into >=2 grid blocks only where there are 2 TensorCores (v7x);
    # on single-TC chips the split is a serial loop that just adds overhead.
    if (allow_split and _NUM_TC >= 2 and tile == sp
            and sp >= 32 and (sp // 2) % 16 == 0):
        tile = sp // 2
    return tile


# ----------------------------------------------------------------------------
# Fused encoder level:
#   relu(rel_xyz @ Wr + feat @ Wf + b) * mask  ->  max over K
# rel slab carries [x, y, z, mask] in its 4 channels; feat/Wf are bf16 (MXU).
# ----------------------------------------------------------------------------
def _enc_level_kernel(*refs, has_feat):
    it = iter(refs)
    rel_ref = next(it)                         # [T, Kp, 4] f32 (xyz + mask)
    feat_ref = next(it) if has_feat else None  # [T, Kp, FPAD] bf16
    wr_ref = next(it)                          # [3, FPAD] f32
    wf_ref = next(it) if has_feat else None    # [FPAD, FPAD] bf16
    b_ref = next(it)                           # [1, FPAD] f32
    o_ref = next(it)                           # [T, FPAD] bf16

    rel = rel_ref[...]
    wr = wr_ref[...]
    # 3-deep xyz contraction stays on the VPU (too shallow for the MXU); it is
    # hidden under the feat-slab DMA on the HBM-bound levels.
    y = (rel[:, :, 0:1] * wr[0:1, :]
         + rel[:, :, 1:2] * wr[1:2, :]
         + rel[:, :, 2:3] * wr[2:3, :])                         # [T, Kp, FPAD] f32

    if has_feat:
        T, K, fin = feat_ref.shape
        feat = feat_ref[...].reshape(T * K, fin)                # layout-free (K % 16 == 0)
        y = y + jnp.dot(feat, wf_ref[...],
                        preferred_element_type=jnp.float32).reshape(T, K, FPAD)

    y = jnp.maximum(y + b_ref[...], 0.0)                        # ReLU (>= 0)
    # Multiplicative post-ReLU mask (channel 3 of rel): identical to a masked
    # max for non-negative values and pools fully-masked groups to 0.
    y = y * rel[:, :, 3:4]
    o_ref[...] = jnp.max(y, axis=1).astype(o_ref.dtype)         # pool over K


def encoder_level(rel, feat, mask, w_rel, w_feat, bias):
    """rel: [S, K, 3] f32; feat: [S, K, FPAD] (any float) or None;
    mask: [S, K] or None. Returns pooled bf16 features [S, FPAD] in one
    fused pallas_call."""
    S, K, _ = rel.shape
    if mask is None:
        mask = jnp.ones((S, K), jnp.float32)
    mask = mask.astype(jnp.float32)
    rel4 = jnp.concatenate(
        [rel.astype(jnp.float32), mask[:, :, None]], axis=-1)    # [S, K, 4]

    Kp = _round_up(K, 16 if feat is not None else 8)
    if Kp != K:
        # padded K entries get mask==0 -> never win the max pool
        rel4 = jnp.pad(rel4, ((0, 0), (0, Kp - K), (0, 0)))
        if feat is not None:
            feat = jnp.pad(feat, ((0, 0), (0, Kp - K), (0, 0)))

    Sp = _round_up(S, 16)
    if Sp != S:
        rel4 = jnp.pad(rel4, ((0, Sp - S), (0, 0), (0, 0)))
        if feat is not None:
            feat = jnp.pad(feat, ((0, Sp - S), (0, 0), (0, 0)))

    tile = _pick_tile_s(Sp, Kp)
    grid = (Sp // tile,)

    args = [rel4]
    in_specs = [pl.BlockSpec((tile, Kp, 4), lambda i: (i, 0, 0))]
    if feat is not None:
        args.append(feat.astype(jnp.bfloat16))
        in_specs.append(pl.BlockSpec((tile, Kp, FPAD), lambda i: (i, 0, 0)))
    args.append(w_rel)
    in_specs.append(pl.BlockSpec((3, FPAD), lambda i: (0, 0)))
    if feat is not None:
        args.append(w_feat)                                      # bf16 (host pre-cast)
        in_specs.append(pl.BlockSpec((FPAD, FPAD), lambda i: (0, 0)))
    args.append(bias)
    in_specs.append(pl.BlockSpec((1, FPAD), lambda i: (0, 0)))

    out = pl.pallas_call(
        functools.partial(_enc_level_kernel, has_feat=feat is not None),
        out_shape=jax.ShapeDtypeStruct((Sp, FPAD), jnp.bfloat16),
        grid=grid,
        in_specs=in_specs,
        out_specs=pl.BlockSpec((tile, FPAD), lambda i: (i, 0)),
        compiler_params=pltpu.CompilerParams(
            dimension_semantics=("parallel",),
            vmem_limit_bytes=VMEM_LIMIT_BYTES),
    )(*args)
    return out[:S]


# ----------------------------------------------------------------------------
# Fused decoder MLP chain: dec1_pts/dec1_h -> dec2_pts/dec2_h -> dec3_pts
# Each output row packs [hidden | points | zero-pad] into a 128-wide slab.
# w2/w3 are zero-padded to [128, 128] so the full relu(y) slab feeds the next
# MXU matmul without any lane slicing (extra rows are zero -> identical math).
# ----------------------------------------------------------------------------
def _dec_chain_kernel(lat_ref, w1_ref, w2_ref, w3_ref, b_ref,
                      y1_ref, y2_ref, y3_ref):
    bf16 = jnp.bfloat16
    lat = lat_ref[...]                                           # bf16
    y1 = jnp.dot(lat, w1_ref[...],
                 preferred_element_type=jnp.float32) + b_ref[0:1, :]
    h1 = jnp.maximum(y1, 0.0).astype(bf16)                       # full 128-lane slab
    y2 = jnp.dot(h1, w2_ref[...],
                 preferred_element_type=jnp.float32) + b_ref[1:2, :]
    h2 = jnp.maximum(y2, 0.0).astype(bf16)
    y3 = jnp.dot(h2, w3_ref[...],
                 preferred_element_type=jnp.float32) + b_ref[2:3, :]
    y1_ref[...] = y1
    y2_ref[...] = y2
    y3_ref[...] = y3


def decoder_chain(latent, w1, w2, w3, b):
    """latent: [B, FPAD] -> (y1, y2, y3), each [B, FPAD] f32; the whole folding
    MLP chain in one pallas_call (h1/h2 never leave VMEM)."""
    B = latent.shape[0]
    Bp = _round_up(B, 16)
    lat = jnp.pad(latent, ((0, Bp - B), (0, 0))) if Bp != B else latent
    lat = lat.astype(jnp.bfloat16)
    tile = _pick_tile_s(Bp, 8, allow_split=False)   # Bp is tiny; never split
    grid = (Bp // tile,)
    row_spec = pl.BlockSpec((tile, FPAD), lambda i: (i, 0))
    y_shape = jax.ShapeDtypeStruct((Bp, FPAD), jnp.float32)
    y1, y2, y3 = pl.pallas_call(
        _dec_chain_kernel,
        out_shape=(y_shape, y_shape, y_shape),
        grid=grid,
        in_specs=[
            row_spec,
            pl.BlockSpec((FPAD, FPAD), lambda i: (0, 0)),
            pl.BlockSpec((FPAD, FPAD), lambda i: (0, 0)),
            pl.BlockSpec((FPAD, FPAD), lambda i: (0, 0)),
            pl.BlockSpec((3, FPAD), lambda i: (0, 0)),
        ],
        out_specs=(row_spec, row_spec, row_spec),
        compiler_params=pltpu.CompilerParams(
            dimension_semantics=("parallel",),
            vmem_limit_bytes=VMEM_LIMIT_BYTES),
    )(lat, w1, w2, w3, b)
    return y1[:B], y2[:B], y3[:B]


# ----------------------------------------------------------------------------
# Plain-JAX glue: FPS, capped radius search (data-dependent / ragged)
# ----------------------------------------------------------------------------
def farthest_point_sampling(points, n_samples):
    """points: [B, N, 3] -> sample indices [B, n_samples] (deterministic start)."""
    def one(pts):
        N = pts.shape[0]

        def body(i, state):
            sel, dists = state
            last = pts[sel[i - 1]]
            d = jnp.sum((pts - last[None, :]) ** 2, axis=-1)
            dists = jnp.minimum(dists, d)
            nxt = jnp.argmax(dists).astype(jnp.int32)
            sel = sel.at[i].set(nxt)
            return sel, dists

        sel0 = jnp.zeros((n_samples,), jnp.int32)
        dists0 = jnp.full((N,), jnp.inf, jnp.float32)
        sel, _ = lax.fori_loop(1, n_samples, body, (sel0, dists0))
        return sel

    return jax.vmap(one)(points)


def radius_neighbors(x, y, r, k):
    """Capped radius search (k nearest candidates within r, via lax.top_k).
    x: [B, Nx, 3] candidates, y: [B, Ny, 3] queries.
    Returns indices [B, Ny, k] into Nx and a validity mask [B, Ny, k]."""
    k = min(k, x.shape[1])
    d2 = jnp.sum((y[:, :, None, :] - x[:, None, :, :]) ** 2, axis=-1)
    d2 = jnp.where(d2 <= r * r, d2, jnp.inf)
    vals, idx = lax.top_k(-d2, k)          # k smallest distances
    mask = jnp.isfinite(vals)
    idx = jnp.where(mask, idx, 0)
    return idx.astype(jnp.int32), mask


# ----------------------------------------------------------------------------
# Parameters (feature dims zero-padded to FPAD=128; matmul weights in bf16)
# ----------------------------------------------------------------------------
def init_params(key, f1, f2, f3, n1, n2, n3):
    ks = jax.random.split(key, 10)
    bf16 = jnp.bfloat16

    def lin(k, fi, fo):
        return (jax.random.normal(k, (fi, fo), jnp.float32)
                / jnp.sqrt(jnp.float32(fi)))

    def embed(w, rows, cols):
        return jnp.zeros((rows, cols), jnp.float32).at[
            :w.shape[0], :w.shape[1]].set(w)

    p = {
        "enc1_wr": embed(lin(ks[0], 3, f1), 3, FPAD),
        "enc2_wr": embed(lin(ks[1], 3, f2), 3, FPAD),
        "enc2_wf": embed(lin(ks[2], f1, f2), FPAD, FPAD).astype(bf16),
        "enc3_wr": embed(lin(ks[3], 3, f3), 3, FPAD),
        "enc3_wf": embed(lin(ks[4], f2, f3), FPAD, FPAD).astype(bf16),
        "enc1_b": jnp.zeros((1, FPAD), jnp.float32),
        "enc2_b": jnp.zeros((1, FPAD), jnp.float32),
        "enc3_b": jnp.zeros((1, FPAD), jnp.float32),
    }
    # decoder weights, fused [hidden | points | zero-pad] column layout;
    # w2/w3 are [FPAD, FPAD] with zero rows past their true fan-in so the
    # kernel can feed the full 128-lane relu slab into the MXU.
    w1 = jnp.zeros((FPAD, FPAD), jnp.float32)
    w1 = w1.at[:f3, :f2].set(lin(ks[5], f3, f2))                  # dec1_h
    w1 = w1.at[:f3, f2:f2 + n1 * 3].set(lin(ks[6], f3, n1 * 3))   # dec1_pts
    w2 = jnp.zeros((FPAD, FPAD), jnp.float32)
    w2 = w2.at[:f2, :f1].set(lin(ks[7], f2, f1))                  # dec2_h
    w2 = w2.at[:f2, f1:f1 + n2 * 3].set(lin(ks[8], f2, n2 * 3))   # dec2_pts
    w3 = jnp.zeros((FPAD, FPAD), jnp.float32)
    w3 = w3.at[:f1, :n3 * 3].set(lin(ks[9], f1, n3 * 3))          # dec3_pts
    p["dec_w1"] = w1.astype(bf16)
    p["dec_w2"] = w2.astype(bf16)
    p["dec_w3"] = w3.astype(bf16)
    p["dec_b"] = jnp.zeros((3, FPAD), jnp.float32)
    return p


# ----------------------------------------------------------------------------
# Network
# ----------------------------------------------------------------------------
class FullNetworkPallas:
    def __init__(self, ratio1=1 / 25, ratio2=1 / 16, nb_neighs3=9,
                 radius1=0.23, radius2=1.1, radius3=2.0,
                 feats1=20, feats2=30, feats3=80,
                 k1=16, k2=16, key=jax.random.PRNGKey(42)):
        self.ratio1 = ratio1
        self.nb_neighs1 = int(1 / ratio1)
        self.ratio2 = ratio2
        self.nb_neighs2 = int(1 / ratio2)
        self.nb_neighs3 = nb_neighs3
        self.radius1, self.radius2, self.radius3 = radius1, radius2, radius3
        self.feats1, self.feats2, self.feats3 = feats1, feats2, feats3
        self.k1, self.k2 = k1, k2
        assert max(feats1, feats2, feats3) <= FPAD
        assert feats2 + self.nb_neighs3 * 3 <= FPAD
        assert feats1 + self.nb_neighs2 * 3 <= FPAD
        assert self.nb_neighs1 * 3 <= FPAD
        # decoder: nb_neighs1=self.nb_neighs3, nb_neighs2=self.nb_neighs2,
        #          nb_neighs3=self.nb_neighs1  (mirrors the torch module)
        self.params = init_params(key, feats1, feats2, feats3,
                                  n1=self.nb_neighs3,
                                  n2=self.nb_neighs2,
                                  n3=self.nb_neighs1)
        self._fwd_cache = {}

    # ------------------------------------------------------------------ #
    def _forward(self, points, params, *, B, N):
        pts = points.reshape(B, N, 3).astype(jnp.float32)
        p = params

        # ------------------ sampling / grouping (glue) ------------------
        S1 = max(1, int(round(N * self.ratio1)))
        idx1 = farthest_point_sampling(pts, S1)                       # [B, S1]
        samples = jnp.take_along_axis(pts, idx1[:, :, None], axis=1)  # [B, S1, 3]

        nbr1, mask1 = radius_neighbors(pts, samples, self.radius1, self.k1)
        k1 = nbr1.shape[-1]
        rad_points = jnp.take_along_axis(
            pts, nbr1.reshape(B, S1 * k1, 1), axis=1).reshape(B, S1, k1, 3)
        relative = (rad_points - samples[:, :, None, :]) / self.radius1

        S2 = max(1, int(round(S1 * self.ratio2)))
        idx2 = farthest_point_sampling(samples, S2)                   # [B, S2]
        samples2 = jnp.take_along_axis(samples, idx2[:, :, None], axis=1)

        nbr2, mask2 = radius_neighbors(samples, samples2, self.radius2, self.k2)
        k2 = nbr2.shape[-1]
        rad2_points = jnp.take_along_axis(
            samples, nbr2.reshape(B, S2 * k2, 1), axis=1).reshape(B, S2, k2, 3)
        relative2 = (rad2_points - samples2[:, :, None, :]) / self.radius2
        relative3 = samples2 / self.radius3

        # -------------- encoder (fused Pallas, one call per level) ------------
        f1 = encoder_level(relative.reshape(B * S1, k1, 3), None,
                           mask1.reshape(B * S1, k1),
                           p["enc1_wr"], None, p["enc1_b"])       # [B*S1,128] bf16
        f1 = f1.reshape(B, S1, FPAD)

        f1_nbr = jnp.take_along_axis(                              # bf16 gather
            f1, nbr2.reshape(B, S2 * k2, 1), axis=1).reshape(B * S2, k2, FPAD)
        f2 = encoder_level(relative2.reshape(B * S2, k2, 3), f1_nbr,
                           mask2.reshape(B * S2, k2),
                           p["enc2_wr"], p["enc2_wf"], p["enc2_b"])  # [B*S2,128]
        f2 = f2.reshape(B, S2, FPAD)

        latent = encoder_level(relative3, f2, None,
                               p["enc3_wr"], p["enc3_wf"], p["enc3_b"])  # [B,128]

        # ------------------ decoder (fused Pallas chain) ------------------
        n1, n2, n3 = self.nb_neighs3, self.nb_neighs2, self.nb_neighs1
        fe1, fe2 = self.feats1, self.feats2
        y1, y2, y3 = decoder_chain(latent, p["dec_w1"], p["dec_w2"],
                                   p["dec_w3"], p["dec_b"])

        d1 = y1[:, fe2:fe2 + n1 * 3].reshape(B, n1, 1, 1, 3)   # dec1 points
        d2 = y2[:, fe1:fe1 + n2 * 3].reshape(B, 1, n2, 1, 3)   # dec2 points
        d3 = y3[:, :n3 * 3].reshape(B, 1, 1, n3, 3)            # dec3 points

        # ---- reconstruction (repeat_interleave + scale + add): tiny elementwise
        #      broadcast; left to XLA fusion instead of a lane-sparse Pallas call.
        points_out = (d1 * self.radius3 + d2 * self.radius2 + d3 * self.radius1)
        points_out = points_out.reshape(B * n1 * n2 * n3, 3)

        batch_out = jnp.repeat(jnp.arange(B, dtype=jnp.int32), n1 * n2 * n3)
        return points_out, batch_out

    # ------------------------------------------------------------------ #
    def __call__(self, points, batch, batch_size=None):
        # points: [B*N, 3] float32; batch: [B*N] int32, sorted, equal counts.
        if batch_size is None:
            # single 4-byte scalar read to fix the static batch size; the whole
            # forward below is jit-compiled (cached per (B, N)).
            batch_size = int(jax.device_get(batch[-1])) + 1
        B = int(batch_size)
        N = points.shape[0] // B
        fwd = self._fwd_cache.get((B, N))
        if fwd is None:
            fwd = jax.jit(functools.partial(self._forward, B=B, N=N))
            self._fwd_cache[(B, N)] = fwd
        return fwd(points, self.params)


# ----------------------------------------------------------------------------
if __name__ == "__main__":
    key = jax.random.PRNGKey(0)
    B = 2
    net = FullNetworkPallas(ratio1=1 / 4, ratio2=1 / 4, nb_neighs3=4,
                            radius1=0.23, radius2=1.1, radius3=2.0,
                            feats1=20, feats2=30, feats3=80,
                            k1=8, k2=8, key=jax.random.PRNGKey(42))
    N = net.nb_neighs1 * net.nb_neighs2 * net.nb_neighs3   # 64 points per cloud
    pts_key, _ = jax.random.split(key)
    points = jax.random.uniform(pts_key, (B * N, 3), jnp.float32)
    batch = jnp.repeat(jnp.arange(B, dtype=jnp.int32), N)

    points_out, batch_out = net(points, batch)
    jax.block_until_ready(points_out)
    jax.block_until_ready(batch_out)

    n_out = B * net.nb_neighs1 * net.nb_neighs2 * net.nb_neighs3
    assert points_out.shape == (n_out, 3), points_out.shape
    assert batch_out.shape == (n_out,), batch_out.shape
    assert bool(jnp.all(jnp.isfinite(points_out)))
    print("KERNEL_OK")
</pallas_src>

<mosaic_0001>
module attributes {stable_mosaic.version = 11 : i64} {
  func.func @_enc_level_kernel(%arg0: i32, %arg1: memref<32x8x4xf32, #tpu.memory_space<vmem>>, %arg2: memref<3x128xf32, #tpu.memory_space<vmem>>, %arg3: memref<1x128xf32, #tpu.memory_space<vmem>>, %arg4: memref<32x128xbf16, #tpu.memory_space<vmem>>) attributes {dimension_semantics = [#tpu.dimension_semantics<parallel>], iteration_bounds = array<i64: 1>, scalar_prefetch = 0 : i64, scratch_operands = 0 : i64, tpu.core_type = #tpu.core_type<tc>, window_params = [{transform_indices = @transform_0, window_bounds = array<i64: 32, 8, 4>}, {pipeline_mode = #tpu.pipeline_mode<synchronous>, transform_indices = @transform_1, window_bounds = array<i64: 3, 128>}, {pipeline_mode = #tpu.pipeline_mode<synchronous>, transform_indices = @transform_2, window_bounds = array<i64: 1, 128>}, {transform_indices = @transform_3, window_bounds = array<i64: 32, 128>}]} {
    %c0 = arith.constant 0 : index
    %c0_0 = arith.constant 0 : index
    %c0_1 = arith.constant 0 : index
    %0 = vector.load %arg1[%c0, %c0_0, %c0_1] : memref<32x8x4xf32, #tpu.memory_space<vmem>>, vector<32x8x4xf32>
    %c0_2 = arith.constant 0 : index
    %c0_3 = arith.constant 0 : index
    %1 = vector.load %arg2[%c0_2, %c0_3] : memref<3x128xf32, #tpu.memory_space<vmem>>, vector<3x128xf32>
    %2 = vector.extract_strided_slice %0 {offsets = [0, 0, 0], sizes = [32, 8, 1], strides = [1, 1, 1]} : vector<32x8x4xf32> to vector<32x8x1xf32>
    %3 = vector.extract_strided_slice %1 {offsets = [0, 0], sizes = [1, 128], strides = [1, 1]} : vector<3x128xf32> to vector<1x128xf32>
    %4 = vector.shape_cast %3 : vector<1x128xf32> to vector<1x1x128xf32>
    %5 = vector.broadcast %2 : vector<32x8x1xf32> to vector<32x8x128xf32>
    %6 = vector.broadcast %4 : vector<1x1x128xf32> to vector<32x8x128xf32>
    %7 = arith.mulf %5, %6 : vector<32x8x128xf32>
    %8 = vector.extract_strided_slice %0 {offsets = [0, 0, 1], sizes = [32, 8, 1], strides = [1, 1, 1]} : vector<32x8x4xf32> to vector<32x8x1xf32>
    %9 = vector.extract_strided_slice %1 {offsets = [1, 0], sizes = [1, 128], strides = [1, 1]} : vector<3x128xf32> to vector<1x128xf32>
    %10 = vector.shape_cast %9 : vector<1x128xf32> to vector<1x1x128xf32>
    %11 = vector.broadcast %8 : vector<32x8x1xf32> to vector<32x8x128xf32>
    %12 = vector.broadcast %10 : vector<1x1x128xf32> to vector<32x8x128xf32>
    %13 = arith.mulf %11, %12 : vector<32x8x128xf32>
    %14 = arith.addf %7, %13 : vector<32x8x128xf32>
    %15 = vector.extract_strided_slice %0 {offsets = [0, 0, 2], sizes = [32, 8, 1], strides = [1, 1, 1]} : vector<32x8x4xf32> to vector<32x8x1xf32>
    %16 = vector.extract_strided_slice %1 {offsets = [2, 0], sizes = [1, 128], strides = [1, 1]} : vector<3x128xf32> to vector<1x128xf32>
    %17 = vector.shape_cast %16 : vector<1x128xf32> to vector<1x1x128xf32>
    %18 = vector.broadcast %15 : vector<32x8x1xf32> to vector<32x8x128xf32>
    %19 = vector.broadcast %17 : vector<1x1x128xf32> to vector<32x8x128xf32>
    %20 = arith.mulf %18, %19 : vector<32x8x128xf32>
    %21 = arith.addf %14, %20 : vector<32x8x128xf32>
    %c0_4 = arith.constant 0 : index
    %c0_5 = arith.constant 0 : index
    %22 = vector.load %arg3[%c0_4, %c0_5] : memref<1x128xf32, #tpu.memory_space<vmem>>, vector<1x128xf32>
    %23 = vector.shape_cast %22 : vector<1x128xf32> to vector<1x1x128xf32>
    %24 = vector.broadcast %23 : vector<1x1x128xf32> to vector<32x8x128xf32>
    %25 = arith.addf %21, %24 : vector<32x8x128xf32>
    %cst = arith.constant 0.000000e+00 : f32
    %26 = vector.broadcast %cst : f32 to vector<32x8x128xf32>
    %27 = arith.maximumf %25, %26 : vector<32x8x128xf32>
    %28 = vector.extract_strided_slice %0 {offsets = [0, 0, 3], sizes = [32, 8, 1], strides = [1, 1, 1]} : vector<32x8x4xf32> to vector<32x8x1xf32>
    %29 = vector.broadcast %28 : vector<32x8x1xf32> to vector<32x8x128xf32>
    %30 = arith.mulf %27, %29 : vector<32x8x128xf32>
    %cst_6 = arith.constant dense<0xFF800000> : vector<32x128xf32>
    %31 = vector.multi_reduction <maximumf>, %30, %cst_6 [1] : vector<32x8x128xf32> to vector<32x128xf32>
    %32 = arith.truncf %31 : vector<32x128xf32> to vector<32x128xbf16>
    %c0_7 = arith.constant 0 : index
    %c0_8 = arith.constant 0 : index
    %33 = vector.load %arg4[%c0_7, %c0_8] : memref<32x128xbf16, #tpu.memory_space<vmem>>, vector<32x128xbf16>
    tpu.vector_store %arg4[%c0_7, %c0_8], %32 {strides = array<i32>} : memref<32x128xbf16, #tpu.memory_space<vmem>>, vector<32x128xbf16>,
    return
  }
  func.func @transform_0(%arg0: i32) -> (i32, i32, i32) {
    %c0_i32 = arith.constant 0 : i32
    %c0_i32_0 = arith.constant 0 : i32
    %c0_i32_1 = arith.constant 0 : i32
    return %arg0, %c0_i32, %c0_i32_0 : i32, i32, i32
  }
  func.func @transform_1(%arg0: i32) -> (i32, i32) {
    %c0_i32 = arith.constant 0 : i32
    %c0_i32_0 = arith.constant 0 : i32
    %c0_i32_1 = arith.constant 0 : i32
    return %c0_i32, %c0_i32_0 : i32, i32
  }
  func.func @transform_2(%arg0: i32) -> (i32, i32) {
    %c0_i32 = arith.constant 0 : i32
    %c0_i32_0 = arith.constant 0 : i32
    %c0_i32_1 = arith.constant 0 : i32
    return %c0_i32, %c0_i32_0 : i32, i32
  }
  func.func @transform_3(%arg0: i32) -> (i32, i32) {
    %c0_i32 = arith.constant 0 : i32
    %c0_i32_0 = arith.constant 0 : i32
    return %arg0, %c0_i32 : i32, i32
  }
}

module attributes {stable_mosaic.version = 11 : i64} {
  func.func @_enc_level_kernel(%arg0: i32, %arg1: memref<16x16x4xf32, #tpu.memory_space<vmem>>, %arg2: memref<16x16x128xbf16, #tpu.memory_space<vmem>>, %arg3: memref<3x128xf32, #tpu.memory_space<vmem>>, %arg4: memref<128x128xbf16, #tpu.memory_space<vmem>>, %arg5: memref<1x128xf32, #tpu.memory_space<vmem>>, %arg6: memref<16x128xbf16, #tpu.memory_space<vmem>>) attributes {dimension_semantics = [#tpu.dimension_semantics<parallel>], iteration_bounds = array<i64: 1>, scalar_prefetch = 0 : i64, scratch_operands = 0 : i64, tpu.core_type = #tpu.core_type<tc>, window_params = [{transform_indices = @transform_0, window_bounds = array<i64: 16, 16, 4>}, {transform_indices = @transform_1, window_bounds = array<i64: 16, 16, 128>}, {pipeline_mode = #tpu.pipeline_mode<synchronous>, transform_indices = @transform_2, window_bounds = array<i64: 3, 128>}, {pipeline_mode = #tpu.pipeline_mode<synchronous>, transform_indices = @transform_3, window_bounds = array<i64: 128, 128>}, {pipeline_mode = #tpu.pipeline_mode<synchronous>, transform_indices = @transform_4, window_bounds = array<i64: 1, 128>}, {transform_indices = @transform_5, window_bounds = array<i64: 16, 128>}]} {
    %c0 = arith.constant 0 : index
    %c0_0 = arith.constant 0 : index
    %c0_1 = arith.constant 0 : index
    %0 = vector.load %arg1[%c0, %c0_0, %c0_1] : memref<16x16x4xf32, #tpu.memory_space<vmem>>, vector<16x16x4xf32>
    %c0_2 = arith.constant 0 : index
    %c0_3 = arith.constant 0 : index
    %1 = vector.load %arg3[%c0_2, %c0_3] : memref<3x128xf32, #tpu.memory_space<vmem>>, vector<3x128xf32>
    %2 = vector.extract_strided_slice %0 {offsets = [0, 0, 0], sizes = [16, 16, 1], strides = [1, 1, 1]} : vector<16x16x4xf32> to vector<16x16x1xf32>
    %3 = vector.extract_strided_slice %1 {offsets = [0, 0], sizes = [1, 128], strides = [1, 1]} : vector<3x128xf32> to vector<1x128xf32>
    %4 = vector.shape_cast %3 : vector<1x128xf32> to vector<1x1x128xf32>
    %5 = vector.broadcast %2 : vector<16x16x1xf32> to vector<16x16x128xf32>
    %6 = vector.broadcast %4 : vector<1x1x128xf32> to vector<16x16x128xf32>
    %7 = arith.mulf %5, %6 : vector<16x16x128xf32>
    %8 = vector.extract_strided_slice %0 {offsets = [0, 0, 1], sizes = [16, 16, 1], strides = [1, 1, 1]} : vector<16x16x4xf32> to vector<16x16x1xf32>
    %9 = vector.extract_strided_slice %1 {offsets = [1, 0], sizes = [1, 128], strides = [1, 1]} : vector<3x128xf32> to vector<1x128xf32>
    %10 = vector.shape_cast %9 : vector<1x128xf32> to vector<1x1x128xf32>
    %11 = vector.broadcast %8 : vector<16x16x1xf32> to vector<16x16x128xf32>
    %12 = vector.broadcast %10 : vector<1x1x128xf32> to vector<16x16x128xf32>
    %13 = arith.mulf %11, %12 : vector<16x16x128xf32>
    %14 = arith.addf %7, %13 : vector<16x16x128xf32>
    %15 = vector.extract_strided_slice %0 {offsets = [0, 0, 2], sizes = [16, 16, 1], strides = [1, 1, 1]} : vector<16x16x4xf32> to vector<16x16x1xf32>
    %16 = vector.extract_strided_slice %1 {offsets = [2, 0], sizes = [1, 128], strides = [1, 1]} : vector<3x128xf32> to vector<1x128xf32>
    %17 = vector.shape_cast %16 : vector<1x128xf32> to vector<1x1x128xf32>
    %18 = vector.broadcast %15 : vector<16x16x1xf32> to vector<16x16x128xf32>
    %19 = vector.broadcast %17 : vector<1x1x128xf32> to vector<16x16x128xf32>
    %20 = arith.mulf %18, %19 : vector<16x16x128xf32>
    %21 = arith.addf %14, %20 : vector<16x16x128xf32>
    %c0_4 = arith.constant 0 : index
    %c0_5 = arith.constant 0 : index
    %c0_6 = arith.constant 0 : index
    %22 = vector.load %arg2[%c0_4, %c0_5, %c0_6] : memref<16x16x128xbf16, #tpu.memory_space<vmem>>, vector<16x16x128xbf16>
    %23 = vector.shape_cast %22 : vector<16x16x128xbf16> to vector<256x128xbf16>
    %c0_7 = arith.constant 0 : index
    %c0_8 = arith.constant 0 : index
    %24 = vector.load %arg4[%c0_7, %c0_8] : memref<128x128xbf16, #tpu.memory_space<vmem>>, vector<128x128xbf16>
    %cst = arith.constant dense<0.000000e+00> : vector<256x128xf32>
    %25 = tpu.matmul %23, %24, %cst {dimension_numbers = #tpu.dot_dimension_numbers<[1], [0], [0], [1], [0, 0, 1, 1], [], []>} : vector<256x128xbf16>, vector<128x128xbf16>, vector<256x128xf32> -> vector<256x128xf32>
    %26 = vector.shape_cast %25 : vector<256x128xf32> to vector<16x16x128xf32>
    %27 = arith.addf %21, %26 : vector<16x16x128xf32>
    %c0_9 = arith.constant 0 : index
    %c0_10 = arith.constant 0 : index
    %28 = vector.load %arg5[%c0_9, %c0_10] : memref<1x128xf32, #tpu.memory_space<vmem>>, vector<1x128xf32>
    %29 = vector.shape_cast %28 : vector<1x128xf32> to vector<1x1x128xf32>
    %30 = vector.broadcast %29 : vector<1x1x128xf32> to vector<16x16x128xf32>
    %31 = arith.addf %27, %30 : vector<16x16x128xf32>
    %cst_11 = arith.constant 0.000000e+00 : f32
    %32 = vector.broadcast %cst_11 : f32 to vector<16x16x128xf32>
    %33 = arith.maximumf %31, %32 : vector<16x16x128xf32>
    %34 = vector.extract_strided_slice %0 {offsets = [0, 0, 3], sizes = [16, 16, 1], strides = [1, 1, 1]} : vector<16x16x4xf32> to vector<16x16x1xf32>
    %35 = vector.broadcast %34 : vector<16x16x1xf32> to vector<16x16x128xf32>
    %36 = arith.mulf %33, %35 : vector<16x16x128xf32>
    %cst_12 = arith.constant dense<0xFF800000> : vector<16x128xf32>
    %37 = vector.multi_reduction <maximumf>, %36, %cst_12 [1] : vector<16x16x128xf32> to vector<16x128xf32>
    %38 = arith.truncf %37 : vector<16x128xf32> to vector<16x128xbf16>
    %c0_13 = arith.constant 0 : index
    %c0_14 = arith.constant 0 : index
    %39 = vector.load %arg6[%c0_13, %c0_14] : memref<16x128xbf16, #tpu.memory_space<vmem>>, vector<16x128xbf16>
    tpu.vector_store %arg6[%c0_13, %c0_14], %38 {strides = array<i32>} : memref<16x128xbf16, #tpu.memory_space<vmem>>, vector<16x128xbf16>,
    return
  }
  func.func @transform_0(%arg0: i32) -> (i32, i32, i32) {
    %c0_i32 = arith.constant 0 : i32
    %c0_i32_0 = arith.constant 0 : i32
    %c0_i32_1 = arith.constant 0 : i32
    return %arg0, %c0_i32, %c0_i32_0 : i32, i32, i32
  }
  func.func @transform_1(%arg0: i32) -> (i32, i32, i32) {
    %c0_i32 = arith.constant 0 : i32
    %c0_i32_0 = arith.constant 0 : i32
    %c0_i32_1 = arith.constant 0 : i32
    return %arg0, %c0_i32, %c0_i32_0 : i32, i32, i32
  }
  func.func @transform_2(%arg0: i32) -> (i32, i32) {
    %c0_i32 = arith.constant 0 : i32
    %c0_i32_0 = arith.constant 0 : i32
    %c0_i32_1 = arith.constant 0 : i32
    return %c0_i32, %c0_i32_0 : i32, i32
  }
  func.func @transform_3(%arg0: i32) -> (i32, i32) {
    %c0_i32 = arith.constant 0 : i32
    %c0_i32_0 = arith.constant 0 : i32
    %c0_i32_1 = arith.constant 0 : i32
    return %c0_i32, %c0_i32_0 : i32, i32
  }
  func.func @transform_4(%arg0: i32) -> (i32, i32) {
    %c0_i32 = arith.constant 0 : i32
    %c0_i32_0 = arith.constant 0 : i32
    %c0_i32_1 = arith.constant 0 : i32
    return %c0_i32, %c0_i32_0 : i32, i32
  }
  func.func @transform_5(%arg0: i32) -> (i32, i32) {
    %c0_i32 = arith.constant 0 : i32
    %c0_i32_0 = arith.constant 0 : i32
    return %arg0, %c0_i32 : i32, i32
  }
}

module attributes {stable_mosaic.version = 11 : i64} {
  func.func @_dec_chain_kernel(%arg0: i32, %arg1: memref<16x128xbf16, #tpu.memory_space<vmem>>, %arg2: memref<128x128xbf16, #tpu.memory_space<vmem>>, %arg3: memref<128x128xbf16, #tpu.memory_space<vmem>>, %arg4: memref<128x128xbf16, #tpu.memory_space<vmem>>, %arg5: memref<3x128xf32, #tpu.memory_space<vmem>>, %arg6: memref<16x128xf32, #tpu.memory_space<vmem>>, %arg7: memref<16x128xf32, #tpu.memory_space<vmem>>, %arg8: memref<16x128xf32, #tpu.memory_space<vmem>>) attributes {dimension_semantics = [#tpu.dimension_semantics<parallel>], iteration_bounds = array<i64: 1>, scalar_prefetch = 0 : i64, scratch_operands = 0 : i64, tpu.core_type = #tpu.core_type<tc>, window_params = [{transform_indices = @transform_0, window_bounds = array<i64: 16, 128>}, {pipeline_mode = #tpu.pipeline_mode<synchronous>, transform_indices = @transform_1, window_bounds = array<i64: 128, 128>}, {pipeline_mode = #tpu.pipeline_mode<synchronous>, transform_indices = @transform_2, window_bounds = array<i64: 128, 128>}, {pipeline_mode = #tpu.pipeline_mode<synchronous>, transform_indices = @transform_3, window_bounds = array<i64: 128, 128>}, {pipeline_mode = #tpu.pipeline_mode<synchronous>, transform_indices = @transform_4, window_bounds = array<i64: 3, 128>}, {transform_indices = @transform_5, window_bounds = array<i64: 16, 128>}, {transform_indices = @transform_6, window_bounds = array<i64: 16, 128>}, {transform_indices = @transform_7, window_bounds = array<i64: 16, 128>}]} {
    %c0 = arith.constant 0 : index
    %c0_0 = arith.constant 0 : index
    %0 = vector.load %arg1[%c0, %c0_0] : memref<16x128xbf16, #tpu.memory_space<vmem>>, vector<16x128xbf16>
    %c0_1 = arith.constant 0 : index
    %c0_2 = arith.constant 0 : index
    %1 = vector.load %arg2[%c0_1, %c0_2] : memref<128x128xbf16, #tpu.memory_space<vmem>>, vector<128x128xbf16>
    %cst = arith.constant dense<0.000000e+00> : vector<16x128xf32>
    %2 = tpu.matmul %0, %1, %cst {dimension_numbers = #tpu.dot_dimension_numbers<[1], [0], [0], [1], [0, 0, 1, 1], [], []>} : vector<16x128xbf16>, vector<128x128xbf16>, vector<16x128xf32> -> vector<16x128xf32>
    %c0_3 = arith.constant 0 : index
    %c0_4 = arith.constant 0 : index
    %3 = vector.load %arg5[%c0_3, %c0_4] : memref<3x128xf32, #tpu.memory_space<vmem>>, vector<1x128xf32>
    %4 = vector.broadcast %3 : vector<1x128xf32> to vector<16x128xf32>
    %5 = arith.addf %2, %4 : vector<16x128xf32>
    %cst_5 = arith.constant 0.000000e+00 : f32
    %6 = vector.broadcast %cst_5 : f32 to vector<16x128xf32>
    %7 = arith.maximumf %5, %6 : vector<16x128xf32>
    %8 = arith.truncf %7 : vector<16x128xf32> to vector<16x128xbf16>
    %c0_6 = arith.constant 0 : index
    %c0_7 = arith.constant 0 : index
    %9 = vector.load %arg3[%c0_6, %c0_7] : memref<128x128xbf16, #tpu.memory_space<vmem>>, vector<128x128xbf16>
    %cst_8 = arith.constant dense<0.000000e+00> : vector<16x128xf32>
    %10 = tpu.matmul %8, %9, %cst_8 {dimension_numbers = #tpu.dot_dimension_numbers<[1], [0], [0], [1], [0, 0, 1, 1], [], []>} : vector<16x128xbf16>, vector<128x128xbf16>, vector<16x128xf32> -> vector<16x128xf32>
    %c1 = arith.constant 1 : index
    %c0_9 = arith.constant 0 : index
    %11 = vector.load %arg5[%c1, %c0_9] : memref<3x128xf32, #tpu.memory_space<vmem>>, vector<1x128xf32>
    %12 = vector.broadcast %11 : vector<1x128xf32> to vector<16x128xf32>
    %13 = arith.addf %10, %12 : vector<16x128xf32>
    %cst_10 = arith.constant 0.000000e+00 : f32
    %14 = vector.broadcast %cst_10 : f32 to vector<16x128xf32>
    %15 = arith.maximumf %13, %14 : vector<16x128xf32>
    %16 = arith.truncf %15 : vector<16x128xf32> to vector<16x128xbf16>
    %c0_11 = arith.constant 0 : index
    %c0_12 = arith.constant 0 : index
    %17 = vector.load %arg4[%c0_11, %c0_12] : memref<128x128xbf16, #tpu.memory_space<vmem>>, vector<128x128xbf16>
    %cst_13 = arith.constant dense<0.000000e+00> : vector<16x128xf32>
    %18 = tpu.matmul %16, %17, %cst_13 {dimension_numbers = #tpu.dot_dimension_numbers<[1], [0], [0], [1], [0, 0, 1, 1], [], []>} : vector<16x128xbf16>, vector<128x128xbf16>, vector<16x128xf32> -> vector<16x128xf32>
    %c2 = arith.constant 2 : index
    %c0_14 = arith.constant 0 : index
    %19 = vector.load %arg5[%c2, %c0_14] : memref<3x128xf32, #tpu.memory_space<vmem>>, vector<1x128xf32>
    %20 = vector.broadcast %19 : vector<1x128xf32> to vector<16x128xf32>
    %21 = arith.addf %18, %20 : vector<16x128xf32>
    %c0_15 = arith.constant 0 : index
    %c0_16 = arith.constant 0 : index
    %22 = vector.load %arg6[%c0_15, %c0_16] : memref<16x128xf32, #tpu.memory_space<vmem>>, vector<16x128xf32>
    tpu.vector_store %arg6[%c0_15, %c0_16], %5 {strides = array<i32>} : memref<16x128xf32, #tpu.memory_space<vmem>>, vector<16x128xf32>,
    %c0_17 = arith.constant 0 : index
    %c0_18 = arith.constant 0 : index
    %23 = vector.load %arg7[%c0_17, %c0_18] : memref<16x128xf32, #tpu.memory_space<vmem>>, vector<16x128xf32>
    tpu.vector_store %arg7[%c0_17, %c0_18], %13 {strides = array<i32>} : memref<16x128xf32, #tpu.memory_space<vmem>>, vector<16x128xf32>,
    %c0_19 = arith.constant 0 : index
    %c0_20 = arith.constant 0 : index
    %24 = vector.load %arg8[%c0_19, %c0_20] : memref<16x128xf32, #tpu.memory_space<vmem>>, vector<16x128xf32>
    tpu.vector_store %arg8[%c0_19, %c0_20], %21 {strides = array<i32>} : memref<16x128xf32, #tpu.memory_space<vmem>>, vector<16x128xf32>,
    return
  }
  func.func @transform_0(%arg0: i32) -> (i32, i32) {
    %c0_i32 = arith.constant 0 : i32
    %c0_i32_0 = arith.constant 0 : i32
    return %arg0, %c0_i32 : i32, i32
  }
  func.func @transform_1(%arg0: i32) -> (i32, i32) {
    %c0_i32 = arith.constant 0 : i32
    %c0_i32_0 = arith.constant 0 : i32
    %c0_i32_1 = arith.constant 0 : i32
    return %c0_i32, %c0_i32_0 : i32, i32
  }
  func.func @transform_2(%arg0: i32) -> (i32, i32) {
    %c0_i32 = arith.constant 0 : i32
    %c0_i32_0 = arith.constant 0 : i32
    %c0_i32_1 = arith.constant 0 : i32
    return %c0_i32, %c0_i32_0 : i32, i32
  }
  func.func @transform_3(%arg0: i32) -> (i32, i32) {
    %c0_i32 = arith.constant 0 : i32
    %c0_i32_0 = arith.constant 0 : i32
    %c0_i32_1 = arith.constant 0 : i32
    return %c0_i32, %c0_i32_0 : i32, i32
  }
  func.func @transform_4(%arg0: i32) -> (i32, i32) {
    %c0_i32 = arith.constant 0 : i32
    %c0_i32_0 = arith.constant 0 : i32
    %c0_i32_1 = arith.constant 0 : i32
    return %c0_i32, %c0_i32_0 : i32, i32
  }
  func.func @transform_5(%arg0: i32) -> (i32, i32) {
    %c0_i32 = arith.constant 0 : i32
    %c0_i32_0 = arith.constant 0 : i32
    return %arg0, %c0_i32 : i32, i32
  }
  func.func @transform_6(%arg0: i32) -> (i32, i32) {
    %c0_i32 = arith.constant 0 : i32
    %c0_i32_0 = arith.constant 0 : i32
    return %arg0, %c0_i32 : i32, i32
  }
  func.func @transform_7(%arg0: i32) -> (i32, i32) {
    %c0_i32 = arith.constant 0 : i32
    %c0_i32_0 = arith.constant 0 : i32
    return %arg0, %c0_i32 : i32, i32
  }
}

</mosaic_0001>

<bundles_post_ra>
// kernel: custom-call.14
= control target key start
LH: loop header
LB: loop body
LE: loop exit
PB: predicated region body
PF: predicated region fallthrough
CT: control target
= control target key end

     0   :  { %s6_s0 = inlined_call_operand.vmem [shape: f32[2,64], index: 0, kind: output, shape index: {}]  }

// kernel: custom-call.15
= control target key start
LH: loop header
LB: loop body
LE: loop exit
PB: predicated region body
PF: predicated region fallthrough
CT: control target
= control target key end

     0   :  { %s6_s0 = inlined_call_operand.vmem [shape: f32[2,16], index: 0, kind: output, shape index: {}]  }

// kernel: _forward.4
= control target key start
LH: loop header
LB: loop body
LE: loop exit
PB: predicated region body
PF: predicated region fallthrough
CT: control target
= control target key end

     0   :  { %v1346_v0 = vmov 0   ;;  %v1347_v33 = vmov 1   ;;  %v1348_v36 = vmov 2   ;;  %vm1218_vm0 = vcmask 1041409   ;;  %s2277_s0 = inlined_call_operand.vmem [shape: f32[32,8,4], index: 0, kind: input, shape index: {}]   ;;  %s2278_s1 = inlined_call_operand.vmem [shape: f32[3,128], index: 1, kind: input, shape index: {}]   ;;  %s2279_s2 = inlined_call_operand.vmem [shape: f32[1,128], index: 2, kind: input, shape index: {}]   ;;  %s2280_s3 = inlined_call_operand.vmem [shape: bf16[32,128], index: 3, kind: output, shape index: {}]  }
   0x1   :  { %1339 = vset.pattern.permute.xlu1 %v1346_v0  ;;  %1338 = vset.pattern.permute.xlu0 %v1346_v0  ;;  %v1373_v1 = vld [vmem:[%s2277_s0 + $0x10] sm:$0xff]  ;;  %v1378_v2 = vld [vmem:[%s2277_s0] sm:$0xff]  ;;  %v1385_v3 = vld [vmem:[%s2277_s0 + $0x18] sm:$0xff]  ;;  %vm1220_vm1 = vcmask 1042434   ;;  %vm1222_vm2 = vcmask 1043459   ;;  %vm1224_vm3 = vcmask 1044484  }
   0x2   :  { %59 = vperm.xlu1 %1339, %v1373_v1   ;;  %49 = vperm.xlu0 %1338, %v1378_v2   ;;  %v1390_v4 = vld [vmem:[%s2277_s0 + $0x8] sm:$0xff]  ;;  %v1402_v6 = vld [vmem:[%s2277_s0 + $0x20] sm:$0xff]  ;;  %v1409_v7 = vld [vmem:[%s2277_s0 + $0x38] sm:$0xff]  ;;  %vm1226_vm4 = vcmask 1045509   ;;  %vm1228_vm5 = vcmask 1046534   ;;  %vm1230_vm6 = vcmask 1047559  }
   0x3   :  { %v1397_v5 = vld [vmem:[%s2277_s0 + $0x28] sm:$0xff]  ;;  %v1414_v8 = vld [vmem:[%s2277_s0 + $0x30] sm:$0xff]  ;;  %v1426_v10 = vld [vmem:[%s2277_s0 + $0x40] sm:$0xff] }
   0x4   :  { %v1421_v9 = vld [vmem:[%s2277_s0 + $0x48] sm:$0xff]  ;;  %v1433_v11 = vld [vmem:[%s2277_s0 + $0x58] sm:$0xff]  ;;  %v1438_v12 = vld [vmem:[%s2277_s0 + $0x50] sm:$0xff] }
   0x5   :  { %v1445_v13 = vld [vmem:[%s2277_s0 + $0x68] sm:$0xff]  ;;  %v1450_v14 = vld [vmem:[%s2277_s0 + $0x60] sm:$0xff]  ;;  %v1457_v15 = vld [vmem:[%s2277_s0 + $0x78] sm:$0xff] }
   0x6   :  { %64 = vperm.xlu1 %1339, %v1385_v3   ;;  %54 = vperm.xlu0 %1338, %v1390_v4   ;;  %v1462_v16 = vld [vmem:[%s2277_s0 + $0x70] sm:$0xff]  ;;  %v1469_v17 = vld [vmem:[%s2277_s0 + $0x88] sm:$0xff]  ;;  %v1474_v18 = vld [vmem:[%s2277_s0 + $0x80] sm:$0xff] }
   0x7   :  { %v1481_v19 = vld [vmem:[%s2277_s0 + $0x98] sm:$0xff]  ;;  %v1486_v20 = vld [vmem:[%s2277_s0 + $0x90] sm:$0xff]  ;;  %v1493_v21 = vld [vmem:[%s2277_s0 + $0xa8] sm:$0xff] }
   0x8   :  { %v1498_v22 = vld [vmem:[%s2277_s0 + $0xa0] sm:$0xff]  ;;  %v1505_v23 = vld [vmem:[%s2277_s0 + $0xb8] sm:$0xff]  ;;  %v1510_v24 = vld [vmem:[%s2277_s0 + $0xb0] sm:$0xff] }
   0x9   :  { %v1517_v25 = vld [vmem:[%s2277_s0 + $0xc8] sm:$0xff]  ;;  %v1522_v26 = vld [vmem:[%s2277_s0 + $0xc0] sm:$0xff]  ;;  %v1529_v27 = vld [vmem:[%s2277_s0 + $0xd8] sm:$0xff] }
   0xa   :  { %74 = vperm.xlu1 %1339, %v1397_v5   ;;  %69 = vperm.xlu0 %1338, %v1402_v6   ;;  %v1534_v28 = vld [vmem:[%s2277_s0 + $0xd0] sm:$0xff]  ;;  %v1541_v29 = vld [vmem:[%s2277_s0 + $0xe8] sm:$0xff]  ;;  %v1546_v30 = vld [vmem:[%s2277_s0 + $0xe0] sm:$0xff] }
   0xb   :  { %v1553_v31 = vld [vmem:[%s2277_s0 + $0xf8] sm:$0xff]  ;;  %v1558_v32 = vld [vmem:[%s2277_s0 + $0xf0] sm:$0xff] }
   0xe   :  { %84 = vperm.xlu1 %1339, %v1409_v7   ;;  %79 = vperm.xlu0 %1338, %v1414_v8  }
  0x12   :  { %94 = vperm.xlu1 %1339, %v1421_v9   ;;  %89 = vperm.xlu0 %1338, %v1426_v10  }
  0x16   :  { %104 = vperm.xlu1 %1339, %v1433_v11   ;;  %99 = vperm.xlu0 %1338, %v1438_v12  }
  0x1a   :  { %114 = vperm.xlu1 %1339, %v1445_v13   ;;  %109 = vperm.xlu0 %1338, %v1450_v14  }
  0x1e   :  { %124 = vperm.xlu1 %1339, %v1457_v15   ;;  %119 = vperm.xlu0 %1338, %v1462_v16  }
  0x22   :  { %134 = vperm.xlu1 %1339, %v1469_v17   ;;  %129 = vperm.xlu0 %1338, %v1474_v18  }
  0x26   :  { %144 = vperm.xlu1 %1339, %v1481_v19   ;;  %139 = vperm.xlu0 %1338, %v1486_v20  }
  0x2a   :  { %154 = vperm.xlu1 %1339, %v1493_v21   ;;  %149 = vperm.xlu0 %1338, %v1498_v22  }
  0x2e   :  { %164 = vperm.xlu1 %1339, %v1505_v23   ;;  %159 = vperm.xlu0 %1338, %v1510_v24  }
  0x32   :  { %174 = vperm.xlu1 %1339, %v1517_v25   ;;  %169 = vperm.xlu0 %1338, %v1522_v26  }
  0x36   :  { %184 = vperm.xlu1 %1339, %v1529_v27   ;;  %179 = vperm.xlu0 %1338, %v1534_v28  }
  0x3a   :  { %194 = vperm.xlu1 %1339, %v1541_v29   ;;  %189 = vperm.xlu0 %1338, %v1546_v30  }
  0x3e   :  { %204 = vperm.xlu1 %1339, %v1553_v31   ;;  %199 = vperm.xlu0 %1338, %v1558_v32  }
  0x42   :  { %1341 = vset.pattern.permute.xlu1 %v1347_v33  ;;  %1340 = vset.pattern.permute.xlu0 %v1347_v33 }
  0x43   :  { %248 = vperm.xlu1 %1341, %v1390_v4   ;;  %244 = vperm.xlu0 %1340, %v1378_v2  }
  0x47   :  { %252 = vperm.xlu1 %1341, %v1373_v1   ;;  %256 = vperm.xlu0 %1340, %v1385_v3  }
  0x4b   :  { %260 = vperm.xlu1 %1341, %v1402_v6   ;;  %264 = vperm.xlu0 %1340, %v1397_v5  }
  0x4f   :  { %268 = vperm.xlu1 %1341, %v1414_v8   ;;  %272 = vperm.xlu0 %1340, %v1409_v7  }
  0x53   :  { %276 = vperm.xlu1 %1341, %v1426_v10   ;;  %280 = vperm.xlu0 %1340, %v1421_v9  }
  0x57   :  { %284 = vperm.xlu1 %1341, %v1438_v12   ;;  %288 = vperm.xlu0 %1340, %v1433_v11  }
  0x5b   :  { %292 = vperm.xlu1 %1341, %v1450_v14   ;;  %296 = vperm.xlu0 %1340, %v1445_v13  }
  0x5f   :  { %300 = vperm.xlu1 %1341, %v1462_v16   ;;  %304 = vperm.xlu0 %1340, %v1457_v15  }
  0x63   :  { %308 = vperm.xlu1 %1341, %v1474_v18   ;;  %312 = vperm.xlu0 %1340, %v1469_v17  }
  0x67   :  { %316 = vperm.xlu1 %1341, %v1486_v20   ;;  %320 = vperm.xlu0 %1340, %v1481_v19  }
  0x6b   :  { %324 = vperm.xlu1 %1341, %v1498_v22   ;;  %328 = vperm.xlu0 %1340, %v1493_v21  }
  0x6f   :  { %332 = vperm.xlu1 %1341, %v1510_v24   ;;  %336 = vperm.xlu0 %1340, %v1505_v23  }
  0x73   :  { %340 = vperm.xlu1 %1341, %v1522_v26   ;;  %344 = vperm.xlu0 %1340, %v1517_v25  }
  0x77   :  { %348 = vperm.xlu1 %1341, %v1534_v28   ;;  %352 = vperm.xlu0 %1340, %v1529_v27  }
  0x7b   :  { %356 = vperm.xlu1 %1341, %v1546_v30   ;;  %360 = vperm.xlu0 %1340, %v1541_v29  }
  0x7f   :  { %364 = vperm.xlu1 %1341, %v1558_v32   ;;  %368 = vperm.xlu0 %1340, %v1553_v31  }
  0x81   :  { %v1594_v34 = vpop.permute.xlu1 %59  ;;  %v1596_v35 = vpop.permute.xlu0 %49 }
  0x83   :  { %1342 = vset.pattern.permute.xlu1 %v1348_v36  ;;  %1343 = vset.pattern.permute.xlu0 %v1348_v36 }
  0x84   :  { %440 = vperm.xlu1 %1342, %v1378_v2   ;;  %444 = vperm.xlu0 %1343, %v1390_v4  }
  0x85   :  { %v1600_v37 = vpop.permute.xlu1 %64  ;;  %v1602_v38 = vpop.permute.xlu0 %54 }
  0x88   :  { %448 = vperm.xlu1 %1342, %v1373_v1   ;;  %456 = vperm.xlu0 %1343, %v1402_v6  }
  0x89   :  { %v1606_v39 = vpop.permute.xlu1 %74  ;;  %v1608_v40 = vpop.permute.xlu0 %69 }
  0x8c   :  { %452 = vperm.xlu1 %1342, %v1385_v3   ;;  %464 = vperm.xlu0 %1343, %v1414_v8  }
  0x8d   :  { %v1612_v41 = vpop.permute.xlu1 %84  ;;  %v1614_v42 = vpop.permute.xlu0 %79 }
  0x90   :  { %460 = vperm.xlu1 %1342, %v1397_v5   ;;  %472 = vperm.xlu0 %1343, %v1426_v10  }
  0x91   :  { %v1618_v43 = vpop.permute.xlu1 %94  ;;  %v1620_v44 = vpop.permute.xlu0 %89 }
  0x94   :  { %468 = vperm.xlu1 %1342, %v1409_v7   ;;  %480 = vperm.xlu0 %1343, %v1438_v12  }
  0x95   :  { %v1624_v45 = vpop.permute.xlu1 %104  ;;  %v1626_v46 = vpop.permute.xlu0 %99 }
  0x98   :  { %476 = vperm.xlu1 %1342, %v1421_v9   ;;  %488 = vperm.xlu0 %1343, %v1450_v14  }
  0x99   :  { %v1630_v47 = vpop.permute.xlu1 %114  ;;  %v1632_v48 = vpop.permute.xlu0 %109 }
  0x9c   :  { %484 = vperm.xlu1 %1342, %v1433_v11   ;;  %496 = vperm.xlu0 %1343, %v1462_v16  }
  0x9d   :  { %v1636_v49 = vpop.permute.xlu1 %124  ;;  %v1638_v50 = vpop.permute.xlu0 %119 }
  0xa0   :  { %492 = vperm.xlu1 %1342, %v1445_v13   ;;  %504 = vperm.xlu0 %1343, %v1474_v18  }
  0xa1   :  { %v1642_v51 = vpop.permute.xlu1 %134  ;;  %v1644_v52 = vpop.permute.xlu0 %129 }
  0xa4   :  { %500 = vperm.xlu1 %1342, %v1457_v15   ;;  %512 = vperm.xlu0 %1343, %v1486_v20  }
  0xa5   :  { %v1648_v53 = vpop.permute.xlu1 %144  ;;  %v1650_v54 = vpop.permute.xlu0 %139 }
  0xa8   :  { %508 = vperm.xlu1 %1342, %v1469_v17   ;;  %520 = vperm.xlu0 %1343, %v1498_v22  }
  0xa9   :  { %v1654_v55 = vpop.permute.xlu1 %154  ;;  %v1656_v56 = vpop.permute.xlu0 %149 }
  0xac   :  { %516 = vperm.xlu1 %1342, %v1481_v19   ;;  %528 = vperm.xlu0 %1343, %v1510_v24  }
  0xad   :  { %v1660_v57 = vpop.permute.xlu1 %164  ;;  %v1662_v58 = vpop.permute.xlu0 %159 }
  0xb0   :  { %524 = vperm.xlu1 %1342, %v1493_v21   ;;  %536 = vperm.xlu0 %1343, %v1522_v26  }
  0xb1   :  { %v1666_v59 = vpop.permute.xlu1 %174  ;;  %v1668_v60 = vpop.permute.xlu0 %169 }
  0xb2   :  { %2281 = vst [vmem:[#allocation2_spill] sm:$0xff] %v1666_v59  ;;  %2282 = vst [vmem:[#allocation3_spill] sm:$0xff] %v1668_v60 }
  0xb4   :  { %532 = vperm.xlu1 %1342, %v1505_v23   ;;  %544 = vperm.xlu0 %1343, %v1534_v28  }
  0xb5   :  { %v1672_v61 = vpop.permute.xlu1 %184  ;;  %v1674_v62 = vpop.permute.xlu0 %179 }
  0xb6   :  { %2283 = vst [vmem:[#allocation4_spill] sm:$0xff] %v1672_v61  ;;  %2284 = vst [vmem:[#allocation5_spill] sm:$0xff] %v1674_v62  ;;  %v1349_v61 = vmov 3  }
  0xb8   :  { %540 = vperm.xlu1 %1342, %v1517_v25   ;;  %552 = vperm.xlu0 %1343, %v1546_v30  }
  0xb9   :  { %v1678_v63 = vpop.permute.xlu1 %194  ;;  %v1680_v0 = vpop.permute.xlu0 %189 }
  0xba   :  { %2285 = vst [vmem:[#allocation6_spill] sm:$0xff] %v1678_v63 }
  0xbc   :  { %548 = vperm.xlu1 %1342, %v1529_v27   ;;  %560 = vperm.xlu0 %1343, %v1558_v32  }
  0xbd   :  { %v1684_v33 = vpop.permute.xlu1 %204  ;;  %v1686_v36 = vpop.permute.xlu0 %199 }
  0xbe   :  { %2286 = vst [vmem:[#allocation7_spill] sm:$0xff] %v1684_v33 }
  0xc0   :  { %556 = vperm.xlu1 %1342, %v1541_v29   ;;  %1344 = vset.pattern.permute.xlu0 %v1349_v61 }
  0xc1   :  { %707 = vperm.xlu0 %1344, %v1378_v2  }
  0xc2   :  { %v1690_v62 = vpop.permute.xlu1 %248  ;;  %v1692_v60 = vpop.permute.xlu0 %244 }
  0xc3   :  { %2287 = vst [vmem:[#allocation8_spill] sm:$0xff] %v1690_v62 }
  0xc4   :  { %564 = vperm.xlu1 %1342, %v1553_v31  }
  0xc5   :  { %719 = vperm.xlu0 %1344, %v1385_v3  }
  0xc6   :  { %v1696_v63 = vpop.permute.xlu1 %252  ;;  %v1698_v59 = vpop.permute.xlu0 %256 }
  0xc8   :  { %1345 = vset.pattern.permute.xlu1 %v1349_v61 }
  0xc9   :  { %711 = vperm.xlu1 %1345, %v1390_v4   ;;  %727 = vperm.xlu0 %1344, %v1397_v5  }
  0xca   :  { %v1702_v33 = vpop.permute.xlu1 %260  ;;  %v1704_v2 = vpop.permute.xlu0 %264 }
  0xcd   :  { %715 = vperm.xlu1 %1345, %v1373_v1   ;;  %735 = vperm.xlu0 %1344, %v1409_v7  }
  0xce   :  { %v1708_v62 = vpop.permute.xlu1 %268  ;;  %v1710_v3 = vpop.permute.xlu0 %272 }
  0xcf   :  { %2288 = vst [vmem:[#allocation9_spill] sm:$0xff] %v1708_v62  ;;  %2289 = vst [vmem:[#allocation10_spill] sm:$0xff] %v1710_v3 }
  0xd1   :  { %723 = vperm.xlu1 %1345, %v1402_v6   ;;  %743 = vperm.xlu0 %1344, %v1421_v9  }
  0xd2   :  { %v1714_v61 = vpop.permute.xlu1 %276  ;;  %v1716_v4 = vpop.permute.xlu0 %280 }
  0xd5   :  { %731 = vperm.xlu1 %1345, %v1414_v8   ;;  %775 = vperm.xlu0 %1344, %v1469_v17  }
  0xd6   :  { %v1720_v5 = vpop.permute.xlu1 %284  ;;  %v1722_v1 = vpop.permute.xlu0 %288 }
  0xd9   :  { %739 = vperm.xlu1 %1345, %v1426_v10   ;;  %807 = vperm.xlu0 %1344, %v1517_v25  }
  0xda   :  { %v1726_v7 = vpop.permute.xlu1 %292  ;;  %v1728_v6 = vpop.permute.xlu0 %296 }
  0xdd   :  { %771 = vperm.xlu1 %1345, %v1474_v18   ;;  %779 = vperm.xlu0 %1344, %v1486_v20  }
  0xde   :  { %v1732_v9 = vpop.permute.xlu1 %300  ;;  %v1734_v8 = vpop.permute.xlu0 %304 }
  0xe1   :  { %803 = vperm.xlu1 %1345, %v1522_v26   ;;  %751 = vperm.xlu0 %1344, %v1433_v11   ;;  %v207_v11 = vlaneseq }
  0xe2   :  { %v1738_v17 = vpop.permute.xlu1 %308  ;;  %v1740_v10 = vpop.permute.xlu0 %312 }
  0xe3   :  { %v208_v3 = vshrl.u32 %v207_v11, 7 }
  0xe5   :  { %747 = vperm.xlu1 %1345, %v1438_v12   ;;  %815 = vperm.xlu0 %1344, %v1529_v27   ;;  %v209_v62 = vsub.s32 0, %v208_v3 }
  0xe6   :  { %v1744_v25 = vpop.permute.xlu1 %316  ;;  %v1746_v18 = vpop.permute.xlu0 %320 }
  0xe9   :  { %811 = vperm.xlu1 %1345, %v1534_v28   ;;  %787 = vperm.xlu0 %1344, %v1498_v22  }
  0xea   :  { %v1750_v20 = vpop.permute.xlu1 %324  ;;  %v1752_v26 = vpop.permute.xlu0 %328 }
  0xeb   :  { %2290 = vst [vmem:[#allocation11_spill] sm:$0xff] %v1752_v26  ;;  %v373_v26 = vsub.s32 1, %v208_v3 }
  0xed   :  { %783 = vperm.xlu1 %1345, %v1481_v19   ;;  %759 = vperm.xlu0 %1344, %v1445_v13   ;;  %v46_v13 = vld [vmem:[%s2278_s1] sm:$0x7] }
  0xee   :  { %v1756_v12 = vpop.permute.xlu1 %332  ;;  %v1758_v27 = vpop.permute.xlu0 %336 }
  0xef   :  { %2291 = vst [vmem:[#allocation12_spill] sm:$0xff] %v1758_v27 }
  0xf1   :  { %755 = vperm.xlu1 %1345, %v1450_v14   ;;  %823 = vperm.xlu0 %1344, %v1541_v29   ;;  %v1775_v14 = vrot.slane %v46_v13, %v209_v62  ;;  %v1777_v29 = vrot.slane %v46_v13, %v373_v26 }
  0xf2   :  { %v1762_v28 = vpop.permute.xlu1 %340  ;;  %v1764_v22 = vpop.permute.xlu0 %344 }
  0xf3   :  { %2292 = vst [vmem:[#allocation13_spill] sm:$0xff] %v1762_v28  ;;  %2293 = vst [vmem:[#allocation14_spill] sm:$0xff] %v1764_v22  ;;  %v569_v28 = vsub.s32 2, %v208_v3 }
  0xf5   :  { %819 = vperm.xlu1 %1345, %v1546_v30   ;;  %795 = vperm.xlu0 %1344, %v1510_v24   ;;  %v239_v24 = vmul.f32 %v1775_v14, %v1680_v0  ;;  %v375_v0 = vmul.f32 %v1777_v29, %v1692_v60  ;;  %v213_v60 = vmul.f32 %v1775_v14, %v1594_v34 }
  0xf6   :  { %v1771_v19 = vpop.permute.xlu1 %348  ;;  %v1773_v11 = vpop.permute.xlu0 %352  ;;  %v219_v34 = vmul.f32 %v1775_v14, %v1620_v44 }
  0xf7   :  { %2294 = vst [vmem:[#allocation15_spill] sm:$0xff] %v1771_v19 }
  0xf9   :  { %791 = vperm.xlu1 %1345, %v1493_v21   ;;  %767 = vperm.xlu0 %1344, %v1457_v15   ;;  %v241_v15 = vmul.f32 %v1775_v14, %v1686_v36  ;;  %v377_v36 = vmul.f32 %v1777_v29, %v1696_v63 }
  0xfa   :  { %v357_v22 = vpop.permute.xlu1 %356  ;;  %v1781_v30 = vpop.permute.xlu0 %360 }
  0xfb   :  { %2295 = vst [vmem:[#allocation16_spill] sm:$0xff] %v1781_v30  ;;  %v403_v27 = vmul.f32 %v1777_v29, %v357_v22  ;;  %v1797_v30 = vrot.slane %v46_v13, %v569_v28 }
  0xfd   :  { %v1786_v19 = vadd.f32 %v403_v27, %v239_v24  ;;  %763 = vperm.xlu1 %1345, %v1462_v16   ;;  %831 = vperm.xlu0 %1344, %v1553_v31   ;;  %v211_v16 = vmul.f32 %v1775_v14, %v1596_v35  ;;  %v409_v35 = vadd.f32 %v377_v36, %v213_v60 }
  0xfe   :  { %v365_v62 = vpop.permute.xlu1 %364  ;;  %v1790_v26 = vpop.permute.xlu0 %368 }
  0xff   :  { %2296 = vst [vmem:[#allocation17_spill] sm:$0xff] %v1786_v19  ;;  %v405_v21 = vmul.f32 %v1777_v29, %v365_v62  ;;  %v407_v22 = vadd.f32 %v375_v0, %v211_v16  ;;  %v2309_v19 = vld [vmem:[#allocation15_spill] sm:$0xff] }
 0x101   :  { %v1799_v3 = vadd.f32 %v405_v21, %v241_v15  ;;  %827 = vperm.xlu1 %1345, %v1558_v32  }
 0x103   :  { %2297 = vst [vmem:[#allocation18_spill] sm:$0xff] %v1799_v3  ;;  %v441_v31 = vpop.permute.xlu1 %440  ;;  %v1804_v27 = vpop.permute.xlu0 %444 }
 0x104   :  { %v571_v24 = vmul.f32 %v1797_v30, %v441_v31 }
 0x105   :  { %799 = vperm.xlu1 %1345, %v1505_v23   ;;  %v383_v23 = vmul.f32 %v1777_v29, %v1714_v61  ;;  %v384_v61 = vmul.f32 %v1777_v29, %v1716_v4  ;;  %v386_v4 = vmul.f32 %v1777_v29, %v1722_v1 }
 0x106   :  { %v1812_v28 = vadd.f32 %v571_v24, %v407_v22  ;;  %v385_v22 = vmul.f32 %v1777_v29, %v1720_v5  ;;  %v221_v24 = vmul.f32 %v1775_v14, %v1626_v46  ;;  %v220_v5 = vmul.f32 %v1775_v14, %v1618_v43 }
 0x107   :  { %v449_v32 = vpop.permute.xlu1 %448  ;;  %v1814_v13 = vpop.permute.xlu0 %456  ;;  %v415_v31 = vadd.f32 %v383_v23, %v219_v34  ;;  %v223_v46 = vmul.f32 %v1775_v14, %v1632_v48  ;;  %v222_v43 = vmul.f32 %v1775_v14, %v1624_v45  ;;  %v225_v48 = vmul.f32 %v1775_v14, %v1638_v50 }
 0x108   :  { %v573_v62 = vmul.f32 %v1797_v30, %v449_v32  ;;  %v224_v50 = vmul.f32 %v1775_v14, %v1630_v47 }
 0x109   :  { %v418_v1 = vadd.f32 %v386_v4, %v222_v43 }
 0x10a   :  { %v1817_v15 = vadd.f32 %v573_v62, %v409_v35  ;;  %v417_v35 = vadd.f32 %v385_v22, %v221_v24  ;;  %v387_v62 = vmul.f32 %v1777_v29, %v1726_v7  ;;  %v389_v7 = vmul.f32 %v1777_v29, %v1732_v9 }
 0x10b   :  { %v1819_v21 = vpop.permute.xlu1 %452  ;;  %v1821_v63 = vpop.permute.xlu0 %464 }
 0x10c   :  { %v419_v22 = vadd.f32 %v387_v62, %v223_v46  ;;  %v388_v62 = vmul.f32 %v1777_v29, %v1728_v6  ;;  %v391_v46 = vmul.f32 %v1777_v29, %v1738_v17 }
 0x10e   :  { %v420_v6 = vadd.f32 %v388_v62, %v224_v50  ;;  %v215_v62 = vmul.f32 %v1775_v14, %v1608_v40  ;;  %v232_v50 = vmul.f32 %v1775_v14, %v1654_v55 }
 0x10f   :  { %v1827_v0 = vpop.permute.xlu1 %460  ;;  %v473_v16 = vpop.permute.xlu0 %472 }
 0x110   :  { %v579_v36 = vmul.f32 %v1797_v30, %v473_v16  ;;  %v416_v16 = vadd.f32 %v384_v61, %v220_v5  ;;  %v421_v5 = vadd.f32 %v389_v7, %v225_v48  ;;  %v212_v48 = vmul.f32 %v1775_v14, %v1602_v38 }
 0x111   :  { %v217_v38 = vmul.f32 %v1775_v14, %v1614_v42  ;;  %v230_v42 = vmul.f32 %v1775_v14, %v1648_v53  ;;  %v2299_v53 = vld [vmem:[#allocation3_spill] sm:$0xff] }
 0x112   :  { %v1834_v60 = vadd.f32 %v579_v36, %v415_v31  ;;  %v235_v55 = vmul.f32 %v1775_v14, %v2299_v53  ;;  %v2305_v53 = vld [vmem:[#allocation11_spill] sm:$0xff] }
 0x113   :  { %v1838_v32 = vpop.permute.xlu1 %468  ;;  %v481_v44 = vpop.permute.xlu0 %480 }
 0x114   :  { %v581_v23 = vmul.f32 %v1797_v30, %v481_v44 }
 0x116   :  { %v1847_v34 = vadd.f32 %v581_v23, %v417_v35 }
 0x117   :  { %v477_v31 = vpop.permute.xlu1 %476  ;;  %v489_v36 = vpop.permute.xlu0 %488 }
 0x118   :  { %v580_v24 = vmul.f32 %v1797_v30, %v477_v31  ;;  %v583_v44 = vmul.f32 %v1797_v30, %v489_v36 }
 0x11a   :  { %v1859_v61 = vadd.f32 %v580_v24, %v416_v16  ;;  %v1861_v35 = vadd.f32 %v583_v44, %v419_v22  ;;  %v227_v16 = vmul.f32 %v1775_v14, %v1644_v52  ;;  %v390_v22 = vmul.f32 %v1777_v29, %v1734_v8 }
 0x11b   :  { %v485_v23 = vpop.permute.xlu1 %484  ;;  %v497_v9 = vpop.permute.xlu0 %496  ;;  %v393_v44 = vmul.f32 %v1777_v29, %v1744_v25  ;;  %v214_v52 = vmul.f32 %v1775_v14, %v1600_v37  ;;  %v226_v8 = vmul.f32 %v1775_v14, %v1636_v49  ;;  %v229_v25 = vmul.f32 %v1775_v14, %v1650_v54 }
 0x11c   :  { %v582_v31 = vmul.f32 %v1797_v30, %v485_v23  ;;  %v585_v45 = vmul.f32 %v1797_v30, %v497_v9  ;;  %v423_v24 = vadd.f32 %v391_v46, %v227_v16  ;;  %v1901_v37 = vmul.f32 %v1775_v14, %v1612_v41 }
 0x11d   :  { %v392_v49 = vmul.f32 %v1777_v29, %v1740_v10  ;;  %v425_v46 = vadd.f32 %v393_v44, %v229_v25  ;;  %v395_v54 = vmul.f32 %v1777_v29, %v1750_v20  ;;  %v228_v41 = vmul.f32 %v1775_v14, %v1642_v51  ;;  %v2298_v51 = vld [vmem:[#allocation2_spill] sm:$0xff] }
 0x11e   :  { %v1873_v4 = vadd.f32 %v582_v31, %v418_v1  ;;  %v1875_v36 = vadd.f32 %v585_v45, %v421_v5  ;;  %v216_v1 = vmul.f32 %v1775_v14, %v1606_v39  ;;  %v422_v39 = vadd.f32 %v390_v22, %v226_v8  ;;  %v2300_v8 = vld [vmem:[#allocation4_spill] sm:$0xff] }
 0x11f   :  { %v493_v7 = vpop.permute.xlu1 %492  ;;  %v505_v17 = vpop.permute.xlu0 %504  ;;  %v231_v10 = vmul.f32 %v1775_v14, %v1656_v56  ;;  %v234_v16 = vmul.f32 %v1775_v14, %v1660_v57  ;;  %v233_v20 = vmul.f32 %v1775_v14, %v1662_v58  ;;  %v394_v56 = vmul.f32 %v1777_v29, %v1746_v18 }
 0x120   :  { %v584_v43 = vmul.f32 %v1797_v30, %v493_v7  ;;  %v587_v47 = vmul.f32 %v1797_v30, %v505_v17  ;;  %v1929_v7 = vmul.f32 %v1775_v14, %v2298_v51  ;;  %v424_v17 = vadd.f32 %v392_v49, %v228_v41 }
 0x121   :  { %v427_v44 = vadd.f32 %v395_v54, %v231_v10  ;;  %v397_v58 = vmul.f32 %v1777_v29, %v1756_v12  ;;  %v1941_v25 = vmul.f32 %v1775_v14, %v2300_v8  ;;  %v378_v18 = vmul.f32 %v1777_v29, %v1698_v59  ;;  %v2304_v10 = vld [vmem:[#allocation9_spill] sm:$0xff] }
 0x122   :  { %v1895_v23 = vadd.f32 %v584_v43, %v420_v6  ;;  %v1897_v9 = vadd.f32 %v587_v47, %v423_v24  ;;  %v381_v51 = vmul.f32 %v1777_v29, %v2304_v10  ;;  %v426_v59 = vadd.f32 %v394_v56, %v230_v42  ;;  %v2308_v56 = vld [vmem:[#allocation12_spill] sm:$0xff] }
 0x123   :  { %v501_v5 = vpop.permute.xlu1 %500  ;;  %v513_v40 = vpop.permute.xlu0 %512  ;;  %v429_v8 = vadd.f32 %v397_v58, %v233_v20 }
 0x124   :  { %v586_v31 = vmul.f32 %v1797_v30, %v501_v5  ;;  %v589_v45 = vmul.f32 %v1797_v30, %v513_v40  ;;  %v379_v5 = vmul.f32 %v1777_v29, %v1702_v33  ;;  %v2302_v40 = vld [vmem:[#allocation5_spill] sm:$0xff]  ;;  %v396_v33 = vmul.f32 %v1777_v29, %v2305_v53 }
 0x125   :  { %v237_v12 = vmul.f32 %v1775_v14, %v2302_v40  ;;  %v398_v53 = vmul.f32 %v1777_v29, %v2308_v56  ;;  %v413_v58 = vadd.f32 %v381_v51, %v217_v38  ;;  %v574_v38 = vmul.f32 %v1797_v30, %v1819_v21 }
 0x126   :  { %v1923_v6 = vadd.f32 %v586_v31, %v422_v39  ;;  %v1925_v22 = vadd.f32 %v589_v45, %v425_v46  ;;  %v2301_v39 = vld [vmem:[#allocation8_spill] sm:$0xff]  ;;  %v380_v46 = vmul.f32 %v1777_v29, %v1704_v2  ;;  %v2303_v45 = vld [vmem:[#allocation6_spill] sm:$0xff]  ;;  %v411_v40 = vadd.f32 %v379_v5, %v215_v62 }
 0x127   :  { %v509_v24 = vpop.permute.xlu1 %508  ;;  %v521_v57 = vpop.permute.xlu0 %520  ;;  %v376_v49 = vmul.f32 %v1777_v29, %v2301_v39  ;;  %v240_v41 = vmul.f32 %v1775_v14, %v2303_v45  ;;  %v2306_v39 = vld [vmem:[#allocation13_spill] sm:$0xff]  ;;  %v2307_v45 = vld [vmem:[#allocation10_spill] sm:$0xff]  ;;  %v402_v21 = vmul.f32 %v1777_v29, %v1773_v11 }
 0x128   :  { %v588_v43 = vmul.f32 %v1797_v30, %v509_v24  ;;  %v591_v47 = vmul.f32 %v1797_v30, %v521_v57  ;;  %v399_v2 = vmul.f32 %v1777_v29, %v2306_v39  ;;  %v382_v10 = vmul.f32 %v1777_v29, %v2307_v45 }
 0x129   :  { %v412_v42 = vadd.f32 %v380_v46, %v216_v1  ;;  %v428_v39 = vadd.f32 %v396_v33, %v232_v50  ;;  %v575_v1 = vmul.f32 %v1797_v30, %v1814_v13  ;;  %v430_v50 = vadd.f32 %v398_v53, %v234_v16 }
 0x12a   :  { %v1953_v54 = vadd.f32 %v588_v43, %v424_v17  ;;  %v1955_v31 = vadd.f32 %v591_v47, %v427_v44  ;;  %v408_v43 = vadd.f32 %v376_v49, %v212_v48  ;;  %v410_v47 = vadd.f32 %v378_v18, %v214_v52 }
 0x12b   :  { %v517_v24 = vpop.permute.xlu1 %516  ;;  %v529_v57 = vpop.permute.xlu0 %528  ;;  %v572_v52 = vmul.f32 %v1797_v30, %v1804_v27  ;;  %v431_v49 = vadd.f32 %v399_v2, %v235_v55  ;;  %v414_v46 = vadd.f32 %v382_v10, %v1901_v37  ;;  %v576_v27 = vmul.f32 %v1797_v30, %v1827_v0  ;;  %v2003_v0 = vld [vmem:[%s2279_s2] ss:$0 sm:$0xff] }
 0x12c   :  { %v590_v17 = vmul.f32 %v1797_v30, %v517_v24  ;;  %v593_v44 = vmul.f32 %v1797_v30, %v529_v57  ;;  %v401_v24 = vmul.f32 %v1777_v29, %v2309_v19  ;;  %v577_v19 = vmul.f32 %v1797_v30, %v1821_v63 }
 0x12d   :  { %v578_v55 = vmul.f32 %v1797_v30, %v1838_v32  ;;  %v604_v57 = vadd.f32 %v572_v52, %v408_v43  ;;  %v2311_v32 = vld [vmem:[#allocation16_spill] sm:$0xff]  ;;  %v607_v2 = vadd.f32 %v575_v1, %v411_v40  ;;  %v606_v11 = vadd.f32 %v574_v38, %v410_v47 }
 0x12e   :  { %v1971_v3 = vadd.f32 %v590_v17, %v426_v59  ;;  %v1973_v20 = vadd.f32 %v593_v44, %v429_v8  ;;  %v2310_v59 = vld [vmem:[#allocation14_spill] sm:$0xff]  ;;  %v433_v33 = vadd.f32 %v401_v24, %v237_v12  ;;  %v404_v16 = vmul.f32 %v1777_v29, %v2311_v32  ;;  %v2312_v24 = vld [vmem:[#allocation7_spill] sm:$0xff] }
 0x12f   :  { %v525_v48 = vpop.permute.xlu1 %524  ;;  %v537_v62 = vpop.permute.xlu0 %536  ;;  %v400_v37 = vmul.f32 %v1777_v29, %v2310_v59  ;;  %v406_v12 = vmul.f32 %v1777_v29, %v1790_v26  ;;  %v609_v43 = vadd.f32 %v577_v19, %v413_v58  ;;  %v608_v45 = vadd.f32 %v576_v27, %v412_v42 }
 0x130   :  { %v592_v18 = vmul.f32 %v1797_v30, %v525_v48  ;;  %v595_v5 = vmul.f32 %v1797_v30, %v537_v62  ;;  %v610_v10 = vadd.f32 %v578_v55, %v414_v46  ;;  %v242_v40 = vmul.f32 %v1775_v14, %v2312_v24 }
 0x131   :  { %v432_v52 = vadd.f32 %v400_v37, %v1929_v7  ;;  %v434_v48 = vadd.f32 %v402_v21, %v1941_v25  ;;  %v2022_v26 = vadd.f32 %v2003_v0, %v604_v57  ;;  %v436_v47 = vadd.f32 %v404_v16, %v240_v41 }
 0x132   :  { %v1992_v13 = vadd.f32 %v592_v18, %v428_v39  ;;  %v1994_v51 = vadd.f32 %v595_v5, %v431_v49  ;;  %v642_v39 = vadd.f32 %v2003_v0, %v1812_v28  ;;  %v2027_v58 = vadd.f32 %v2003_v0, %v1817_v15 }
 0x133   :  { %v533_v63 = vpop.permute.xlu1 %532  ;;  %v545_v8 = vpop.permute.xlu0 %544  ;;  %v2030_v28 = vadd.f32 %v2003_v0, %v607_v2  ;;  %v2032_v14 = vadd.f32 %v406_v12, %v242_v40  ;;  %v645_v7 = vadd.f32 %v2003_v0, %v606_v11  ;;  %v2036_v25 = vadd.f32 %v2003_v0, %v608_v45 }
 0x134   :  { %v594_v17 = vmul.f32 %v1797_v30, %v533_v63  ;;  %v597_v44 = vmul.f32 %v1797_v30, %v545_v8  ;;  %v2039_v49 = vadd.f32 %v2003_v0, %v609_v43  ;;  %v674_v1 = vmax.f32 %v642_v39, 0.0 }
 0x135   :  { %v2044_v18 = vadd.f32 %v2003_v0, %v610_v10  ;;  %v2048_v15 = vadd.f32 %v2003_v0, %v1834_v60  ;;  %v675_v38 = vmax.f32 %v2022_v26, 0.0  ;;  %v2053_v19 = vadd.f32 %v2003_v0, %v1859_v61 }
 0x136   :  { %v2011_v56 = vadd.f32 %v594_v17, %v430_v50  ;;  %v2013_v53 = vadd.f32 %v597_v44, %v433_v33  ;;  %v2057_v27 = vadd.f32 %v2003_v0, %v1847_v34  ;;  %v2061_v50 = vadd.f32 %v2003_v0, %v1861_v35 }
 0x137   :  { %v541_v62 = vpop.permute.xlu1 %540  ;;  %v553_v29 = vpop.permute.xlu0 %552  ;;  %v676_v60 = vmax.f32 %v2027_v58, 0.0  ;;  %v678_v59 = vmax.f32 %v2030_v28, 0.0  ;;  %v2068_v37 = vadd.f32 %v2003_v0, %v1873_v4  ;;  %v677_v61 = vmax.f32 %v645_v7, 0.0 }
 0x138   :  { %v596_v42 = vmul.f32 %v1797_v30, %v541_v62  ;;  %v679_v33 = vmax.f32 %v2036_v25, 0.0  ;;  %v680_v34 = vmax.f32 %v2039_v49, 0.0  ;;  %v2074_v21 = vadd.f32 %v2003_v0, %v1875_v36 }
 0x139   :  { %v681_v57 = vmax.f32 %v2044_v18, 0.0  ;;  %v682_v63 = vmax.f32 %v2048_v15, 0.0  ;;  %v2080_v8 = vadd.f32 %v2003_v0, %v1897_v9  ;;  %v683_v32 = vmax.f32 %v2053_v19, 0.0 }
 0x13a   :  { %v2041_v41 = vadd.f32 %v596_v42, %v432_v52  ;;  %v2086_v2 = vadd.f32 %v2003_v0, %v1895_v23  ;;  %v2092_v12 = vadd.f32 %v2003_v0, %v1925_v22  ;;  %v685_v9 = vmax.f32 %v2068_v37, 0.0 }
 0x13b   :  { %v549_v5 = vpop.permute.xlu1 %548  ;;  %v561_v46 = vpop.permute.xlu0 %560  ;;  %v2097_v11 = vadd.f32 %v2003_v0, %v1923_v6  ;;  %v2101_v23 = vadd.f32 %v2003_v0, %v1953_v54  ;;  %v2105_v45 = vadd.f32 %v2003_v0, %v1955_v31  ;;  %v599_v22 = vmul.f32 %v1797_v30, %v553_v29 }
 0x13c   :  { %v598_v55 = vmul.f32 %v1797_v30, %v549_v5  ;;  %v690_v24 = vmax.f32 %v2080_v8, 0.0  ;;  %v2112_v6 = vadd.f32 %v2003_v0, %v1971_v3  ;;  %v2116_v54 = vadd.f32 %v2003_v0, %v1994_v51  ;;  %v2313_v5 = vld [vmem:[#allocation17_spill] sm:$0xff] }
 0x13d   :  { %v601_v62 = vmul.f32 %v1797_v30, %v561_v46  ;;  %v2127_v3 = vadd.f32 %v2003_v0, %v1992_v13  ;;  %v691_v25 = vmax.f32 %v2101_v23, 0.0  ;;  %v2135_v46 = vadd.f32 %v2003_v0, %v2013_v53 }
 0x13e   :  { %v630_v35 = vadd.f32 %v598_v55, %v434_v48  ;;  %v2121_v48 = vadd.f32 %v2003_v0, %v1973_v20  ;;  %v631_v20 = vadd.f32 %v599_v22, %v2313_v5  ;;  %v2140_v13 = vadd.f32 %v2003_v0, %v2011_v56 }
 0x13f   :  { %v557_v4 = vpop.permute.xlu1 %556  ;;  %v2148_v53 = vadd.f32 %v2003_v0, %v2041_v41 }
 0x140   :  { %v600_v17 = vmul.f32 %v1797_v30, %v557_v4  ;;  %v708_v44 = vpop.permute.xlu0 %707 }
 0x141   :  { %v834_v43 = vmul.f32 %v708_v44, %v674_v1  ;;  %v2154_v44 = vadd.f32 %v2003_v0, %v630_v35 }
 0x142   :  { %v632_v39 = vadd.f32 %v600_v17, %v436_v47  ;;  %v692_v47 = vmax.f32 %v2092_v12, 0.0 }
 0x143   :  { %v866_v40 = vrot.slane %v834_v43, 4  ;;  %v565_v52 = vpop.permute.xlu1 %564 }
 0x144   :  { %v720_v29 = vpop.permute.xlu0 %719  ;;  %v602_v22 = vmul.f32 %v1797_v30, %v565_v52  ;;  %v2158_v30 = vadd.f32 %v2003_v0, %v631_v20 }
 0x145   :  { %v867_v7 = vmax.f32 %v834_v43, %v866_v40  ;;  %v837_v51 = vmul.f32 %v720_v29, %v677_v61  ;;  %v698_v61 = vmax.f32 %v2116_v54, 0.0  ;;  %v2314_v43 = vld [vmem:[#allocation18_spill] sm:$0xff] }
 0x146   :  { %v633_v40 = vadd.f32 %v601_v62, %v2314_v43 }
 0x147   :  { %v868_v4 = vrot.slane %v867_v7, 2  ;;  %v884_v17 = vrot.slane %v837_v51, 4 }
 0x148   :  { %v712_v29 = vpop.permute.xlu1 %711  ;;  %v728_v5 = vpop.permute.xlu0 %727  ;;  %v2167_v35 = vadd.f32 %v2003_v0, %v633_v40 }
 0x149   :  { %v869_v56 = vmax.f32 %v867_v7, %v868_v4  ;;  %v885_v42 = vmax.f32 %v837_v51, %v884_v17  ;;  %v835_v36 = vmul.f32 %v712_v29, %v675_v38  ;;  %v839_v31 = vmul.f32 %v728_v5, %v679_v33 }
 0x14a   :  { %v634_v7 = vadd.f32 %v602_v22, %v2032_v14  ;;  %v699_v38 = vmax.f32 %v2148_v53, 0.0  ;;  %v2164_v33 = vadd.f32 %v2003_v0, %v632_v39 }
 0x14b   :  { %v870_v41 = vrot.slane %v869_v56, 1  ;;  %v886_v43 = vrot.slane %v885_v42, 2  ;;  %v872_v55 = vrot.slane %v835_v36, 4  ;;  %v896_v10 = vrot.slane %v839_v31, 4 }
 0x14c   :  { %v716_v51 = vpop.permute.xlu1 %715  ;;  %v736_v26 = vpop.permute.xlu0 %735 }
 0x14d   :  { %v871_v20 = vmax.f32 %v869_v56, %v870_v41  ;;  %v887_v4 = vmax.f32 %v885_v42, %v886_v43  ;;  %v873_v17 = vmax.f32 %v835_v36, %v872_v55  ;;  %v897_v29 = vmax.f32 %v839_v31, %v896_v10 }
 0x14e   :  { %v836_v5 = vmul.f32 %v716_v51, %v676_v60  ;;  %v841_v14 = vmul.f32 %v736_v26, %v681_v57  ;;  %v2178_v31 = vadd.f32 %v2003_v0, %v634_v7 }
 0x14f   :  { %v1302_v1 = vpack.c.bf16 %v871_v20, %v871_v20  ;;  %v888_v39 = vrot.slane %v887_v4, 1  ;;  %v874_v62 = vrot.slane %v873_v17, 2  ;;  %v898_v16 = vrot.slane %v897_v29, 2 }
 0x150   :  { %v878_v40 = vrot.slane %v836_v5, 4  ;;  %v908_v56 = vrot.slane %v841_v14, 4  ;;  %v724_v42 = vpop.permute.xlu1 %723  ;;  %v744_v36 = vpop.permute.xlu0 %743 }
 0x151   :  { %v889_v60 = vmax.f32 %v887_v4, %v888_v39  ;;  %v875_v18 = vmax.f32 %v873_v17, %v874_v62  ;;  %v899_v57 = vmax.f32 %v897_v29, %v898_v16  ;;  %v838_v43 = vmul.f32 %v724_v42, %v678_v59 }
 0x152   :  { %v879_v55 = vmax.f32 %v836_v5, %v878_v40  ;;  %v909_v41 = vmax.f32 %v841_v14, %v908_v56  ;;  %v843_v51 = vmul.f32 %v744_v36, %v683_v32  ;;  %v1186_v26 = vunpack.c.l.b16 %v1302_v1 }
 0x153   :  { %v1305_v20 = vpack.c.bf16 %v889_v60, %v889_v60  ;;  %v876_v52 = vrot.slane %v875_v18, 1  ;;  %v900_v10 = vrot.slane %v899_v57, 1  ;;  %v890_v4 = vrot.slane %v838_v43, 4 }
 0x154   :  { %v880_v22 = vrot.slane %v879_v55, 2  ;;  %v910_v58 = vrot.slane %v909_v41, 2  ;;  %v920_v62 = vrot.slane %v843_v51, 4  ;;  %v732_v16 = vpop.permute.xlu1 %731  ;;  %v776_v17 = vpop.permute.xlu0 %775 }
 0x155   :  { %v1189_v0 = vunpack.c.l.b16 %v1305_v20  ;;  %v877_v7 = vmax.f32 %v875_v18, %v876_v52  ;;  %v901_v29 = vmax.f32 %v899_v57, %v900_v10  ;;  %v840_v28 = vmul.f32 %v732_v16, %v680_v34 }
 0x156   :  { %v881_v59 = vmax.f32 %v879_v55, %v880_v22  ;;  %v911_v19 = vmax.f32 %v909_v41, %v910_v58  ;;  %v891_v32 = vmax.f32 %v838_v43, %v890_v4  ;;  %v921_v1 = vmax.f32 %v843_v51, %v920_v62 }
 0x157   :  { %v1303_v5 = vpack.c.bf16 %v877_v7, %v877_v7  ;;  %v1307_v14 = vpack.c.bf16 %v901_v29, %v901_v29  ;;  %v902_v39 = vrot.slane %v840_v28, 4  ;;  %v851_v40 = vmul.f32 %v776_v17, %v691_v25 }
 0x158   :  { %v882_v56 = vrot.slane %v881_v59, 1  ;;  %v912_v42 = vrot.slane %v911_v19, 1  ;;  %v892_v36 = vrot.slane %v891_v32, 2  ;;  %v922_v52 = vrot.slane %v921_v1, 2  ;;  %v740_v10 = vpop.permute.xlu1 %739  ;;  %v808_v60 = vpop.permute.xlu0 %807 }
 0x159   :  { %v1187_v18 = vunpack.c.l.b16 %v1303_v5  ;;  %v1191_v49 = vunpack.c.l.b16 %v1307_v14  ;;  %v903_v34 = vmax.f32 %v840_v28, %v902_v39  ;;  %v968_v22 = vrot.slane %v851_v40, 4 }
 0x15a   :  { %v883_v58 = vmax.f32 %v881_v59, %v882_v56  ;;  %v913_v57 = vmax.f32 %v911_v19, %v912_v42  ;;  %v893_v55 = vmax.f32 %v891_v32, %v892_v36  ;;  %v923_v41 = vmax.f32 %v921_v1, %v922_v52 }
 0x15b   :  { %v1219_v43 = vsel %vm1218_vm0, %v1187_v18, %v1186_v26  ;;  %v904_v23 = vrot.slane %v903_v34, 2  ;;  %v969_v25 = vmax.f32 %v851_v40, %v968_v22  ;;  %v842_v51 = vmul.f32 %v740_v10, %v682_v63 }
 0x15c   :  { %v1304_v20 = vpack.c.bf16 %v883_v58, %v883_v58  ;;  %v1309_v4 = vpack.c.bf16 %v913_v57, %v913_v57  ;;  %v894_v62 = vrot.slane %v893_v55, 1  ;;  %v924_v16 = vrot.slane %v923_v41, 1  ;;  %v772_v17 = vpop.permute.xlu1 %771  ;;  %v780_v7 = vpop.permute.xlu0 %779 }
 0x15d   :  { %v905_v29 = vmax.f32 %v903_v34, %v904_v23  ;;  %v970_v28 = vrot.slane %v969_v25, 2  ;;  %v914_v59 = vrot.slane %v842_v51, 4  ;;  %v859_v19 = vmul.f32 %v808_v60, %v699_v38 }
 0x15e   :  { %v1188_v26 = vunpack.c.l.b16 %v1304_v20  ;;  %v1193_v32 = vunpack.c.l.b16 %v1309_v4  ;;  %v895_v1 = vmax.f32 %v893_v55, %v894_v62  ;;  %v925_v5 = vmax.f32 %v923_v41, %v924_v16 }
 0x15f   :  { %v906_v15 = vrot.slane %v905_v29, 1  ;;  %v971_v63 = vmax.f32 %v969_v25, %v970_v28  ;;  %v915_v14 = vmax.f32 %v842_v51, %v914_v59  ;;  %v1016_v39 = vrot.slane %v859_v19, 4 }
 0x160   :  { %v1221_v40 = vsel %vm1220_vm1, %v1188_v26, %v1219_v43  ;;  %v1306_v56 = vpack.c.bf16 %v895_v1, %v895_v1  ;;  %v1311_v42 = vpack.c.bf16 %v925_v5, %v925_v5  ;;  %v850_v36 = vmul.f32 %v772_v17, %v690_v24  ;;  %v804_v52 = vpop.permute.xlu1 %803  ;;  %v752_v10 = vpop.permute.xlu0 %751 }
 0x161   :  { %v1223_v53 = vsel %vm1222_vm2, %v1189_v0, %v1221_v40  ;;  %v907_v38 = vmax.f32 %v905_v29, %v906_v15  ;;  %v972_v60 = vrot.slane %v971_v63, 1  ;;  %v916_v18 = vrot.slane %v915_v14, 2 }
 0x162   :  { %v1190_v34 = vunpack.c.l.b16 %v1306_v56  ;;  %v1195_v22 = vunpack.c.l.b16 %v1311_v42  ;;  %v1017_v58 = vmax.f32 %v859_v19, %v1016_v39  ;;  %v962_v57 = vrot.slane %v850_v36, 4 }
 0x163   :  { %v1308_v55 = vpack.c.bf16 %v907_v38, %v907_v38  ;;  %v973_v41 = vmax.f32 %v971_v63, %v972_v60  ;;  %v917_v23 = vmax.f32 %v915_v14, %v916_v18  ;;  %v852_v43 = vmul.f32 %v780_v7, %v692_v47 }
 0x164   :  { %v1225_v8 = vsel %vm1224_vm3, %v1190_v34, %v1223_v53  ;;  %v1018_v24 = vrot.slane %v1017_v58, 2  ;;  %v963_v25 = vmax.f32 %v850_v36, %v962_v57  ;;  %v858_v0 = vmul.f32 %v804_v52, %v698_v61  ;;  %v748_v51 = vpop.permute.xlu1 %747  ;;  %v816_v20 = vpop.permute.xlu0 %815 }
 0x165   :  { %v1192_v4 = vunpack.c.l.b16 %v1308_v55  ;;  %v1227_v62 = vsel %vm1226_vm4, %v1191_v49, %v1225_v8  ;;  %v1319_v16 = vpack.c.bf16 %v973_v41, %v973_v41  ;;  %v918_v17 = vrot.slane %v917_v23, 1 }
 0x166   :  { %v1019_v29 = vmax.f32 %v1017_v58, %v1018_v24  ;;  %v964_v28 = vrot.slane %v963_v25, 2  ;;  %v974_v59 = vrot.slane %v852_v43, 4  ;;  %v1010_v19 = vrot.slane %v858_v0, 4 }
 0x167   :  { %v1229_v12 = vsel %vm1228_vm5, %v1192_v4, %v1227_v62  ;;  %v1203_v47 = vunpack.c.l.b16 %v1319_v16  ;;  %v919_v7 = vmax.f32 %v917_v23, %v918_v17  ;;  %v845_v26 = vmul.f32 %v752_v10, %v685_v9 }
 0x168   :  { %v1231_v54 = vsel %vm1230_vm6, %v1193_v32, %v1229_v12  ;;  %v1020_v61 = vrot.slane %v1019_v29, 1  ;;  %v965_v1 = vmax.f32 %v963_v25, %v964_v28  ;;  %v975_v5 = vmax.f32 %v852_v43, %v974_v59  ;;  %v812_v15 = vpop.permute.xlu1 %811  ;;  %v788_v40 = vpop.permute.xlu0 %787 }
 0x169   :  { %v1253_v49 = vpack.c.b16 %v1231_v54, %v1231_v54  ;;  %v1310_v63 = vpack.c.bf16 %v919_v7, %v919_v7  ;;  %v1011_v14 = vmax.f32 %v858_v0, %v1010_v19  ;;  %v932_v39 = vrot.slane %v845_v26, 4 }
 0x16a   :  { %v1021_v56 = vmax.f32 %v1019_v29, %v1020_v61  ;;  %v966_v42 = vrot.slane %v965_v1, 1  ;;  %v976_v36 = vrot.slane %v975_v5, 2  ;;  %v2315_v52 = vmax.f32 %v2057_v27, 0.0 }
 0x16b   :  { %1261 = vst [vmem:[%s2280_s3] sm:$0xf] %v1253_v49  ;;  %v1194_v37 = vunpack.c.l.b16 %v1310_v63  ;;  %v1012_v9 = vrot.slane %v1011_v14, 2  ;;  %v933_v32 = vmax.f32 %v845_v26, %v932_v39  ;;  %v2316_v10 = vmax.f32 %v2154_v44, 0.0 }
 0x16c   :  { %v844_v53 = vmul.f32 %v748_v51, %v2315_v52  ;;  %v1327_v60 = vpack.c.bf16 %v1021_v56, %v1021_v56  ;;  %v967_v18 = vmax.f32 %v965_v1, %v966_v42  ;;  %v977_v34 = vmax.f32 %v975_v5, %v976_v36  ;;  %v784_v57 = vpop.permute.xlu1 %783  ;;  %v760_v62 = vpop.permute.xlu0 %759 }
 0x16d   :  { %v861_v38 = vmul.f32 %v816_v20, %v2316_v10  ;;  %v2215_v55 = vsel %vm1218_vm0, %v1195_v22, %v1194_v37  ;;  %v1013_v27 = vmax.f32 %v1011_v14, %v1012_v9  ;;  %v934_v41 = vrot.slane %v933_v32, 2 }
 0x16e   :  { %v926_v58 = vrot.slane %v844_v53, 4  ;;  %v1211_v43 = vunpack.c.l.b16 %v1327_v60  ;;  %v1318_v8 = vpack.c.bf16 %v967_v18, %v967_v18  ;;  %v978_v24 = vrot.slane %v977_v34, 1 }
 0x16f   :  { %v1028_v23 = vrot.slane %v861_v38, 4  ;;  %v1014_v0 = vrot.slane %v1013_v27, 1  ;;  %v935_v51 = vmax.f32 %v933_v32, %v934_v41  ;;  %v2317_v44 = vmax.f32 %v2135_v46, 0.0 }
 0x170   :  { %v927_v25 = vmax.f32 %v844_v53, %v926_v58  ;;  %v1202_v16 = vunpack.c.l.b16 %v1318_v8  ;;  %v979_v17 = vmax.f32 %v977_v34, %v978_v24  ;;  %v2318_v22 = vmax.f32 %v2105_v45, 0.0  ;;  %v756_v59 = vpop.permute.xlu1 %755  ;;  %v824_v9 = vpop.permute.xlu0 %823 }
 0x171   :  { %v1029_v4 = vmax.f32 %v861_v38, %v1028_v23  ;;  %v860_v20 = vmul.f32 %v812_v15, %v2317_v44  ;;  %v1015_v19 = vmax.f32 %v1013_v27, %v1014_v0  ;;  %v936_v12 = vrot.slane %v935_v51, 1 }
 0x172   :  { %v928_v29 = vrot.slane %v927_v25, 2  ;;  %v854_v28 = vmul.f32 %v788_v40, %v2318_v22  ;;  %v1239_v54 = vsel %vm1218_vm0, %v1203_v47, %v1202_v16  ;;  %v1320_v61 = vpack.c.bf16 %v979_v17, %v979_v17 }
 0x173   :  { %v1030_v7 = vrot.slane %v1029_v4, 2  ;;  %v1022_v26 = vrot.slane %v860_v20, 4  ;;  %v1326_v49 = vpack.c.bf16 %v1015_v19, %v1015_v19  ;;  %v937_v46 = vmax.f32 %v935_v51, %v936_v12 }
 0x174   :  { %v929_v1 = vmax.f32 %v927_v25, %v928_v29  ;;  %v986_v5 = vrot.slane %v854_v28, 4  ;;  %v1204_v14 = vunpack.c.l.b16 %v1320_v61  ;;  %v2319_v45 = vmax.f32 %v2112_v6, 0.0  ;;  %v820_v42 = vpop.permute.xlu1 %819  ;;  %v796_v12 = vpop.permute.xlu0 %795 }
 0x175   :  { %v1031_v15 = vmax.f32 %v1029_v4, %v1030_v7  ;;  %v1023_v63 = vmax.f32 %v860_v20, %v1022_v26  ;;  %v1210_v36 = vunpack.c.l.b16 %v1326_v49  ;;  %v1313_v52 = vpack.c.bf16 %v937_v46, %v937_v46 }
 0x176   :  { %v930_v39 = vrot.slane %v929_v1, 1  ;;  %v987_v56 = vmax.f32 %v854_v28, %v986_v5  ;;  %v853_v40 = vmul.f32 %v784_v57, %v2319_v45  ;;  %v2225_v47 = vsel %vm1220_vm1, %v1204_v14, %v1239_v54 }
 0x177   :  { %v1032_v53 = vrot.slane %v1031_v15, 1  ;;  %v1024_v37 = vrot.slane %v1023_v63, 2  ;;  %v1246_v60 = vsel %vm1218_vm0, %v1211_v43, %v1210_v36  ;;  %v1197_v18 = vunpack.c.l.b16 %v1313_v52 }
 0x178   :  { %v931_v32 = vmax.f32 %v929_v1, %v930_v39  ;;  %v988_v10 = vrot.slane %v987_v56, 2  ;;  %v980_v38 = vrot.slane %v853_v40, 4  ;;  %v2320_v41 = vmax.f32 %v2086_v2, 0.0  ;;  %v792_v44 = vpop.permute.xlu1 %791 }
 0x179   :  { %v1033_v34 = vmax.f32 %v1031_v15, %v1032_v53  ;;  %v1025_v58 = vmax.f32 %v1023_v63, %v1024_v37  ;;  %v2321_v25 = vmax.f32 %v2061_v50, 0.0  ;;  %v2322_v51 = vmax.f32 %v2164_v33, 0.0 }
 0x17a   :  { %v1312_v27 = vpack.c.bf16 %v931_v32, %v931_v32  ;;  %v989_v6 = vmax.f32 %v987_v56, %v988_v10  ;;  %v981_v57 = vmax.f32 %v853_v40, %v980_v38  ;;  %v847_v23 = vmul.f32 %v760_v62, %v2320_v41  ;;  %v768_v10 = vpop.permute.xlu0 %767 }
 0x17b   :  { %v1329_v8 = vpack.c.bf16 %v1033_v34, %v1033_v34  ;;  %v1026_v24 = vrot.slane %v1025_v58, 1  ;;  %v846_v0 = vmul.f32 %v756_v59, %v2321_v25  ;;  %v863_v4 = vmul.f32 %v824_v9, %v2322_v51 }
 0x17c   :  { %v1196_v20 = vunpack.c.l.b16 %v1312_v27  ;;  %v990_v43 = vrot.slane %v989_v6, 1  ;;  %v982_v16 = vrot.slane %v981_v57, 2  ;;  %v944_v17 = vrot.slane %v847_v23, 4  ;;  %v764_v56 = vpop.permute.xlu1 %763 }
 0x17d   :  { %v1213_v29 = vunpack.c.l.b16 %v1329_v8  ;;  %v1027_v22 = vmax.f32 %v1025_v58, %v1026_v24  ;;  %v938_v28 = vrot.slane %v846_v0, 4  ;;  %v1040_v19 = vrot.slane %v863_v4, 4 }
 0x17e   :  { %v1233_v2 = vsel %vm1220_vm1, %v1196_v20, %v2215_v55  ;;  %v991_v62 = vmax.f32 %v989_v6, %v990_v43  ;;  %v983_v7 = vmax.f32 %v981_v57, %v982_v16  ;;  %v945_v50 = vmax.f32 %v847_v23, %v944_v17 }
 0x17f   :  { %v1328_v59 = vpack.c.bf16 %v1027_v22, %v1027_v22  ;;  %v939_v26 = vmax.f32 %v846_v0, %v938_v28  ;;  %v1234_v33 = vsel %vm1222_vm2, %v1197_v18, %v1233_v2  ;;  %v1041_v54 = vmax.f32 %v863_v4, %v1040_v19  ;;  %v832_v28 = vpop.permute.xlu0 %831 }
 0x180   :  { %v1322_v61 = vpack.c.bf16 %v991_v62, %v991_v62  ;;  %v984_v1 = vrot.slane %v983_v7, 1  ;;  %v946_v5 = vrot.slane %v945_v50, 2  ;;  %v2323_v49 = vmax.f32 %v2158_v30, 0.0  ;;  %v828_v4 = vpop.permute.xlu1 %827 }
 0x181   :  { %v1212_v15 = vunpack.c.l.b16 %v1328_v59  ;;  %v940_v63 = vrot.slane %v939_v26, 2  ;;  %v1042_v14 = vrot.slane %v1041_v54, 2  ;;  %v2324_v39 = vmax.f32 %v2121_v48, 0.0 }
 0x182   :  { %v862_v46 = vmul.f32 %v820_v42, %v2323_v49  ;;  %v1206_v45 = vunpack.c.l.b16 %v1322_v61  ;;  %v985_v40 = vmax.f32 %v983_v7, %v984_v1  ;;  %v947_v36 = vmax.f32 %v945_v50, %v946_v5 }
 0x183   :  { %v856_v55 = vmul.f32 %v796_v12, %v2324_v39  ;;  %v1247_v53 = vsel %vm1220_vm1, %v1212_v15, %v1246_v60  ;;  %v941_v37 = vmax.f32 %v939_v26, %v940_v63  ;;  %v1043_v9 = vmax.f32 %v1041_v54, %v1042_v14 }
 0x184   :  { %v1034_v52 = vrot.slane %v862_v46, 4  ;;  %v1321_v38 = vpack.c.bf16 %v985_v40, %v985_v40  ;;  %v948_v30 = vrot.slane %v947_v36, 1  ;;  %v1248_v18 = vsel %vm1222_vm2, %v1213_v29, %v1247_v53  ;;  %v800_v63 = vpop.permute.xlu1 %799 }
 0x185   :  { %v998_v32 = vrot.slane %v856_v55, 4  ;;  %v942_v34 = vrot.slane %v941_v37, 1  ;;  %v1044_v58 = vrot.slane %v1043_v9, 1  ;;  %v2325_v27 = vmax.f32 %v2127_v3, 0.0 }
 0x186   :  { %v1035_v42 = vmax.f32 %v862_v46, %v1034_v52  ;;  %v1205_v57 = vunpack.c.l.b16 %v1321_v38  ;;  %v949_v41 = vmax.f32 %v947_v36, %v948_v30  ;;  %v2326_v60 = vmax.f32 %v2097_v11, 0.0 }
 0x187   :  { %v999_v48 = vmax.f32 %v856_v55, %v998_v32  ;;  %v855_v6 = vmul.f32 %v792_v44, %v2325_v27  ;;  %v943_v24 = vmax.f32 %v941_v37, %v942_v34  ;;  %v1045_v25 = vmax.f32 %v1043_v9, %v1044_v58 }
 0x188   :  { %v1036_v23 = vrot.slane %v1035_v42, 2  ;;  %v849_v8 = vmul.f32 %v768_v10, %v2326_v60  ;;  %v1241_v20 = vsel %vm1222_vm2, %v1205_v57, %v2225_v47  ;;  %v1315_v43 = vpack.c.bf16 %v949_v41, %v949_v41 }
 0x189   :  { %v1000_v0 = vrot.slane %v999_v48, 2  ;;  %v992_v51 = vrot.slane %v855_v6, 4  ;;  %v1314_v29 = vpack.c.bf16 %v943_v24, %v943_v24  ;;  %v705_v22 = vmax.f32 %v2178_v31, 0.0 }
 0x18a   :  { %v1037_v16 = vmax.f32 %v1035_v42, %v1036_v23  ;;  %v956_v17 = vrot.slane %v849_v8, 4  ;;  %v1331_v19 = vpack.c.bf16 %v1045_v25, %v1045_v25  ;;  %v1242_v12 = vsel %vm1224_vm3, %v1206_v45, %v1241_v20 }
 0x18b   :  { %v1001_v3 = vmax.f32 %v999_v48, %v1000_v0  ;;  %v993_v44 = vmax.f32 %v855_v6, %v992_v51  ;;  %v1199_v62 = vunpack.c.l.b16 %v1315_v43  ;;  %v1198_v7 = vunpack.c.l.b16 %v1314_v29 }
 0x18c   :  { %v1038_v11 = vrot.slane %v1037_v16, 1  ;;  %v957_v2 = vmax.f32 %v849_v8, %v956_v17  ;;  %v2327_v54 = vmax.f32 %v2074_v21, 0.0  ;;  %v865_v1 = vmul.f32 %v832_v28, %v705_v22 }
 0x18d   :  { %v1002_v50 = vrot.slane %v1001_v3, 1  ;;  %v994_v59 = vrot.slane %v993_v44, 2  ;;  %v1235_v5 = vsel %vm1224_vm3, %v1198_v7, %v1234_v33  ;;  %v2328_v46 = vmax.f32 %v2167_v35, 0.0 }
 0x18e   :  { %v1039_v26 = vmax.f32 %v1037_v16, %v1038_v11  ;;  %v958_v47 = vrot.slane %v957_v2, 2  ;;  %v848_v61 = vmul.f32 %v764_v56, %v2327_v54  ;;  %v1236_v45 = vsel %vm1226_vm4, %v1199_v62, %v1235_v5 }
 0x18f   :  { %v1003_v49 = vmax.f32 %v1001_v3, %v1002_v50  ;;  %v995_v31 = vmax.f32 %v993_v44, %v994_v59  ;;  %v864_v15 = vmul.f32 %v828_v4, %v2328_v46  ;;  %v1052_v36 = vrot.slane %v865_v1, 4 }
 0x190   :  { %v1330_v14 = vpack.c.bf16 %v1039_v26, %v1039_v26  ;;  %v959_v39 = vmax.f32 %v957_v2, %v958_v47  ;;  %v950_v55 = vrot.slane %v848_v61, 4  ;;  %v1215_v53 = vunpack.c.l.b16 %v1331_v19 }
 0x191   :  { %v996_v40 = vrot.slane %v995_v31, 1  ;;  %v1046_v52 = vrot.slane %v864_v15, 4  ;;  %v2329_v37 = vmax.f32 %v2140_v13, 0.0  ;;  %v1053_v10 = vmax.f32 %v865_v1, %v1052_v36 }
 0x192   :  { %v1214_v21 = vunpack.c.l.b16 %v1330_v14  ;;  %v951_v56 = vmax.f32 %v848_v61, %v950_v55  ;;  %v960_v32 = vrot.slane %v959_v39, 1  ;;  %v1324_v30 = vpack.c.bf16 %v1003_v49, %v1003_v49 }
 0x193   :  { %v857_v33 = vmul.f32 %v800_v63, %v2329_v37  ;;  %v997_v9 = vmax.f32 %v995_v31, %v996_v40  ;;  %v1047_v35 = vmax.f32 %v864_v15, %v1046_v52  ;;  %v1054_v48 = vrot.slane %v1053_v10, 2 }
 0x194   :  { %v1249_v38 = vsel %vm1224_vm3, %v1214_v21, %v1248_v18  ;;  %v952_v42 = vrot.slane %v951_v56, 2  ;;  %v961_v60 = vmax.f32 %v959_v39, %v960_v32  ;;  %v1208_v24 = vunpack.c.l.b16 %v1324_v30 }
 0x195   :  { %v1004_v34 = vrot.slane %v857_v33, 4  ;;  %v1323_v58 = vpack.c.bf16 %v997_v9, %v997_v9  ;;  %v1048_v27 = vrot.slane %v1047_v35, 2  ;;  %v1250_v6 = vsel %vm1226_vm4, %v1215_v53, %v1249_v38 }
 0x196   :  { %v953_v57 = vmax.f32 %v951_v56, %v952_v42  ;;  %v1055_v13 = vmax.f32 %v1053_v10, %v1054_v48  ;;  %v1317_v17 = vpack.c.bf16 %v961_v60, %v961_v60 }
 0x197   :  { %v1005_v41 = vmax.f32 %v857_v33, %v1004_v34  ;;  %v1207_v23 = vunpack.c.l.b16 %v1323_v58  ;;  %v1049_v8 = vmax.f32 %v1047_v35, %v1048_v27 }
 0x198   :  { %v954_v25 = vrot.slane %v953_v57, 1  ;;  %v1056_v18 = vrot.slane %v1055_v13, 1  ;;  %v1201_v62 = vunpack.c.l.b16 %v1317_v17 }
 0x199   :  { %v1006_v0 = vrot.slane %v1005_v41, 2  ;;  %v1243_v51 = vsel %vm1226_vm4, %v1207_v23, %v1242_v12  ;;  %v1050_v4 = vrot.slane %v1049_v8, 1 }
 0x19a   :  { %v955_v20 = vmax.f32 %v953_v57, %v954_v25  ;;  %v1244_v16 = vsel %vm1228_vm5, %v1208_v24, %v1243_v51  ;;  %v1057_v29 = vmax.f32 %v1055_v13, %v1056_v18 }
 0x19b   :  { %v1007_v43 = vmax.f32 %v1005_v41, %v1006_v0  ;;  %v1051_v3 = vmax.f32 %v1049_v8, %v1050_v4 }
 0x19c   :  { %v1316_v44 = vpack.c.bf16 %v955_v20, %v955_v20  ;;  %v1333_v28 = vpack.c.bf16 %v1057_v29, %v1057_v29 }
 0x19d   :  { %v1008_v22 = vrot.slane %v1007_v43, 1  ;;  %v1332_v19 = vpack.c.bf16 %v1051_v3, %v1051_v3 }
 0x19e   :  { %v1200_v11 = vunpack.c.l.b16 %v1316_v44  ;;  %v1217_v12 = vunpack.c.l.b16 %v1333_v28 }
 0x19f   :  { %v1009_v2 = vmax.f32 %v1007_v43, %v1008_v22  ;;  %v1216_v7 = vunpack.c.l.b16 %v1332_v19 }
 0x1a0   :  { %v1237_v50 = vsel %vm1228_vm5, %v1200_v11, %v1236_v45 }
 0x1a1   :  { %v1325_v59 = vpack.c.bf16 %v1009_v2, %v1009_v2  ;;  %v1238_v26 = vsel %vm1230_vm6, %v1201_v62, %v1237_v50  ;;  %v1251_v47 = vsel %vm1228_vm5, %v1216_v7, %v1250_v6 }
 0x1a2   :  { %v1254_v54 = vpack.c.b16 %v1238_v26, %v1238_v26  ;;  %v1252_v61 = vsel %vm1230_vm6, %v1217_v12, %v1251_v47 }
 0x1a3   :  { %v1209_v1 = vunpack.c.l.b16 %v1325_v59  ;;  %v1256_v5 = vpack.c.b16 %v1252_v61, %v1252_v61 }
 0x1a4   :  { %1262 = vst [vmem:[%s2280_s3 + $0x4] sm:$0xf] %v1254_v54 }
 0x1a5   :  { %v1245_v49 = vsel %vm1230_vm6, %v1209_v1, %v1244_v16  ;;  %1264 = vst [vmem:[%s2280_s3 + $0xc] sm:$0xf] %v1256_v5 }
 0x1a6   :  { %v1255_v31 = vpack.c.b16 %v1245_v49, %v1245_v49 }
 0x1a8   :  { %1263 = vst [vmem:[%s2280_s3 + $0x8] sm:$0xf] %v1255_v31 }

// kernel: _forward.5
= control target key start
LH: loop header
LB: loop body
LE: loop exit
PB: predicated region body
PF: predicated region fallthrough
CT: control target
= control target key end

     0   :  { %v1662_v0 = vmov 0   ;;  %v1663_v57 = vmov 1   ;;  %v1664_v60 = vmov 2   ;;  %vm1450_vm0 = vcmask 1041409   ;;  %s2587_s0 = inlined_call_operand.vmem [shape: f32[16,16,4], index: 0, kind: input, shape index: {}]   ;;  %s2588_s3 = inlined_call_operand.vmem [shape: bf16[128,128], index: 3, kind: input, shape index: {}]   ;;  %s2589_s1 = inlined_call_operand.vmem [shape: bf16[16,16,128], index: 1, kind: input, shape index: {}]   ;;  %s2590_s2 = inlined_call_operand.vmem [shape: f32[3,128], index: 2, kind: input, shape index: {}]   ;;  %s2591_s4 = inlined_call_operand.vmem [shape: f32[1,128], index: 4, kind: input, shape index: {}]   ;;  %s2592_s5 = inlined_call_operand.vmem [shape: bf16[16,128], index: 5, kind: output, shape index: {}]  }
   0x1   :  { %1631 = vset.pattern.permute.xlu1 %v1662_v0  ;;  %1630 = vset.pattern.permute.xlu0 %v1662_v0  ;;  %v1699_v1 = vld [vmem:[%s2587_s0 + $0x10] sm:$0xff]  ;;  %v1704_v2 = vld [vmem:[%s2587_s0] sm:$0xff]  ;;  %v1711_v3 = vld [vmem:[%s2587_s0 + $0x18] sm:$0xff]  ;;  %vm1452_vm1 = vcmask 1042434   ;;  %vm1454_vm2 = vcmask 1043459   ;;  %vm1456_vm3 = vcmask 1044484  }
   0x2   :  { %66 = vperm.xlu1 %1631, %v1699_v1   ;;  %56 = vperm.xlu0 %1630, %v1704_v2   ;;  %v1716_v4 = vld [vmem:[%s2587_s0 + $0x8] sm:$0xff]  ;;  %v1638_v5 = vld [vmem:[%s2588_s3] sm:$0xff]   ;;  %v1640_v9 = vld [vmem:[%s2588_s3 + $0x10] sm:$0xff]   ;;  %vm1458_vm4 = vcmask 1045509   ;;  %vm1460_vm5 = vcmask 1046534   ;;  %vm1462_vm6 = vcmask 1047559  }
   0x3   :  { %v1726_v6 = vld [vmem:[%s2587_s0 + $0x28] sm:$0xff]  ;;  %v1734_v8 = vld [vmem:[%s2587_s0 + $0x20] sm:$0xff]  ;;  %1562 = vmatprep.subr.bf16.mxu0 %v1638_v5  ;;  %1610 = vmatprep.subr.bf16.mxu1 %v1638_v5  ;;  %v1744_v10 = vld [vmem:[%s2587_s0 + $0x38] sm:$0xff] }
   0x4   :  { %v1639_v7 = vld [vmem:[%s2588_s3 + $0x8] sm:$0xff]   ;;  %1563 = vmatpush3.bf16.msra.mxu0 %v1638_v5  ;;  %1618 = vmatpush3.bf16.msra.mxu1 %v1638_v5  ;;  %v1749_v11 = vld [vmem:[%s2587_s0 + $0x30] sm:$0xff]  ;;  %v1641_v12 = vld [vmem:[%s2588_s3 + $0x18] sm:$0xff]  }
   0x5   :  { %1564 = vmatprep.subr.bf16.mxu0 %v1639_v7  ;;  %1611 = vmatprep.subr.bf16.mxu1 %v1639_v7  ;;  %v1759_v13 = vld [vmem:[%s2587_s0 + $0x48] sm:$0xff]  ;;  %v1764_v14 = vld [vmem:[%s2587_s0 + $0x40] sm:$0xff]  ;;  %v1777_v17 = vld [vmem:[%s2587_s0 + $0x58] sm:$0xff] }
   0x6   :  { %71 = vperm.xlu1 %1631, %v1711_v3   ;;  %61 = vperm.xlu0 %1630, %v1716_v4   ;;  %v1642_v15 = vld [vmem:[%s2588_s3 + $0x20] sm:$0xff]   ;;  %v1782_v18 = vld [vmem:[%s2587_s0 + $0x50] sm:$0xff]  ;;  %v1643_v19 = vld [vmem:[%s2588_s3 + $0x28] sm:$0xff]  }
   0x7   :  { %v1646_v16 = vld [vmem:[%s2589_s1] sm:$0xff]   ;;  %v1792_v20 = vld [vmem:[%s2587_s0 + $0x68] sm:$0xff]  ;;  %v1644_v22 = vld [vmem:[%s2588_s3 + $0x30] sm:$0xff]  }
   0x8   :  { %1565 = vmatpush3.bf16.msra.mxu0 %v1639_v7  ;;  %1619 = vmatpush3.bf16.msra.mxu1 %v1639_v7  ;;  %v1797_v21 = vld [vmem:[%s2587_s0 + $0x60] sm:$0xff]  ;;  %v1807_v23 = vld [vmem:[%s2587_s0 + $0x78] sm:$0xff]  ;;  %v1812_v24 = vld [vmem:[%s2587_s0 + $0x70] sm:$0xff] }
   0x9   :  { %1566 = vmatprep.subr.bf16.mxu0 %v1640_v9  ;;  %1612 = vmatprep.subr.bf16.mxu1 %v1640_v9  ;;  %v1654_v25 = vld [vmem:[%s2589_s1 + $0x40] sm:$0xff]   ;;  %v1645_v26 = vld [vmem:[%s2588_s3 + $0x38] sm:$0xff]   ;;  %v1825_v27 = vld [vmem:[%s2587_s0 + $0x88] sm:$0xff] }
   0xa   :  { %81 = vperm.xlu1 %1631, %v1726_v6   ;;  %76 = vperm.xlu0 %1630, %v1734_v8   ;;  %v1830_v28 = vld [vmem:[%s2587_s0 + $0x80] sm:$0xff]  ;;  %v1835_v29 = vld [vmem:[%s2587_s0 + $0x98] sm:$0xff]  ;;  %v1842_v30 = vld [vmem:[%s2587_s0 + $0x90] sm:$0xff] }
   0xb   :  { %1578 = vmatprep.mubr.bf16.mxu0 %v1646_v16  ;;  %1594 = vmatprep.mubr.bf16.mxu1 %v1654_v25  ;;  %v1647_v31 = vld [vmem:[%s2589_s1 + $0x8] sm:$0xff]   ;;  %v1648_v33 = vld [vmem:[%s2589_s1 + $0x10] sm:$0xff]   ;;  %v1866_v36 = vld [vmem:[%s2587_s0 + $0xa0] sm:$0xff] }
   0xc   :  { %1567 = vmatpush3.bf16.msra.mxu0 %v1640_v9  ;;  %1620 = vmatpush3.bf16.msra.mxu1 %v1640_v9  ;;  %v1655_v32 = vld [vmem:[%s2589_s1 + $0x48] sm:$0xff]   ;;  %v1656_v34 = vld [vmem:[%s2589_s1 + $0x50] sm:$0xff]   ;;  %v1873_v37 = vld [vmem:[%s2587_s0 + $0xb8] sm:$0xff] }
   0xd   :  { %1568 = vmatprep.subr.bf16.mxu0 %v1641_v12  ;;  %1613 = vmatprep.subr.bf16.mxu1 %v1641_v12  ;;  %v1861_v35 = vld [vmem:[%s2587_s0 + $0xa8] sm:$0xff]  ;;  %v1878_v38 = vld [vmem:[%s2587_s0 + $0xb0] sm:$0xff]  ;;  %v1649_v39 = vld [vmem:[%s2589_s1 + $0x18] sm:$0xff]  }
   0xe   :  { %91 = vperm.xlu1 %1631, %v1744_v10   ;;  %86 = vperm.xlu0 %1630, %v1749_v11   ;;  %v1657_v40 = vld [vmem:[%s2589_s1 + $0x58] sm:$0xff]   ;;  %v1650_v41 = vld [vmem:[%s2589_s1 + $0x20] sm:$0xff]   ;;  %v1897_v43 = vld [vmem:[%s2587_s0 + $0xc8] sm:$0xff] }
   0xf   :  { %v1658_v42 = vld [vmem:[%s2589_s1 + $0x60] sm:$0xff]   ;;  %v1909_v45 = vld [vmem:[%s2587_s0 + $0xd8] sm:$0xff]  ;;  %v1914_v46 = vld [vmem:[%s2587_s0 + $0xd0] sm:$0xff] }
  0x10   :  { %1569 = vmatpush3.bf16.msra.mxu0 %v1641_v12  ;;  %1621 = vmatpush3.bf16.msra.mxu1 %v1641_v12  ;;  %v1902_v44 = vld [vmem:[%s2587_s0 + $0xc0] sm:$0xff]  ;;  %v1651_v47 = vld [vmem:[%s2589_s1 + $0x28] sm:$0xff]   ;;  %v1652_v49 = vld [vmem:[%s2589_s1 + $0x30] sm:$0xff]  }
  0x11   :  { %1570 = vmatprep.subr.bf16.mxu0 %v1642_v15  ;;  %1614 = vmatprep.subr.bf16.mxu1 %v1642_v15  ;;  %v1659_v48 = vld [vmem:[%s2589_s1 + $0x68] sm:$0xff]   ;;  %v1660_v50 = vld [vmem:[%s2589_s1 + $0x70] sm:$0xff]   ;;  %v1938_v52 = vld [vmem:[%s2587_s0 + $0xe0] sm:$0xff] }
  0x12   :  { %101 = vperm.xlu1 %1631, %v1759_v13   ;;  %96 = vperm.xlu0 %1630, %v1764_v14   ;;  %v1933_v51 = vld [vmem:[%s2587_s0 + $0xe8] sm:$0xff]  ;;  %v1945_v53 = vld [vmem:[%s2587_s0 + $0xf8] sm:$0xff]  ;;  %v1950_v54 = vld [vmem:[%s2587_s0 + $0xf0] sm:$0xff] }
  0x13   :  { %v1653_v55 = vld [vmem:[%s2589_s1 + $0x38] sm:$0xff]  }
  0x14   :  { %1571 = vmatpush3.bf16.msra.mxu0 %v1642_v15  ;;  %1622 = vmatpush3.bf16.msra.mxu1 %v1642_v15  ;;  %v1661_v56 = vld [vmem:[%s2589_s1 + $0x78] sm:$0xff]  }
  0x15   :  { %1572 = vmatprep.subr.bf16.mxu0 %v1643_v19  ;;  %1615 = vmatprep.subr.bf16.mxu1 %v1643_v19 }
  0x16   :  { %111 = vperm.xlu1 %1631, %v1777_v17   ;;  %106 = vperm.xlu0 %1630, %v1782_v18  }
  0x18   :  { %1573 = vmatpush3.bf16.msra.mxu0 %v1643_v19  ;;  %1623 = vmatpush3.bf16.msra.mxu1 %v1643_v19 }
  0x19   :  { %1574 = vmatprep.subr.bf16.mxu0 %v1644_v22  ;;  %1616 = vmatprep.subr.bf16.mxu1 %v1644_v22 }
  0x1a   :  { %121 = vperm.xlu1 %1631, %v1792_v20   ;;  %116 = vperm.xlu0 %1630, %v1797_v21  }
  0x1c   :  { %1575 = vmatpush3.bf16.msra.mxu0 %v1644_v22  ;;  %1624 = vmatpush3.bf16.msra.mxu1 %v1644_v22 }
  0x1d   :  { %1576 = vmatprep.subr.bf16.mxu0 %v1645_v26  ;;  %1617 = vmatprep.subr.bf16.mxu1 %v1645_v26 }
  0x1e   :  { %131 = vperm.xlu1 %1631, %v1807_v23   ;;  %126 = vperm.xlu0 %1630, %v1812_v24  }
  0x20   :  { %1577 = vmatpush3.bf16.msra.mxu0 %v1645_v26  ;;  %1625 = vmatpush3.bf16.msra.mxu1 %v1645_v26 }
  0x22   :  { %141 = vperm.xlu1 %1631, %v1825_v27   ;;  %136 = vperm.xlu0 %1630, %v1830_v28  }
  0x23   :  { %1579 = vmatmul.mubr.bf16.vlgmr.msra.gmra.mrb[0].mxu0 %v1647_v31  ;;  %1595 = vmatmul.mubr.bf16.vlgmr.msra.gmra.mrb[0].mxu1 %v1655_v32 }
  0x24   :  { %1582 = vmatprep.mubr.bf16.mxu0 %v1648_v33  ;;  %1598 = vmatprep.mubr.bf16.mxu1 %v1656_v34 }
  0x26   :  { %151 = vperm.xlu1 %1631, %v1835_v29   ;;  %146 = vperm.xlu0 %1630, %v1842_v30  }
  0x2a   :  { %161 = vperm.xlu1 %1631, %v1861_v35   ;;  %156 = vperm.xlu0 %1630, %v1866_v36  }
  0x2b   :  { %1583 = vmatmul.mubr.bf16.gmra.mrb[4].mxu0 %v1649_v39  ;;  %1599 = vmatmul.mubr.bf16.gmra.mrb[4].mxu1 %v1657_v40 }
  0x2c   :  { %1586 = vmatprep.mubr.bf16.mxu0 %v1650_v41  ;;  %1602 = vmatprep.mubr.bf16.mxu1 %v1658_v42 }
  0x2e   :  { %171 = vperm.xlu1 %1631, %v1873_v37   ;;  %166 = vperm.xlu0 %1630, %v1878_v38  }
  0x32   :  { %181 = vperm.xlu1 %1631, %v1897_v43   ;;  %176 = vperm.xlu0 %1630, %v1902_v44  }
  0x33   :  { %1587 = vmatmul.mubr.bf16.gmra.mrb[8].mxu0 %v1651_v47  ;;  %1603 = vmatmul.mubr.bf16.gmra.mrb[8].mxu1 %v1659_v48 }
  0x34   :  { %1590 = vmatprep.mubr.bf16.mxu0 %v1652_v49  ;;  %1606 = vmatprep.mubr.bf16.mxu1 %v1660_v50 }
  0x36   :  { %191 = vperm.xlu1 %1631, %v1909_v45   ;;  %186 = vperm.xlu0 %1630, %v1914_v46  }
  0x3a   :  { %201 = vperm.xlu1 %1631, %v1933_v51   ;;  %196 = vperm.xlu0 %1630, %v1938_v52  }
  0x3b   :  { %1591 = vmatmul.mubr.bf16.gmra.mrb[12].mxu0 %v1653_v55  ;;  %1607 = vmatmul.mubr.bf16.gmra.mrb[12].mxu1 %v1661_v56 }
  0x3e   :  { %211 = vperm.xlu1 %1631, %v1945_v53   ;;  %206 = vperm.xlu0 %1630, %v1950_v54  }
  0x42   :  { %1633 = vset.pattern.permute.xlu1 %v1663_v57  ;;  %1632 = vset.pattern.permute.xlu0 %v1663_v57 }
  0x43   :  { %255 = vperm.xlu1 %1633, %v1716_v4   ;;  %251 = vperm.xlu0 %1632, %v1704_v2  }
  0x47   :  { %259 = vperm.xlu1 %1633, %v1699_v1   ;;  %263 = vperm.xlu0 %1632, %v1711_v3  }
  0x4b   :  { %267 = vperm.xlu1 %1633, %v1734_v8   ;;  %271 = vperm.xlu0 %1632, %v1726_v6  }
  0x4f   :  { %275 = vperm.xlu1 %1633, %v1749_v11   ;;  %279 = vperm.xlu0 %1632, %v1744_v10  }
  0x53   :  { %283 = vperm.xlu1 %1633, %v1764_v14   ;;  %287 = vperm.xlu0 %1632, %v1759_v13  }
  0x57   :  { %291 = vperm.xlu1 %1633, %v1782_v18   ;;  %295 = vperm.xlu0 %1632, %v1777_v17  }
  0x5b   :  { %299 = vperm.xlu1 %1633, %v1797_v21   ;;  %303 = vperm.xlu0 %1632, %v1792_v20  }
  0x5f   :  { %307 = vperm.xlu1 %1633, %v1812_v24   ;;  %311 = vperm.xlu0 %1632, %v1807_v23  }
  0x63   :  { %315 = vperm.xlu1 %1633, %v1830_v28   ;;  %319 = vperm.xlu0 %1632, %v1825_v27  }
  0x67   :  { %323 = vperm.xlu1 %1633, %v1842_v30   ;;  %327 = vperm.xlu0 %1632, %v1835_v29  }
  0x6b   :  { %331 = vperm.xlu1 %1633, %v1866_v36   ;;  %335 = vperm.xlu0 %1632, %v1861_v35  }
  0x6f   :  { %339 = vperm.xlu1 %1633, %v1878_v38   ;;  %343 = vperm.xlu0 %1632, %v1873_v37  }
  0x73   :  { %347 = vperm.xlu1 %1633, %v1902_v44   ;;  %351 = vperm.xlu0 %1632, %v1897_v43  }
  0x77   :  { %355 = vperm.xlu1 %1633, %v1914_v46   ;;  %359 = vperm.xlu0 %1632, %v1909_v45  }
  0x7b   :  { %363 = vperm.xlu1 %1633, %v1938_v52   ;;  %367 = vperm.xlu0 %1632, %v1933_v51  }
  0x7f   :  { %371 = vperm.xlu1 %1633, %v1950_v54   ;;  %375 = vperm.xlu0 %1632, %v1945_v53  }
  0x81   :  { %v1992_v58 = vpop.permute.xlu1 %66  ;;  %v1994_v59 = vpop.permute.xlu0 %56 }
  0x83   :  { %1634 = vset.pattern.permute.xlu1 %v1664_v60  ;;  %1635 = vset.pattern.permute.xlu0 %v1664_v60 }
  0x84   :  { %447 = vperm.xlu1 %1634, %v1704_v2   ;;  %451 = vperm.xlu0 %1635, %v1716_v4  }
  0x85   :  { %v1998_v61 = vpop.permute.xlu1 %71  ;;  %v2000_v62 = vpop.permute.xlu0 %61 }
  0x88   :  { %455 = vperm.xlu1 %1634, %v1699_v1   ;;  %463 = vperm.xlu0 %1635, %v1734_v8  }
  0x89   :  { %v2004_v63 = vpop.permute.xlu1 %81  ;;  %v2006_v0 = vpop.permute.xlu0 %76 }
  0x8c   :  { %459 = vperm.xlu1 %1634, %v1711_v3   ;;  %471 = vperm.xlu0 %1635, %v1749_v11  }
  0x8d   :  { %v2010_v5 = vpop.permute.xlu1 %91  ;;  %v2012_v7 = vpop.permute.xlu0 %86 }
  0x90   :  { %467 = vperm.xlu1 %1634, %v1726_v6   ;;  %479 = vperm.xlu0 %1635, %v1764_v14  }
  0x91   :  { %v2016_v9 = vpop.permute.xlu1 %101  ;;  %v2018_v12 = vpop.permute.xlu0 %96 }
  0x94   :  { %475 = vperm.xlu1 %1634, %v1744_v10   ;;  %487 = vperm.xlu0 %1635, %v1782_v18  }
  0x95   :  { %v2022_v15 = vpop.permute.xlu1 %111  ;;  %v2024_v16 = vpop.permute.xlu0 %106 }
  0x98   :  { %483 = vperm.xlu1 %1634, %v1759_v13   ;;  %495 = vperm.xlu0 %1635, %v1797_v21  }
  0x99   :  { %v2028_v19 = vpop.permute.xlu1 %121  ;;  %v2030_v22 = vpop.permute.xlu0 %116 }
  0x9c   :  { %491 = vperm.xlu1 %1634, %v1777_v17   ;;  %503 = vperm.xlu0 %1635, %v1812_v24  }
  0x9d   :  { %v2034_v25 = vpop.permute.xlu1 %131  ;;  %v2036_v26 = vpop.permute.xlu0 %126 }
  0xa0   :  { %499 = vperm.xlu1 %1634, %v1792_v20   ;;  %511 = vperm.xlu0 %1635, %v1830_v28  }
  0xa1   :  { %v2040_v31 = vpop.permute.xlu1 %141  ;;  %v2042_v32 = vpop.permute.xlu0 %136 }
  0xa4   :  { %507 = vperm.xlu1 %1634, %v1807_v23   ;;  %519 = vperm.xlu0 %1635, %v1842_v30  }
  0xa5   :  { %v2046_v33 = vpop.permute.xlu1 %151  ;;  %v2048_v34 = vpop.permute.xlu0 %146 }
  0xa6   :  { %2593 = vst [vmem:[#allocation2_spill] sm:$0xff] %v2046_v33 }
  0xa8   :  { %515 = vperm.xlu1 %1634, %v1825_v27   ;;  %527 = vperm.xlu0 %1635, %v1866_v36  }
  0xa9   :  { %v2052_v39 = vpop.permute.xlu1 %161  ;;  %v2054_v40 = vpop.permute.xlu0 %156 }
  0xaa   :  { %2594 = vst [vmem:[#allocation3_spill] sm:$0xff] %v2052_v39 }
  0xac   :  { %523 = vperm.xlu1 %1634, %v1835_v29   ;;  %535 = vperm.xlu0 %1635, %v1878_v38  }
  0xad   :  { %v2058_v41 = vpop.permute.xlu1 %171  ;;  %v2060_v42 = vpop.permute.xlu0 %166 }
  0xae   :  { %2595 = vst [vmem:[#allocation4_spill] sm:$0xff] %v2058_v41  ;;  %2596 = vst [vmem:[#allocation5_spill] sm:$0xff] %v2060_v42 }
  0xb0   :  { %531 = vperm.xlu1 %1634, %v1861_v35   ;;  %543 = vperm.xlu0 %1635, %v1902_v44  }
  0xb1   :  { %v2064_v47 = vpop.permute.xlu1 %181  ;;  %v2066_v48 = vpop.permute.xlu0 %176 }
  0xb2   :  { %2597 = vst [vmem:[#allocation6_spill] sm:$0xff] %v2064_v47  ;;  %2598 = vst [vmem:[#allocation7_spill] sm:$0xff] %v2066_v48 }
  0xb4   :  { %539 = vperm.xlu1 %1634, %v1873_v37   ;;  %551 = vperm.xlu0 %1635, %v1914_v46  }
  0xb5   :  { %v2070_v49 = vpop.permute.xlu1 %191  ;;  %v2072_v50 = vpop.permute.xlu0 %186 }
  0xb6   :  { %2599 = vst [vmem:[#allocation8_spill] sm:$0xff] %v2070_v49  ;;  %2600 = vst [vmem:[#allocation9_spill] sm:$0xff] %v2072_v50  ;;  %v1665_v49 = vmov 3  }
  0xb8   :  { %547 = vperm.xlu1 %1634, %v1897_v43   ;;  %559 = vperm.xlu0 %1635, %v1938_v52  }
  0xb9   :  { %v2076_v55 = vpop.permute.xlu1 %201  ;;  %v2078_v56 = vpop.permute.xlu0 %196 }
  0xba   :  { %2601 = vst [vmem:[#allocation10_spill] sm:$0xff] %v2076_v55 }
  0xbc   :  { %555 = vperm.xlu1 %1634, %v1909_v45   ;;  %567 = vperm.xlu0 %1635, %v1950_v54  }
  0xbd   :  { %v2082_v57 = vpop.permute.xlu1 %211  ;;  %v2084_v60 = vpop.permute.xlu0 %206 }
  0xbe   :  { %2602 = vst [vmem:[#allocation11_spill] sm:$0xff] %v2082_v57 }
  0xc0   :  { %563 = vperm.xlu1 %1634, %v1933_v51   ;;  %1636 = vset.pattern.permute.xlu0 %v1665_v49 }
  0xc1   :  { %1099 = vperm.xlu0 %1636, %v1704_v2  }
  0xc2   :  { %v2088_v47 = vpop.permute.xlu1 %255  ;;  %v2090_v50 = vpop.permute.xlu0 %251 }
  0xc4   :  { %571 = vperm.xlu1 %1634, %v1945_v53  }
  0xc5   :  { %1111 = vperm.xlu0 %1636, %v1711_v3  }
  0xc6   :  { %v2094_v55 = vpop.permute.xlu1 %259  ;;  %v2096_v41 = vpop.permute.xlu0 %263 }
  0xc8   :  { %1637 = vset.pattern.permute.xlu1 %v1665_v49 }
  0xc9   :  { %1103 = vperm.xlu1 %1637, %v1716_v4   ;;  %1119 = vperm.xlu0 %1636, %v1726_v6  }
  0xca   :  { %v2100_v57 = vpop.permute.xlu1 %267  ;;  %v2102_v2 = vpop.permute.xlu0 %271 }
  0xcd   :  { %1107 = vperm.xlu1 %1637, %v1699_v1   ;;  %1127 = vperm.xlu0 %1636, %v1744_v10  }
  0xce   :  { %v2106_v48 = vpop.permute.xlu1 %275  ;;  %v2108_v3 = vpop.permute.xlu0 %279 }
  0xd1   :  { %1115 = vperm.xlu1 %1637, %v1734_v8   ;;  %1163 = vperm.xlu0 %1636, %v1830_v28  }
  0xd2   :  { %v2112_v49 = vpop.permute.xlu1 %283  ;;  %v2114_v4 = vpop.permute.xlu0 %287 }
  0xd5   :  { %1123 = vperm.xlu1 %1637, %v1749_v11   ;;  %1171 = vperm.xlu0 %1636, %v1842_v30  }
  0xd6   :  { %v2118_v6 = vpop.permute.xlu1 %291  ;;  %v2120_v1 = vpop.permute.xlu0 %295 }
  0xd9   :  { %1131 = vperm.xlu1 %1637, %v1764_v14   ;;  %1179 = vperm.xlu0 %1636, %v1866_v36  }
  0xda   :  { %v2124_v10 = vpop.permute.xlu1 %299  ;;  %v2126_v8 = vpop.permute.xlu0 %303 }
  0xdd   :  { %1167 = vperm.xlu1 %1637, %v1825_v27   ;;  %1187 = vperm.xlu0 %1636, %v1878_v38  }
  0xde   :  { %v2130_v28 = vpop.permute.xlu1 %307  ;;  %v2132_v11 = vpop.permute.xlu0 %311 }
  0xe1   :  { %1175 = vperm.xlu1 %1637, %v1835_v29   ;;  %1135 = vperm.xlu0 %1636, %v1759_v13   ;;  %v214_v13 = vlaneseq }
  0xe2   :  { %v2136_v30 = vpop.permute.xlu1 %315  ;;  %v2138_v14 = vpop.permute.xlu0 %319 }
  0xe3   :  { %v215_v39 = vshrl.u32 %v214_v13, 7 }
  0xe5   :  { %1183 = vperm.xlu1 %1637, %v1861_v35   ;;  %1199 = vperm.xlu0 %1636, %v1897_v43   ;;  %v216_v42 = vsub.s32 0, %v215_v39 }
  0xe6   :  { %v2142_v36 = vpop.permute.xlu1 %323  ;;  %v2144_v27 = vpop.permute.xlu0 %327 }
  0xe7   :  { %2603 = vst [vmem:[#allocation12_spill] sm:$0xff] %v2144_v27 }
  0xe9   :  { %1191 = vperm.xlu1 %1637, %v1873_v37   ;;  %1143 = vperm.xlu0 %1636, %v1777_v17  }
  0xea   :  { %v2148_v38 = vpop.permute.xlu1 %331  ;;  %v2150_v29 = vpop.permute.xlu0 %335 }
  0xeb   :  { %2604 = vst [vmem:[#allocation13_spill] sm:$0xff] %v2150_v29  ;;  %v380_v29 = vsub.s32 1, %v215_v39 }
  0xed   :  { %1195 = vperm.xlu1 %1637, %v1902_v44   ;;  %1207 = vperm.xlu0 %1636, %v1909_v45   ;;  %v53_v44 = vld [vmem:[%s2590_s2] sm:$0x7] }
  0xee   :  { %v2154_v35 = vpop.permute.xlu1 %339  ;;  %v2156_v43 = vpop.permute.xlu0 %343 }
  0xef   :  { %2605 = vst [vmem:[#allocation14_spill] sm:$0xff] %v2154_v35  ;;  %2606 = vst [vmem:[#allocation15_spill] sm:$0xff] %v2156_v43 }
  0xf1   :  { %1139 = vperm.xlu1 %1637, %v1782_v18   ;;  %1151 = vperm.xlu0 %1636, %v1792_v20   ;;  %v2173_v18 = vrot.slane %v53_v44, %v216_v42  ;;  %v2175_v20 = vrot.slane %v53_v44, %v380_v29  ;;  %v576_v42 = vsub.s32 2, %v215_v39 }
  0xf2   :  { %v2160_v37 = vpop.permute.xlu1 %347  ;;  %v2162_v17 = vpop.permute.xlu0 %351 }
  0xf3   :  { %2607 = vst [vmem:[#allocation16_spill] sm:$0xff] %v2160_v37  ;;  %2608 = vst [vmem:[#allocation17_spill] sm:$0xff] %v2162_v17 }
  0xf5   :  { %1203 = vperm.xlu1 %1637, %v1914_v46   ;;  %1215 = vperm.xlu0 %1636, %v1933_v51   ;;  %v246_v51 = vmul.f32 %v2173_v18, %v2078_v56 }
  0xf6   :  { %v2169_v45 = vpop.permute.xlu1 %355  ;;  %v2171_v13 = vpop.permute.xlu0 %359 }
  0xf7   :  { %2609 = vst [vmem:[#allocation18_spill] sm:$0xff] %v2169_v45  ;;  %2610 = vst [vmem:[#allocation19_spill] sm:$0xff] %v2171_v13  ;;  %v2184_v37 = vpop.f32.mrb[0].mxu0  ;;  %v2186_v45 = vpop.f32.mrb[0].mxu1 }
  0xf8   :  { %2612 = vst [vmem:[#allocation21_spill] sm:$0xff] %v2186_v45  ;;  %v868_v13 = vpop.f32.mrb[1].mxu0  ;;  %v2188_v29 = vpop.f32.mrb[1].mxu1 }
  0xf9   :  { %1147 = vperm.xlu1 %1637, %v1797_v21   ;;  %1159 = vperm.xlu0 %1636, %v1807_v23   ;;  %v2194_v21 = vpop.f32.mrb[2].mxu0  ;;  %v2196_v23 = vpop.f32.mrb[2].mxu1 }
  0xfa   :  { %v364_v17 = vpop.permute.xlu1 %363  ;;  %v2179_v46 = vpop.permute.xlu0 %367  ;;  %2614 = vst [vmem:[#allocation23_spill] sm:$0xff] %v2196_v23 }
  0xfb   :  { %2611 = vst [vmem:[#allocation20_spill] sm:$0xff] %v2179_v46  ;;  %v410_v43 = vmul.f32 %v2175_v20, %v364_v17  ;;  %v248_v46 = vmul.f32 %v2173_v18, %v2084_v60  ;;  %v871_v45 = vpop.f32.mrb[3].mxu0  ;;  %v2203_v35 = vpop.f32.mrb[3].mxu1  ;;  %v218_v60 = vmul.f32 %v2173_v18, %v1994_v59 }
  0xfc   :  { %2616 = vst [vmem:[#allocation25_spill] sm:$0xff] %v2203_v35 }
  0xfd   :  { %v2190_v33 = vadd.f32 %v410_v43, %v246_v51  ;;  %1211 = vperm.xlu1 %1637, %v1938_v52   ;;  %1223 = vperm.xlu0 %1636, %v1945_v53   ;;  %v383_v52 = vmul.f32 %v2175_v20, %v2088_v47  ;;  %v382_v53 = vmul.f32 %v2175_v20, %v2090_v50 }
  0xfe   :  { %v372_v56 = vpop.permute.xlu1 %371  ;;  %v2198_v17 = vpop.permute.xlu0 %375  ;;  %v2209_v43 = vrot.slane %v53_v44, %v576_v42  ;;  %v384_v47 = vmul.f32 %v2175_v20, %v2094_v55  ;;  %v386_v50 = vmul.f32 %v2175_v20, %v2100_v57  ;;  %v222_v55 = vmul.f32 %v2173_v18, %v2006_v0 }
  0xff   :  { %2613 = vst [vmem:[#allocation22_spill] sm:$0xff] %v2190_v33  ;;  %2615 = vst [vmem:[#allocation24_spill] sm:$0xff] %v2198_v17  ;;  %v412_v39 = vmul.f32 %v2175_v20, %v372_v56  ;;  %v219_v56 = vmul.f32 %v2173_v18, %v2000_v62  ;;  %v2218_v17 = vpop.f32.mrb[4].mxu0  ;;  %v2220_v33 = vpop.f32.mrb[4].mxu1 }
 0x100   :  { %2618 = vst [vmem:[#allocation27_spill] sm:$0xff] %v2220_v33  ;;  %v2228_v62 = vpop.f32.mrb[5].mxu1  ;;  %v220_v33 = vmul.f32 %v2173_v18, %v1992_v58  ;;  %v388_v58 = vmul.f32 %v2175_v20, %v2106_v48 }
 0x101   :  { %v2211_v51 = vadd.f32 %v412_v39, %v248_v46  ;;  %1155 = vperm.xlu1 %1637, %v1812_v24   ;;  %v415_v42 = vadd.f32 %v383_v52, %v219_v56  ;;  %v414_v24 = vadd.f32 %v382_v53, %v218_v60  ;;  %2619 = vst [vmem:[#allocation28_spill] sm:$0xff] %v2228_v62  ;;  %v2237_v23 = vpop.f32.mrb[6].mxu1 }
 0x102   :  { %v2239_v56 = vpop.f32.mrb[7].mxu1  ;;  %v418_v62 = vadd.f32 %v386_v50, %v222_v55 }
 0x103   :  { %2617 = vst [vmem:[#allocation26_spill] sm:$0xff] %v2211_v51  ;;  %v448_v44 = vpop.permute.xlu1 %447  ;;  %v452_v46 = vpop.permute.xlu0 %451 }
 0x104   :  { %v578_v39 = vmul.f32 %v2209_v43, %v448_v44  ;;  %v579_v59 = vmul.f32 %v2209_v43, %v452_v46  ;;  %v884_v51 = vpop.f32.mrb[5].mxu0  ;;  %v416_v44 = vadd.f32 %v384_v47, %v220_v33  ;;  %v385_v46 = vmul.f32 %v2175_v20, %v2096_v41 }
 0x105   :  { %1219 = vperm.xlu1 %1637, %v1950_v54   ;;  %v2235_v57 = vpop.f32.mrb[6].mxu0  ;;  %v221_v33 = vmul.f32 %v2173_v18, %v1998_v61  ;;  %v224_v41 = vmul.f32 %v2173_v18, %v2012_v7 }
 0x106   :  { %v610_v52 = vadd.f32 %v578_v39, %v414_v24  ;;  %v611_v53 = vadd.f32 %v579_v59, %v415_v42  ;;  %v887_v60 = vpop.f32.mrb[7].mxu0  ;;  %v2257_v48 = vpop.f32.mrb[8].mxu1 }
 0x107   :  { %v456_v0 = vpop.permute.xlu1 %455  ;;  %v464_v35 = vpop.permute.xlu0 %463  ;;  %v420_v59 = vadd.f32 %v388_v58, %v224_v41  ;;  %v389_v41 = vmul.f32 %v2175_v20, %v2108_v3  ;;  %v228_v3 = vmul.f32 %v2173_v18, %v2024_v16 }
 0x108   :  { %v2245_v54 = vadd.f32 %v868_v13, %v610_v52  ;;  %v2247_v27 = vadd.f32 %v871_v45, %v611_v53  ;;  %v580_v24 = vmul.f32 %v2209_v43, %v456_v0  ;;  %v582_v42 = vmul.f32 %v2209_v43, %v464_v35  ;;  %v2255_v39 = vpop.f32.mrb[8].mxu0 }
 0x109   :  { %v417_v13 = vadd.f32 %v385_v46, %v221_v33  ;;  %v387_v45 = vmul.f32 %v2175_v20, %v2102_v2  ;;  %v390_v35 = vmul.f32 %v2175_v20, %v2112_v49  ;;  %v2270_v46 = vpop.f32.mrb[9].mxu1  ;;  %v223_v2 = vmul.f32 %v2173_v18, %v2004_v63 }
 0x10a   :  { %v612_v47 = vadd.f32 %v580_v24, %v416_v44  ;;  %v614_v50 = vadd.f32 %v582_v42, %v418_v62  ;;  %v900_v44 = vpop.f32.mrb[9].mxu0  ;;  %v226_v49 = vmul.f32 %v2173_v18, %v2018_v12  ;;  %v2278_v0 = vpop.f32.mrb[10].mxu1  ;;  %v392_v63 = vmul.f32 %v2175_v20, %v2118_v6 }
 0x10b   :  { %v460_v55 = vpop.permute.xlu1 %459  ;;  %v472_v52 = vpop.permute.xlu0 %471  ;;  %v419_v33 = vadd.f32 %v387_v45, %v223_v2  ;;  %v225_v45 = vmul.f32 %v2173_v18, %v2010_v5 }
 0x10c   :  { %v2264_v61 = vadd.f32 %v2184_v37, %v612_v47  ;;  %v2266_v7 = vadd.f32 %v884_v51, %v614_v50  ;;  %v581_v62 = vmul.f32 %v2209_v43, %v460_v55  ;;  %v584_v53 = vmul.f32 %v2209_v43, %v472_v52  ;;  %v2276_v58 = vpop.f32.mrb[10].mxu0  ;;  %v2280_v42 = vpop.f32.mrb[11].mxu1 }
 0x10d   :  { %v903_v24 = vpop.f32.mrb[11].mxu0  ;;  %v422_v47 = vadd.f32 %v390_v35, %v226_v49  ;;  %v424_v2 = vadd.f32 %v392_v63, %v228_v3  ;;  %v394_v49 = vmul.f32 %v2175_v20, %v2124_v10  ;;  %v393_v3 = vmul.f32 %v2175_v20, %v2120_v1 }
 0x10e   :  { %v613_v37 = vadd.f32 %v581_v62, %v417_v13  ;;  %v616_v51 = vadd.f32 %v584_v53, %v420_v59  ;;  %v1592_v62 = vpop.f32.mrb[12].mxu0  ;;  %v2298_v53 = vpop.f32.mrb[12].mxu1  ;;  %v232_v1 = vmul.f32 %v2173_v18, %v2036_v26 }
 0x10f   :  { %v468_v50 = vpop.permute.xlu1 %467  ;;  %v480_v55 = vpop.permute.xlu0 %479 }
 0x110   :  { %v2287_v12 = vadd.f32 %v2194_v21, %v613_v37  ;;  %v2290_v52 = vadd.f32 %v2218_v17, %v616_v51  ;;  %v583_v13 = vmul.f32 %v2209_v43, %v468_v50  ;;  %v586_v59 = vmul.f32 %v2209_v43, %v480_v55  ;;  %v2310_v55 = vpop.f32.mrb[13].mxu1 }
 0x111   :  { %v421_v21 = vadd.f32 %v389_v41, %v225_v45  ;;  %v391_v17 = vmul.f32 %v2175_v20, %v2114_v4  ;;  %v227_v4 = vmul.f32 %v2173_v18, %v2016_v9  ;;  %v230_v41 = vmul.f32 %v2173_v18, %v2030_v22  ;;  %v2318_v63 = vpop.f32.mrb[14].mxu1 }
 0x112   :  { %v615_v35 = vadd.f32 %v583_v13, %v419_v33  ;;  %v618_v6 = vadd.f32 %v586_v59, %v422_v47  ;;  %v916_v47 = vpop.f32.mrb[13].mxu0  ;;  %v2320_v59 = vpop.f32.mrb[15].mxu1  ;;  %v396_v9 = vmul.f32 %v2175_v20, %v2130_v28 }
 0x113   :  { %v476_v37 = vpop.permute.xlu1 %475  ;;  %v488_v51 = vpop.permute.xlu0 %487  ;;  %v423_v45 = vadd.f32 %v391_v17, %v227_v4  ;;  %v229_v17 = vmul.f32 %v2173_v18, %v2022_v15 }
 0x114   :  { %v2304_v50 = vadd.f32 %v887_v60, %v615_v35  ;;  %v2306_v5 = vadd.f32 %v900_v44, %v618_v6  ;;  %v585_v16 = vmul.f32 %v2209_v43, %v476_v37  ;;  %v588_v33 = vmul.f32 %v2209_v43, %v488_v51  ;;  %v2316_v10 = vpop.f32.mrb[14].mxu0 }
 0x115   :  { %v919_v13 = vpop.f32.mrb[15].mxu0  ;;  %v426_v35 = vadd.f32 %v394_v49, %v230_v41 }
 0x116   :  { %v617_v60 = vadd.f32 %v585_v16, %v421_v21  ;;  %v620_v44 = vadd.f32 %v588_v33, %v424_v2  ;;  %v425_v16 = vadd.f32 %v393_v3, %v229_v17  ;;  %v428_v33 = vadd.f32 %v396_v9, %v232_v1 }
 0x117   :  { %v484_v6 = vpop.permute.xlu1 %483  ;;  %v496_v37 = vpop.permute.xlu0 %495  ;;  %v233_v17 = vmul.f32 %v2173_v18, %v2034_v25 }
 0x118   :  { %v2327_v22 = vadd.f32 %v2235_v57, %v617_v60  ;;  %v2330_v51 = vadd.f32 %v2255_v39, %v620_v44  ;;  %v587_v21 = vmul.f32 %v2209_v43, %v484_v6  ;;  %v590_v2 = vmul.f32 %v2209_v43, %v496_v37 }
 0x119   :  { %v395_v57 = vmul.f32 %v2175_v20, %v2126_v8  ;;  %v398_v39 = vmul.f32 %v2175_v20, %v2136_v30  ;;  %v234_v8 = vmul.f32 %v2173_v18, %v2042_v32  ;;  %v397_v30 = vmul.f32 %v2175_v20, %v2132_v11 }
 0x11a   :  { %v619_v49 = vadd.f32 %v587_v21, %v423_v45  ;;  %v622_v28 = vadd.f32 %v590_v2, %v426_v35  ;;  %v231_v45 = vmul.f32 %v2173_v18, %v2028_v19  ;;  %v236_v11 = vmul.f32 %v2173_v18, %v2048_v34 }
 0x11b   :  { %v492_v4 = vpop.permute.xlu1 %491  ;;  %v504_v41 = vpop.permute.xlu0 %503 }
 0x11c   :  { %v2342_v60 = vadd.f32 %v903_v24, %v619_v49  ;;  %v2344_v44 = vadd.f32 %v916_v47, %v622_v28  ;;  %v589_v15 = vmul.f32 %v2209_v43, %v492_v4  ;;  %v592_v26 = vmul.f32 %v2209_v43, %v504_v41 }
 0x11d   :  { %v427_v9 = vadd.f32 %v395_v57, %v231_v45  ;;  %v430_v24 = vadd.f32 %v398_v39, %v234_v8  ;;  %v400_v47 = vmul.f32 %v2175_v20, %v2142_v36  ;;  %v429_v36 = vadd.f32 %v397_v30, %v233_v17  ;;  %v2621_v8 = vld [vmem:[#allocation14_spill] sm:$0xff]  ;;  %v2622_v30 = vld [vmem:[#allocation21_spill] sm:$0xff] }
 0x11e   :  { %v621_v3 = vadd.f32 %v589_v15, %v425_v16  ;;  %v624_v35 = vadd.f32 %v592_v26, %v428_v33  ;;  %v399_v28 = vmul.f32 %v2175_v20, %v2138_v14  ;;  %v235_v4 = vmul.f32 %v2173_v18, %v2040_v31  ;;  %v2620_v26 = vld [vmem:[#allocation12_spill] sm:$0xff] }
 0x11f   :  { %v500_v6 = vpop.permute.xlu1 %499  ;;  %v512_v37 = vpop.permute.xlu0 %511  ;;  %v238_v14 = vmul.f32 %v2173_v18, %v2054_v40 }
 0x120   :  { %v2357_v21 = vadd.f32 %v2276_v58, %v621_v3  ;;  %v2359_v2 = vadd.f32 %v1592_v62, %v624_v35  ;;  %v591_v19 = vmul.f32 %v2209_v43, %v500_v6  ;;  %v594_v32 = vmul.f32 %v2209_v43, %v512_v37  ;;  %v2624_v37 = vld [vmem:[#allocation5_spill] sm:$0xff] }
 0x121   :  { %v432_v58 = vadd.f32 %v400_v47, %v236_v11  ;;  %v402_v62 = vmul.f32 %v2175_v20, %v2148_v38  ;;  %v431_v38 = vadd.f32 %v399_v28, %v235_v4  ;;  %v2623_v47 = vld [vmem:[#allocation2_spill] sm:$0xff] }
 0x122   :  { %v623_v1 = vadd.f32 %v591_v19, %v427_v9  ;;  %v626_v49 = vadd.f32 %v594_v32, %v430_v24  ;;  %v237_v6 = vmul.f32 %v2173_v18, %v2623_v47  ;;  %v240_v19 = vmul.f32 %v2173_v18, %v2624_v37 }
 0x123   :  { %v508_v16 = vpop.permute.xlu1 %507  ;;  %v520_v57 = vpop.permute.xlu0 %519  ;;  %v434_v45 = vadd.f32 %v402_v62, %v238_v14 }
 0x124   :  { %v2371_v33 = vadd.f32 %v919_v13, %v623_v1  ;;  %v2374_v39 = vadd.f32 %v2188_v29, %v626_v49  ;;  %v593_v25 = vmul.f32 %v2209_v43, %v508_v16  ;;  %v596_v34 = vmul.f32 %v2209_v43, %v520_v57  ;;  %v2625_v1 = vld [vmem:[#allocation13_spill] sm:$0xff] }
 0x125   :  { %v401_v13 = vmul.f32 %v2175_v20, %v2620_v26  ;;  %v404_v29 = vmul.f32 %v2175_v20, %v2621_v8  ;;  %v2627_v16 = vld [vmem:[#allocation25_spill] sm:$0xff] }
 0x126   :  { %v625_v41 = vadd.f32 %v593_v25, %v429_v36  ;;  %v628_v15 = vadd.f32 %v596_v34, %v432_v58  ;;  %v2626_v36 = vld [vmem:[#allocation16_spill] sm:$0xff] }
 0x127   :  { %v516_v3 = vpop.permute.xlu1 %515  ;;  %v528_v35 = vpop.permute.xlu0 %527  ;;  %v433_v11 = vadd.f32 %v401_v13, %v237_v6  ;;  %v436_v49 = vadd.f32 %v404_v29, %v240_v19  ;;  %v406_v28 = vmul.f32 %v2175_v20, %v2626_v36  ;;  %v2628_v25 = vld [vmem:[#allocation28_spill] sm:$0xff]  ;;  %v2631_v29 = vld [vmem:[#allocation15_spill] sm:$0xff] }
 0x128   :  { %v2387_v9 = vadd.f32 %v2316_v10, %v625_v41  ;;  %v2390_v31 = vadd.f32 %v2622_v30, %v628_v15  ;;  %v595_v40 = vmul.f32 %v2209_v43, %v516_v3  ;;  %v598_v24 = vmul.f32 %v2209_v43, %v528_v35  ;;  %v2629_v41 = vld [vmem:[#allocation3_spill] sm:$0xff]  ;;  %v2632_v30 = vld [vmem:[#allocation18_spill] sm:$0xff] }
 0x129   :  { %v403_v10 = vmul.f32 %v2175_v20, %v2625_v1  ;;  %v239_v15 = vmul.f32 %v2173_v18, %v2629_v41  ;;  %v405_v3 = vmul.f32 %v2175_v20, %v2631_v29  ;;  %v2633_v6 = vld [vmem:[#allocation23_spill] sm:$0xff]  ;;  %v2635_v1 = vld [vmem:[#allocation4_spill] sm:$0xff] }
 0x12a   :  { %v627_v32 = vadd.f32 %v595_v40, %v431_v38  ;;  %v630_v17 = vadd.f32 %v598_v24, %v434_v45  ;;  %v2630_v38 = vld [vmem:[#allocation7_spill] sm:$0xff]  ;;  %v408_v40 = vmul.f32 %v2175_v20, %v2632_v30 }
 0x12b   :  { %v524_v58 = vpop.permute.xlu1 %523  ;;  %v536_v62 = vpop.permute.xlu0 %535  ;;  %v242_v26 = vmul.f32 %v2173_v18, %v2630_v38  ;;  %v435_v8 = vadd.f32 %v403_v10, %v239_v15  ;;  %v2634_v19 = vld [vmem:[#allocation27_spill] sm:$0xff]  ;;  %v241_v10 = vmul.f32 %v2173_v18, %v2635_v1 }
 0x12c   :  { %v2403_v57 = vadd.f32 %v2627_v16, %v627_v32  ;;  %v2406_v34 = vadd.f32 %v2628_v25, %v630_v17  ;;  %v597_v4 = vmul.f32 %v2209_v43, %v524_v58  ;;  %v600_v14 = vmul.f32 %v2209_v43, %v536_v62  ;;  %v2637_v16 = vld [vmem:[#allocation17_spill] sm:$0xff]  ;;  %v2639_v30 = vld [vmem:[#allocation19_spill] sm:$0xff] }
 0x12d   :  { %v438_v35 = vadd.f32 %v406_v28, %v242_v26  ;;  %v437_v62 = vadd.f32 %v405_v3, %v241_v10  ;;  %v407_v25 = vmul.f32 %v2175_v20, %v2637_v16  ;;  %v2641_v10 = vld [vmem:[#allocation22_spill] sm:$0xff] }
 0x12e   :  { %v629_v13 = vadd.f32 %v597_v4, %v433_v11  ;;  %v632_v45 = vadd.f32 %v600_v14, %v436_v49  ;;  %v2636_v49 = vld [vmem:[#allocation9_spill] sm:$0xff] }
 0x12f   :  { %v532_v24 = vpop.permute.xlu1 %531  ;;  %v544_v47 = vpop.permute.xlu0 %543  ;;  %v244_v36 = vmul.f32 %v2173_v18, %v2636_v49 }
 0x130   :  { %v2419_v37 = vadd.f32 %v2633_v6, %v629_v13  ;;  %v2422_v32 = vadd.f32 %v2634_v19, %v632_v45  ;;  %v599_v17 = vmul.f32 %v2209_v43, %v532_v24  ;;  %v602_v11 = vmul.f32 %v2209_v43, %v544_v47  ;;  %v2638_v45 = vld [vmem:[#allocation6_spill] sm:$0xff] }
 0x131   :  { %v440_v4 = vadd.f32 %v408_v40, %v244_v36  ;;  %v409_v40 = vmul.f32 %v2175_v20, %v2639_v30 }
 0x132   :  { %v631_v28 = vadd.f32 %v599_v17, %v435_v8  ;;  %v634_v58 = vadd.f32 %v602_v11, %v438_v35  ;;  %v243_v8 = vmul.f32 %v2173_v18, %v2638_v45  ;;  %v2640_v17 = vld [vmem:[#allocation8_spill] sm:$0xff] }
 0x133   :  { %v540_v14 = vpop.permute.xlu1 %539  ;;  %v552_v41 = vpop.permute.xlu0 %551  ;;  %v245_v11 = vmul.f32 %v2173_v18, %v2640_v17 }
 0x134   :  { %v2433_v15 = vadd.f32 %v2239_v56, %v631_v28  ;;  %v2436_v38 = vadd.f32 %v2270_v46, %v634_v58  ;;  %v601_v26 = vmul.f32 %v2209_v43, %v540_v14  ;;  %v604_v13 = vmul.f32 %v2209_v43, %v552_v41  ;;  %v2642_v28 = vld [vmem:[#allocation20_spill] sm:$0xff]  ;;  %v2643_v14 = vld [vmem:[#allocation10_spill] sm:$0xff] }
 0x135   :  { %v439_v35 = vadd.f32 %v407_v25, %v243_v8  ;;  %v441_v36 = vadd.f32 %v409_v40, %v245_v11  ;;  %v411_v58 = vmul.f32 %v2175_v20, %v2642_v28  ;;  %v247_v41 = vmul.f32 %v2173_v18, %v2643_v14 }
 0x136   :  { %v633_v29 = vadd.f32 %v601_v26, %v437_v62  ;;  %v636_v3 = vadd.f32 %v604_v13, %v440_v4  ;;  %v2644_v13 = vld [vmem:[#allocation26_spill] sm:$0xff] }
 0x137   :  { %v548_v24 = vpop.permute.xlu1 %547  ;;  %v560_v47 = vpop.permute.xlu0 %559  ;;  %v443_v8 = vadd.f32 %v411_v58, %v247_v41 }
 0x138   :  { %v2445_v56 = vadd.f32 %v2237_v23, %v633_v29  ;;  %v2448_v46 = vadd.f32 %v2257_v48, %v636_v3  ;;  %v603_v6 = vmul.f32 %v2209_v43, %v548_v24  ;;  %v606_v19 = vmul.f32 %v2209_v43, %v560_v47  ;;  %v2645_v3 = vld [vmem:[#allocation24_spill] sm:$0xff]  ;;  %v2646_v47 = vld [vmem:[#allocation11_spill] sm:$0xff] }
 0x13a   :  { %v635_v1 = vadd.f32 %v603_v6, %v439_v35  ;;  %v638_v49 = vadd.f32 %v606_v19, %v2641_v10  ;;  %v413_v35 = vmul.f32 %v2175_v20, %v2645_v3  ;;  %v249_v6 = vmul.f32 %v2173_v18, %v2646_v47 }
 0x13b   :  { %v556_v62 = vpop.permute.xlu1 %555  ;;  %v568_v23 = vpop.permute.xlu0 %567 }
 0x13c   :  { %v2458_v16 = vadd.f32 %v2280_v42, %v635_v1  ;;  %v2461_v48 = vadd.f32 %v2310_v55, %v638_v49  ;;  %v605_v25 = vmul.f32 %v2209_v43, %v556_v62  ;;  %v608_v4 = vmul.f32 %v2209_v43, %v568_v23  ;;  %v2473_v42 = vld [vmem:[%s2591_s4] ss:$0 sm:$0xff] }
 0x13d   :  { %v1034_v20 = vadd.f32 %v2473_v42, %v2245_v54  ;;  %v1035_v17 = vadd.f32 %v2473_v42, %v2247_v27  ;;  %v445_v1 = vadd.f32 %v413_v35, %v249_v6  ;;  %v1037_v18 = vadd.f32 %v2473_v42, %v2287_v12 }
 0x13e   :  { %v637_v26 = vadd.f32 %v605_v25, %v441_v36  ;;  %v640_v45 = vadd.f32 %v608_v4, %v2644_v13  ;;  %v1036_v54 = vadd.f32 %v2473_v42, %v2264_v61  ;;  %v1039_v25 = vadd.f32 %v2473_v42, %v2304_v50 }
 0x13f   :  { %v564_v29 = vpop.permute.xlu1 %563  ;;  %v1066_v36 = vmax.f32 %v1034_v20, 0.0  ;;  %v1067_v28 = vmax.f32 %v1035_v17, 0.0  ;;  %v1069_v4 = vmax.f32 %v1037_v18, 0.0 }
 0x140   :  { %v2476_v55 = vadd.f32 %v2278_v0, %v637_v26  ;;  %v2479_v30 = vadd.f32 %v2298_v53, %v640_v45  ;;  %v607_v40 = vmul.f32 %v2209_v43, %v564_v29  ;;  %v1100_v24 = vpop.permute.xlu0 %1099  ;;  %v1068_v12 = vmax.f32 %v1036_v54, 0.0 }
 0x141   :  { %v1226_v23 = vmul.f32 %v1100_v24, %v1066_v36  ;;  %v1071_v3 = vmax.f32 %v1039_v25, 0.0 }
 0x142   :  { %v639_v19 = vadd.f32 %v607_v40, %v443_v8 }
 0x143   :  { %v572_v11 = vpop.permute.xlu1 %571 }
 0x144   :  { %v2489_v0 = vadd.f32 %v2320_v59, %v639_v19  ;;  %v609_v53 = vmul.f32 %v2209_v43, %v572_v11  ;;  %v1112_v10 = vpop.permute.xlu0 %1111  ;;  %v1038_v43 = vadd.f32 %v2473_v42, %v2266_v7  ;;  %v1040_v7 = vadd.f32 %v2473_v42, %v2290_v52 }
 0x145   :  { %v1229_v13 = vmul.f32 %v1112_v10, %v1069_v4  ;;  %v2513_v52 = vadd.f32 %v2473_v42, %v2330_v51 }
 0x146   :  { %v641_v49 = vadd.f32 %v609_v53, %v445_v1  ;;  %v1070_v8 = vmax.f32 %v1038_v43, 0.0  ;;  %v1072_v53 = vmax.f32 %v1040_v7, 0.0  ;;  %v1054_v7 = vadd.f32 %v2473_v42, %v2406_v34 }
 0x148   :  { %v2497_v58 = vadd.f32 %v2318_v63, %v641_v49  ;;  %v1104_v27 = vpop.permute.xlu1 %1103  ;;  %v1120_v62 = vpop.permute.xlu0 %1119  ;;  %v1041_v63 = vadd.f32 %v2473_v42, %v2327_v22  ;;  %v2509_v22 = vadd.f32 %v2473_v42, %v2306_v5 }
 0x149   :  { %v1227_v59 = vmul.f32 %v1104_v27, %v1067_v28  ;;  %v1231_v47 = vmul.f32 %v1120_v62, %v1071_v3  ;;  %v1050_v62 = vadd.f32 %v2473_v42, %v2374_v39  ;;  %v1043_v39 = vadd.f32 %v2473_v42, %v2342_v60 }
 0x14a   :  { %v1073_v20 = vmax.f32 %v1041_v63, 0.0 }
 0x14b   :  { %v1258_v14 = vmax.f32 %v1226_v23, %v1227_v59  ;;  %v1051_v23 = vadd.f32 %v2473_v42, %v2403_v57  ;;  %v1082_v57 = vmax.f32 %v1050_v62, 0.0 }
 0x14c   :  { %v1108_v41 = vpop.permute.xlu1 %1107  ;;  %v1128_v26 = vpop.permute.xlu0 %1127 }
 0x14d   :  { %v1259_v61 = vrot.slane %v1258_v14, 4  ;;  %v1228_v45 = vmul.f32 %v1108_v41, %v1068_v12  ;;  %v1233_v10 = vmul.f32 %v1128_v26, %v1073_v20  ;;  %v1083_v3 = vmax.f32 %v1051_v23, 0.0 }
 0x14f   :  { %v1260_v29 = vmax.f32 %v1258_v14, %v1259_v61  ;;  %v1265_v35 = vmax.f32 %v1228_v45, %v1229_v13  ;;  %v1074_v14 = vmax.f32 %v2509_v22, 0.0  ;;  %v1076_v13 = vmax.f32 %v2513_v52, 0.0 }
 0x150   :  { %v1116_v40 = vpop.permute.xlu1 %1115  ;;  %v1164_v50 = vpop.permute.xlu0 %1163  ;;  %v1052_v45 = vadd.f32 %v2473_v42, %v2390_v31 }
 0x151   :  { %v1261_v24 = vrot.slane %v1260_v29, 2  ;;  %v1266_v6 = vrot.slane %v1265_v35, 4  ;;  %v1230_v19 = vmul.f32 %v1116_v40, %v1070_v8  ;;  %v1242_v40 = vmul.f32 %v1164_v50, %v1082_v57 }
 0x153   :  { %v1262_v17 = vmax.f32 %v1260_v29, %v1261_v24  ;;  %v1267_v11 = vmax.f32 %v1265_v35, %v1266_v6  ;;  %v1272_v1 = vmax.f32 %v1230_v19, %v1231_v47  ;;  %v2527_v35 = vadd.f32 %v2473_v42, %v2344_v44 }
 0x154   :  { %v1124_v49 = vpop.permute.xlu1 %1123  ;;  %v1172_v36 = vpop.permute.xlu0 %1171  ;;  %v1053_v47 = vadd.f32 %v2473_v42, %v2419_v37  ;;  %v1084_v44 = vmax.f32 %v1052_v45, 0.0 }
 0x155   :  { %v1263_v18 = vrot.slane %v1262_v17, 1  ;;  %v1268_v28 = vrot.slane %v1267_v11, 2  ;;  %v1273_v54 = vrot.slane %v1272_v1, 4  ;;  %v1232_v27 = vmul.f32 %v1124_v49, %v1072_v53 }
 0x156   :  { %v1056_v49 = vadd.f32 %v2473_v42, %v2422_v32 }
 0x157   :  { %v1264_v59 = vmax.f32 %v1262_v17, %v1263_v18  ;;  %v1269_v5 = vmax.f32 %v1267_v11, %v1268_v28  ;;  %v1274_v43 = vmax.f32 %v1272_v1, %v1273_v54  ;;  %v1279_v25 = vmax.f32 %v1232_v27, %v1233_v10 }
 0x158   :  { %v1132_v4 = vpop.permute.xlu1 %1131  ;;  %v1180_v51 = vpop.permute.xlu0 %1179  ;;  %v1055_v17 = vadd.f32 %v2473_v42, %v2433_v15  ;;  %v1075_v1 = vmax.f32 %v1043_v39, 0.0  ;;  %v1086_v10 = vmax.f32 %v1054_v7, 0.0  ;;  %v1085_v18 = vmax.f32 %v1053_v47, 0.0 }
 0x159   :  { %v1270_v12 = vrot.slane %v1269_v5, 1  ;;  %v1275_v41 = vrot.slane %v1274_v43, 2  ;;  %v1280_v26 = vrot.slane %v1279_v25, 4  ;;  %v1522_v61 = vpack.c.bf16 %v1264_v59, %v1264_v59 }
 0x15a   :  { %v1057_v54 = vadd.f32 %v2473_v42, %v2445_v56  ;;  %v1244_v59 = vmul.f32 %v1172_v36, %v1084_v44  ;;  %v1087_v39 = vmax.f32 %v1055_v17, 0.0  ;;  %v1246_v32 = vmul.f32 %v1180_v51, %v1086_v10 }
 0x15b   :  { %v1271_v63 = vmax.f32 %v1269_v5, %v1270_v12  ;;  %v1276_v8 = vmax.f32 %v1274_v43, %v1275_v41  ;;  %v1281_v29 = vmax.f32 %v1279_v25, %v1280_v26  ;;  %v1434_v11 = vunpack.c.l.b16 %v1522_v61 }
 0x15c   :  { %v1168_v24 = vpop.permute.xlu1 %1167  ;;  %v1188_v60 = vpop.permute.xlu0 %1187  ;;  %v1234_v5 = vmul.f32 %v1132_v4, %v1074_v14  ;;  %v1088_v61 = vmax.f32 %v1056_v49, 0.0  ;;  %v1058_v36 = vadd.f32 %v2473_v42, %v2436_v38 }
 0x15d   :  { %v1523_v6 = vpack.c.bf16 %v1271_v63, %v1271_v63  ;;  %v1277_v19 = vrot.slane %v1276_v8, 1  ;;  %v1282_v31 = vrot.slane %v1281_v29, 2  ;;  %v1243_v20 = vmul.f32 %v1168_v24, %v1083_v3 }
 0x15e   :  { %v1059_v24 = vadd.f32 %v2473_v42, %v2458_v16  ;;  %v1090_v10 = vmax.f32 %v1058_v36, 0.0  ;;  %v1078_v16 = vmax.f32 %v2527_v35, 0.0  ;;  %v1065_v35 = vadd.f32 %v2473_v42, %v2497_v58 }
 0x15f   :  { %v1435_v53 = vunpack.c.l.b16 %v1523_v6  ;;  %v1278_v22 = vmax.f32 %v1276_v8, %v1277_v19  ;;  %v1283_v34 = vmax.f32 %v1281_v29, %v1282_v31  ;;  %v1314_v50 = vmax.f32 %v1242_v40, %v1243_v20 }
 0x160   :  { %v1176_v37 = vpop.permute.xlu1 %1175  ;;  %v1136_v28 = vpop.permute.xlu0 %1135  ;;  %v1089_v40 = vmax.f32 %v1057_v54, 0.0  ;;  %v1248_v19 = vmul.f32 %v1188_v60, %v1088_v61  ;;  %v1091_v60 = vmax.f32 %v1059_v24, 0.0  ;;  %v1097_v58 = vmax.f32 %v1065_v35, 0.0 }
 0x161   :  { %v1451_v15 = vsel %vm1450_vm0, %v1435_v53, %v1434_v11  ;;  %v1524_v27 = vpack.c.bf16 %v1278_v22, %v1278_v22  ;;  %v1284_v62 = vrot.slane %v1283_v34, 1  ;;  %v1315_v23 = vrot.slane %v1314_v50, 4 }
 0x162   :  { %v1245_v43 = vmul.f32 %v1176_v37, %v1085_v18  ;;  %v1235_v25 = vmul.f32 %v1136_v28, %v1075_v1  ;;  %v1045_v11 = vadd.f32 %v2473_v42, %v2357_v21  ;;  %v1060_v18 = vadd.f32 %v2473_v42, %v2448_v46 }
 0x163   :  { %v1436_v12 = vunpack.c.l.b16 %v1524_v27  ;;  %v1285_v41 = vmax.f32 %v1283_v34, %v1284_v62  ;;  %v1316_v26 = vmax.f32 %v1314_v50, %v1315_v23 }
 0x164   :  { %v1321_v57 = vmax.f32 %v1244_v59, %v1245_v43  ;;  %v1286_v45 = vmax.f32 %v1234_v5, %v1235_v25  ;;  %v1184_v63 = vpop.permute.xlu1 %1183  ;;  %v1200_v8 = vpop.permute.xlu0 %1199  ;;  %v1047_v25 = vadd.f32 %v2473_v42, %v2371_v33  ;;  %v1092_v61 = vmax.f32 %v1060_v18, 0.0 }
 0x165   :  { %v1453_v56 = vsel %vm1452_vm1, %v1436_v12, %v1451_v15  ;;  %v1525_v29 = vpack.c.bf16 %v1285_v41, %v1285_v41  ;;  %v1317_v3 = vrot.slane %v1316_v26, 2  ;;  %v1247_v7 = vmul.f32 %v1184_v63, %v1087_v39 }
 0x166   :  { %v1322_v4 = vrot.slane %v1321_v57, 4  ;;  %v1287_v14 = vrot.slane %v1286_v45, 4  ;;  %v1077_v15 = vmax.f32 %v1045_v11, 0.0  ;;  %v1251_v59 = vmul.f32 %v1200_v8, %v1091_v60 }
 0x167   :  { %v1437_v51 = vunpack.c.l.b16 %v1525_v29  ;;  %v1318_v47 = vmax.f32 %v1316_v26, %v1317_v3  ;;  %v1328_v6 = vmax.f32 %v1246_v32, %v1247_v7  ;;  %v1061_v26 = vadd.f32 %v2473_v42, %v2476_v55 }
 0x168   :  { %v1323_v31 = vmax.f32 %v1321_v57, %v1322_v4  ;;  %v1288_v20 = vmax.f32 %v1286_v45, %v1287_v14  ;;  %v1192_v17 = vpop.permute.xlu1 %1191  ;;  %v1144_v44 = vpop.permute.xlu0 %1143  ;;  %v1062_v4 = vadd.f32 %v2473_v42, %v2461_v48 }
 0x169   :  { %v1455_v1 = vsel %vm1454_vm2, %v1437_v51, %v1453_v56  ;;  %v1319_v38 = vrot.slane %v1318_v47, 1  ;;  %v1329_v53 = vrot.slane %v1328_v6, 4  ;;  %v1249_v22 = vmul.f32 %v1192_v17, %v1089_v40 }
 0x16a   :  { %v1324_v34 = vrot.slane %v1323_v31, 2  ;;  %v1289_v50 = vrot.slane %v1288_v20, 2  ;;  %v1237_v56 = vmul.f32 %v1144_v44, %v1077_v15  ;;  %v1093_v40 = vmax.f32 %v1061_v26, 0.0 }
 0x16b   :  { %v1330_v49 = vmax.f32 %v1328_v6, %v1329_v53  ;;  %v1335_v37 = vmax.f32 %v1248_v19, %v1249_v22  ;;  %v1320_v28 = vmax.f32 %v1318_v47, %v1319_v38  ;;  %v1063_v19 = vadd.f32 %v2473_v42, %v2489_v0 }
 0x16c   :  { %v1325_v21 = vmax.f32 %v1323_v31, %v1324_v34  ;;  %v1290_v54 = vmax.f32 %v1288_v20, %v1289_v50  ;;  %v1196_v27 = vpop.permute.xlu1 %1195  ;;  %v1208_v62 = vpop.permute.xlu0 %1207 }
 0x16d   :  { %v1331_v23 = vrot.slane %v1330_v49, 2  ;;  %v1336_v5 = vrot.slane %v1335_v37, 4  ;;  %v1250_v43 = vmul.f32 %v1196_v27, %v1090_v10  ;;  %v1530_v57 = vpack.c.bf16 %v1320_v28, %v1320_v28 }
 0x16e   :  { %v1326_v12 = vrot.slane %v1325_v21, 1  ;;  %v1291_v41 = vrot.slane %v1290_v54, 1  ;;  %v1253_v34 = vmul.f32 %v1208_v62, %v1093_v40 }
 0x16f   :  { %v1332_v39 = vmax.f32 %v1330_v49, %v1331_v23  ;;  %v1337_v46 = vmax.f32 %v1335_v37, %v1336_v5  ;;  %v1342_v32 = vmax.f32 %v1250_v43, %v1251_v59  ;;  %v1442_v31 = vunpack.c.l.b16 %v1530_v57 }
 0x170   :  { %v1327_v45 = vmax.f32 %v1325_v21, %v1326_v12  ;;  %v1292_v63 = vmax.f32 %v1290_v54, %v1291_v41  ;;  %v1140_v29 = vpop.permute.xlu1 %1139  ;;  %v1152_v8 = vpop.permute.xlu0 %1151  ;;  %v1079_v37 = vmax.f32 %v1047_v25, 0.0  ;;  %v1049_v21 = vadd.f32 %v2473_v42, %v2387_v9 }
 0x171   :  { %v1333_v3 = vrot.slane %v1332_v39, 1  ;;  %v1338_v7 = vrot.slane %v1337_v46, 2  ;;  %v1343_v36 = vrot.slane %v1342_v32, 4  ;;  %v1236_v33 = vmul.f32 %v1140_v29, %v1076_v13 }
 0x172   :  { %v1531_v55 = vpack.c.bf16 %v1327_v45, %v1327_v45  ;;  %v1526_v14 = vpack.c.bf16 %v1292_v63, %v1292_v63  ;;  %v1048_v54 = vadd.f32 %v2473_v42, %v2359_v2  ;;  %v1239_v62 = vmul.f32 %v1152_v8, %v1079_v37 }
 0x173   :  { %v1334_v24 = vmax.f32 %v1332_v39, %v1333_v3  ;;  %v1339_v51 = vmax.f32 %v1337_v46, %v1338_v7  ;;  %v1344_v47 = vmax.f32 %v1342_v32, %v1343_v36  ;;  %v1293_v6 = vmax.f32 %v1236_v33, %v1237_v56 }
 0x174   :  { %v1443_v20 = vunpack.c.l.b16 %v1531_v55  ;;  %v1438_v17 = vunpack.c.l.b16 %v1526_v14  ;;  %v1204_v11 = vpop.permute.xlu1 %1203  ;;  %v1216_v53 = vpop.permute.xlu0 %1215  ;;  %v1095_v5 = vmax.f32 %v1063_v19, 0.0  ;;  %v1094_v39 = vmax.f32 %v1062_v4, 0.0 }
 0x175   :  { %v1532_v44 = vpack.c.bf16 %v1334_v24, %v1334_v24  ;;  %v1340_v52 = vrot.slane %v1339_v51, 1  ;;  %v1345_v13 = vrot.slane %v1344_v47, 2  ;;  %v1294_v38 = vrot.slane %v1293_v6, 4 }
 0x176   :  { %v1464_v48 = vsel %vm1450_vm0, %v1443_v20, %v1442_v31  ;;  %v2563_v22 = vsel %vm1456_vm3, %v1438_v17, %v1455_v1  ;;  %v1252_v50 = vmul.f32 %v1204_v11, %v1092_v61  ;;  %v1255_v46 = vmul.f32 %v1216_v53, %v1095_v5 }
 0x177   :  { %v1444_v10 = vunpack.c.l.b16 %v1532_v44  ;;  %v1341_v49 = vmax.f32 %v1339_v51, %v1340_v52  ;;  %v1346_v60 = vmax.f32 %v1344_v47, %v1345_v13  ;;  %v1295_v0 = vmax.f32 %v1293_v6, %v1294_v38 }
 0x178   :  { %v1349_v18 = vmax.f32 %v1252_v50, %v1253_v34  ;;  %v1148_v28 = vpop.permute.xlu1 %1147  ;;  %v1160_v26 = vpop.permute.xlu0 %1159  ;;  %v1080_v61 = vmax.f32 %v1048_v54, 0.0  ;;  %v1081_v3 = vmax.f32 %v1049_v21, 0.0  ;;  %v1064_v33 = vadd.f32 %v2473_v42, %v2479_v30 }
 0x179   :  { %v1465_v15 = vsel %vm1452_vm1, %v1444_v10, %v1464_v48  ;;  %v1533_v27 = vpack.c.bf16 %v1341_v49, %v1341_v49  ;;  %v1347_v1 = vrot.slane %v1346_v60, 1  ;;  %v1296_v23 = vrot.slane %v1295_v0, 2 }
 0x17a   :  { %v1350_v59 = vrot.slane %v1349_v18, 4  ;;  %v1238_v43 = vmul.f32 %v1148_v28, %v1078_v16  ;;  %v1241_v14 = vmul.f32 %v1160_v26, %v1081_v3  ;;  %v1096_v52 = vmax.f32 %v1064_v33, 0.0 }
 0x17b   :  { %v1445_v25 = vunpack.c.l.b16 %v1533_v27  ;;  %v1348_v12 = vmax.f32 %v1346_v60, %v1347_v1  ;;  %v1297_v41 = vmax.f32 %v1295_v0, %v1296_v23 }
 0x17c   :  { %v1351_v9 = vmax.f32 %v1349_v18, %v1350_v59  ;;  %v1300_v32 = vmax.f32 %v1238_v43, %v1239_v62  ;;  %v1212_v2 = vpop.permute.xlu1 %1211  ;;  %v1224_v6 = vpop.permute.xlu0 %1223 }
 0x17d   :  { %v1466_v57 = vsel %vm1454_vm2, %v1445_v25, %v1465_v15  ;;  %v1534_v45 = vpack.c.bf16 %v1348_v12, %v1348_v12  ;;  %v1298_v63 = vrot.slane %v1297_v41, 1  ;;  %v1254_v56 = vmul.f32 %v1212_v2, %v1094_v39 }
 0x17e   :  { %v1352_v29 = vrot.slane %v1351_v9, 2  ;;  %v1301_v8 = vrot.slane %v1300_v32, 4  ;;  %v1257_v30 = vmul.f32 %v1224_v6, %v1097_v58 }
 0x17f   :  { %v1446_v16 = vunpack.c.l.b16 %v1534_v45  ;;  %v1299_v7 = vmax.f32 %v1297_v41, %v1298_v63  ;;  %v1356_v36 = vmax.f32 %v1254_v56, %v1255_v46 }
 0x180   :  { %v1353_v4 = vmax.f32 %v1351_v9, %v1352_v29  ;;  %v1302_v55 = vmax.f32 %v1300_v32, %v1301_v8  ;;  %v1156_v40 = vpop.permute.xlu1 %1155 }
 0x181   :  { %v1467_v24 = vsel %vm1456_vm3, %v1446_v16, %v1466_v57  ;;  %v1527_v51 = vpack.c.bf16 %v1299_v7, %v1299_v7  ;;  %v1357_v47 = vrot.slane %v1356_v36, 4  ;;  %v1240_v19 = vmul.f32 %v1156_v40, %v1080_v61 }
 0x182   :  { %v1354_v31 = vrot.slane %v1353_v4, 1  ;;  %v1303_v20 = vrot.slane %v1302_v55, 2 }
 0x183   :  { %v1439_v17 = vunpack.c.l.b16 %v1527_v51  ;;  %v1358_v11 = vmax.f32 %v1356_v36, %v1357_v47  ;;  %v1307_v44 = vmax.f32 %v1240_v19, %v1241_v14 }
 0x184   :  { %v1355_v13 = vmax.f32 %v1353_v4, %v1354_v31  ;;  %v1304_v42 = vmax.f32 %v1302_v55, %v1303_v20  ;;  %v1220_v38 = vpop.permute.xlu1 %1219 }
 0x185   :  { %v1459_v53 = vsel %vm1458_vm4, %v1439_v17, %v2563_v22  ;;  %v1359_v48 = vrot.slane %v1358_v11, 2  ;;  %v1308_v34 = vrot.slane %v1307_v44, 4  ;;  %v1256_v50 = vmul.f32 %v1220_v38, %v1096_v52 }
 0x186   :  { %v1535_v10 = vpack.c.bf16 %v1355_v13, %v1355_v13  ;;  %v1305_v49 = vrot.slane %v1304_v42, 1 }
 0x187   :  { %v1360_v60 = vmax.f32 %v1358_v11, %v1359_v48  ;;  %v1309_v0 = vmax.f32 %v1307_v44, %v1308_v34  ;;  %v1363_v37 = vmax.f32 %v1256_v50, %v1257_v30 }
 0x188   :  { %v1447_v18 = vunpack.c.l.b16 %v1535_v10  ;;  %v1306_v28 = vmax.f32 %v1304_v42, %v1305_v49 }
 0x189   :  { %v1361_v21 = vrot.slane %v1360_v60, 1  ;;  %v1310_v54 = vrot.slane %v1309_v0, 2  ;;  %v1364_v15 = vrot.slane %v1363_v37, 4 }
 0x18a   :  { %v1468_v27 = vsel %vm1458_vm4, %v1447_v18, %v1467_v24  ;;  %v1528_v1 = vpack.c.bf16 %v1306_v28, %v1306_v28 }
 0x18b   :  { %v1362_v23 = vmax.f32 %v1360_v60, %v1361_v21  ;;  %v1311_v62 = vmax.f32 %v1309_v0, %v1310_v54  ;;  %v1365_v22 = vmax.f32 %v1363_v37, %v1364_v15 }
 0x18c   :  { %v1440_v59 = vunpack.c.l.b16 %v1528_v1 }
 0x18d   :  { %v1536_v5 = vpack.c.bf16 %v1362_v23, %v1362_v23  ;;  %v1312_v43 = vrot.slane %v1311_v62, 1  ;;  %v1366_v25 = vrot.slane %v1365_v22, 2 }
 0x18e   :  { %v1461_v12 = vsel %vm1460_vm5, %v1440_v59, %v1459_v53 }
 0x18f   :  { %v1448_v41 = vunpack.c.l.b16 %v1536_v5  ;;  %v1313_v26 = vmax.f32 %v1311_v62, %v1312_v43  ;;  %v1367_v39 = vmax.f32 %v1365_v22, %v1366_v25 }
 0x191   :  { %v1469_v9 = vsel %vm1460_vm5, %v1448_v41, %v1468_v27  ;;  %v1529_v46 = vpack.c.bf16 %v1313_v26, %v1313_v26  ;;  %v1368_v32 = vrot.slane %v1367_v39, 1 }
 0x193   :  { %v1441_v2 = vunpack.c.l.b16 %v1529_v46  ;;  %v1369_v61 = vmax.f32 %v1367_v39, %v1368_v32 }
 0x195   :  { %v1463_v57 = vsel %vm1462_vm6, %v1441_v2, %v1461_v12  ;;  %v1537_v45 = vpack.c.bf16 %v1369_v61, %v1369_v61 }
 0x196   :  { %v1471_v63 = vpack.c.b16 %v1463_v57, %v1463_v57 }
 0x197   :  { %v1449_v56 = vunpack.c.l.b16 %v1537_v45 }
 0x198   :  { %1475 = vst [vmem:[%s2592_s5] sm:$0xf] %v1471_v63 }
 0x199   :  { %v1470_v29 = vsel %vm1462_vm6, %v1449_v56, %v1469_v9 }
 0x19a   :  { %v1472_v8 = vpack.c.b16 %v1470_v29, %v1470_v29 }
 0x19c   :  { %1476 = vst [vmem:[%s2592_s5 + $0x4] sm:$0xf] %v1472_v8 }

// kernel: _forward.7
= control target key start
LH: loop header
LB: loop body
LE: loop exit
PB: predicated region body
PF: predicated region fallthrough
CT: control target
= control target key end

     0   :  { %v528_v0 = vmov 0.0   ;;  %vm529_vm0 = vmmov 0   ;;  %s702_s1 = inlined_call_operand.vmem [shape: bf16[128,128], index: 1, kind: input, shape index: {}]   ;;  %s703_s2 = inlined_call_operand.vmem [shape: bf16[128,128], index: 2, kind: input, shape index: {}]   ;;  %s704_s0 = inlined_call_operand.vmem [shape: bf16[16,128], index: 0, kind: input, shape index: {}]   ;;  %s705_s3 = inlined_call_operand.vmem [shape: bf16[128,128], index: 3, kind: input, shape index: {}]   ;;  %s706_s4 = inlined_call_operand.vmem [shape: f32[3,128], index: 4, kind: input, shape index: {}]   ;;  %s707_s5 = inlined_call_operand.vmem [shape: f32[16,128], index: 5, kind: output, shape index: {0}]   ;;  %s708_s6 = inlined_call_operand.vmem [shape: f32[16,128], index: 6, kind: output, shape index: {1}]   ;;  %s709_s7 = inlined_call_operand.vmem [shape: f32[16,128], index: 7, kind: output, shape index: {2}]  }
   0x1   :  { %441 = vmatprep.subr.bf16.mxu0 %v528_v0  ;;  %v503_v1 = vld [vmem:[%s702_s1] sm:$0xff]   ;;  %457 = vmatprep.mubr.msk.bf16.mxu0 %vm529_vm0, %v528_v0  ;;  %v504_v2 = vld [vmem:[%s702_s1 + $0x8] sm:$0xff]   ;;  %v505_v3 = vld [vmem:[%s702_s1 + $0x10] sm:$0xff]  }
   0x2   :  { %461 = vmatprep.subr.bf16.mxu1 %v528_v0  ;;  %477 = vmatprep.mubr.msk.bf16.mxu1 %vm529_vm0, %v528_v0  ;;  %v512_v4 = vld [vmem:[%s703_s2] sm:$0xff]   ;;  %v506_v5 = vld [vmem:[%s702_s1 + $0x18] sm:$0xff]   ;;  %v513_v6 = vld [vmem:[%s703_s2 + $0x8] sm:$0xff]  }
   0x3   :  { %442 = vmatpush3.bf16.msra.mxu0 %v503_v1  ;;  %462 = vmatpush3.bf16.msra.mxu1 %v512_v4  ;;  %v507_v7 = vld [vmem:[%s702_s1 + $0x20] sm:$0xff]   ;;  %v514_v8 = vld [vmem:[%s703_s2 + $0x10] sm:$0xff]   ;;  %v508_v9 = vld [vmem:[%s702_s1 + $0x28] sm:$0xff]  }
   0x4   :  { %443 = vmatprep.subr.bf16.mxu0 %v528_v0  ;;  %463 = vmatprep.subr.bf16.mxu1 %v528_v0  ;;  %v515_v10 = vld [vmem:[%s703_s2 + $0x18] sm:$0xff]   ;;  %v509_v11 = vld [vmem:[%s702_s1 + $0x30] sm:$0xff]   ;;  %v516_v12 = vld [vmem:[%s703_s2 + $0x20] sm:$0xff]  }
   0x5   :  { %v510_v13 = vld [vmem:[%s702_s1 + $0x38] sm:$0xff]   ;;  %v517_v14 = vld [vmem:[%s703_s2 + $0x28] sm:$0xff]   ;;  %v511_v15 = vld [vmem:[%s704_s0] sm:$0xff]  }
   0x6   :  { %v518_v16 = vld [vmem:[%s703_s2 + $0x30] sm:$0xff]   ;;  %v519_v17 = vld [vmem:[%s703_s2 + $0x38] sm:$0xff]   ;;  %v520_v18 = vld [vmem:[%s705_s3] sm:$0xff]  }
   0x7   :  { %444 = vmatpush3.bf16.msra.mxu0 %v504_v2  ;;  %464 = vmatpush3.bf16.msra.mxu1 %v513_v6  ;;  %v521_v19 = vld [vmem:[%s705_s3 + $0x8] sm:$0xff]   ;;  %v522_v20 = vld [vmem:[%s705_s3 + $0x10] sm:$0xff]   ;;  %v523_v21 = vld [vmem:[%s705_s3 + $0x18] sm:$0xff]  }
   0x8   :  { %445 = vmatprep.subr.bf16.mxu0 %v528_v0  ;;  %465 = vmatprep.subr.bf16.mxu1 %v528_v0  ;;  %v524_v22 = vld [vmem:[%s705_s3 + $0x20] sm:$0xff]   ;;  %v525_v23 = vld [vmem:[%s705_s3 + $0x28] sm:$0xff]   ;;  %v526_v34 = vld [vmem:[%s705_s3 + $0x30] sm:$0xff]  }
   0x9   :  { %v386_v24 = vld [vmem:[%s706_s4] ss:$0 sm:$0xff]  ;;  %v527_v35 = vld [vmem:[%s705_s3 + $0x38] sm:$0xff]   ;;  %v396_v36 = vld [vmem:[%s706_s4 + $0x1] ss:$0 sm:$0xff] }
   0xa   :  { %v405_v46 = vld [vmem:[%s706_s4 + $0x2] ss:$0 sm:$0xff] }
   0xb   :  { %446 = vmatpush3.bf16.msra.mxu0 %v505_v3  ;;  %466 = vmatpush3.bf16.msra.mxu1 %v514_v8 }
   0xc   :  { %447 = vmatprep.subr.bf16.mxu0 %v528_v0  ;;  %467 = vmatprep.subr.bf16.mxu1 %v528_v0 }
   0xf   :  { %448 = vmatpush3.bf16.msra.mxu0 %v506_v5  ;;  %468 = vmatpush3.bf16.msra.mxu1 %v515_v10 }
  0x10   :  { %449 = vmatprep.subr.bf16.mxu0 %v528_v0  ;;  %469 = vmatprep.subr.bf16.mxu1 %v528_v0 }
  0x13   :  { %450 = vmatpush3.bf16.msra.mxu0 %v507_v7  ;;  %470 = vmatpush3.bf16.msra.mxu1 %v516_v12 }
  0x14   :  { %451 = vmatprep.subr.bf16.mxu0 %v528_v0  ;;  %471 = vmatprep.subr.bf16.mxu1 %v528_v0 }
  0x17   :  { %452 = vmatpush3.bf16.msra.mxu0 %v508_v9  ;;  %472 = vmatpush3.bf16.msra.mxu1 %v517_v14 }
  0x18   :  { %453 = vmatprep.subr.bf16.mxu0 %v528_v0  ;;  %473 = vmatprep.subr.bf16.mxu1 %v528_v0 }
  0x1b   :  { %454 = vmatpush3.bf16.msra.mxu0 %v509_v11  ;;  %474 = vmatpush3.bf16.msra.mxu1 %v518_v16 }
  0x1c   :  { %455 = vmatprep.subr.bf16.mxu0 %v528_v0  ;;  %475 = vmatprep.subr.bf16.mxu1 %v528_v0 }
  0x1f   :  { %456 = vmatpush3.bf16.msra.mxu0 %v510_v13  ;;  %476 = vmatpush3.bf16.msra.mxu1 %v519_v17 }
  0x20   :  { %481 = vmatprep.subr.bf16.mxu0 %v528_v0 }
  0x22   :  { %458 = vmatmul.mubr.bf16.vlgmr.msra.gmra.mrb[0].mxu0 %v511_v15 }
  0x23   :  { %497 = vmatprep.mubr.msk.bf16.mxu0 %vm529_vm0, %v528_v0  ;;  %482 = vmatpush3.bf16.msra.mxu0 %v520_v18 }
  0x24   :  { %483 = vmatprep.subr.bf16.mxu0 %v528_v0 }
  0x27   :  { %484 = vmatpush3.bf16.msra.mxu0 %v521_v19 }
  0x28   :  { %485 = vmatprep.subr.bf16.mxu0 %v528_v0 }
  0x2b   :  { %486 = vmatpush3.bf16.msra.mxu0 %v522_v20 }
  0x2c   :  { %487 = vmatprep.subr.bf16.mxu0 %v528_v0 }
  0x2f   :  { %488 = vmatpush3.bf16.msra.mxu0 %v523_v21 }
  0x30   :  { %489 = vmatprep.subr.bf16.mxu0 %v528_v0 }
  0x33   :  { %490 = vmatpush3.bf16.msra.mxu0 %v524_v22 }
  0x34   :  { %491 = vmatprep.subr.bf16.mxu0 %v528_v0 }
  0x37   :  { %492 = vmatpush3.bf16.msra.mxu0 %v525_v23 }
  0x38   :  { %493 = vmatprep.subr.bf16.mxu0 %v528_v0 }
  0x3b   :  { %494 = vmatpush3.bf16.msra.mxu0 %v526_v34 }
  0x3c   :  { %495 = vmatprep.subr.bf16.mxu0 %v528_v0 }
  0x3f   :  { %496 = vmatpush3.bf16.msra.mxu0 %v527_v35 }
  0xf5   :  { %v135_v25 = vpop.f32.mrb[0].mxu0 }
  0xf6   :  { %v136_v26 = vadd.f32 %v386_v24, %v135_v25  ;;  %v459_v27 = vpop.f32.mrb[1].mxu0 }
  0xf7   :  { %v138_v28 = vpop.f32.mrb[2].mxu0 }
  0xf8   :  { %368 = vst [vmem:[%s707_s5] sm:$0xff] %v136_v26  ;;  %v139_v29 = vadd.f32 %v386_v24, %v138_v28  ;;  %v460_v30 = vpop.f32.mrb[3].mxu0  ;;  %v142_v31 = vmax.f32 %v136_v26, 0.0 }
  0xfa   :  { %v143_v32 = vmax.f32 %v139_v29, 0.0  ;;  %369 = vst [vmem:[%s707_s5 + $0x8] sm:$0xff] %v139_v29 }
  0xfc   :  { %v144_v33 = vpack.c.bf16 %v143_v32, %v142_v31 }
  0xfe   :  { %478 = vmatmul.mubr.bf16.vlgmr.msra.gmra.mrb[0].mxu1 %v144_v33 }
 0x1d1   :  { %v248_v37 = vpop.f32.mrb[0].mxu1 }
 0x1d2   :  { %v249_v38 = vadd.f32 %v396_v36, %v248_v37  ;;  %v479_v39 = vpop.f32.mrb[1].mxu1 }
 0x1d3   :  { %v251_v40 = vpop.f32.mrb[2].mxu1 }
 0x1d4   :  { %370 = vst [vmem:[%s708_s6] sm:$0xff] %v249_v38  ;;  %v252_v41 = vadd.f32 %v396_v36, %v251_v40  ;;  %v480_v42 = vpop.f32.mrb[3].mxu1  ;;  %v255_v43 = vmax.f32 %v249_v38, 0.0 }
 0x1d6   :  { %v256_v44 = vmax.f32 %v252_v41, 0.0  ;;  %371 = vst [vmem:[%s708_s6 + $0x8] sm:$0xff] %v252_v41 }
 0x1d8   :  { %v257_v45 = vpack.c.bf16 %v256_v44, %v255_v43 }
 0x1da   :  { %498 = vmatmul.mubr.bf16.vlgmr.msra.gmra.mrb[4].mxu0 %v257_v45 }
 0x2ad   :  { %v361_v47 = vpop.f32.mrb[4].mxu0 }
 0x2ae   :  { %v362_v48 = vadd.f32 %v405_v46, %v361_v47  ;;  %v499_v49 = vpop.f32.mrb[5].mxu0 }
 0x2af   :  { %v364_v50 = vpop.f32.mrb[6].mxu0 }
 0x2b0   :  { %372 = vst [vmem:[%s709_s7] sm:$0xff] %v362_v48  ;;  %v365_v51 = vadd.f32 %v405_v46, %v364_v50  ;;  %v500_v52 = vpop.f32.mrb[7].mxu0 }
 0x2b2   :  { %373 = vst [vmem:[%s709_s7 + $0x8] sm:$0xff] %v365_v51 }

</bundles_post_ra>
